<compile_context>
chip_gen: v5e
topology: v5e:2x2
jax: 0.10.0
libtpu: 0.0.40
codegen_flags: <defaults>
</compile_context>

<pallas_src>
import functools
import numpy as np
import jax
import jax.numpy as jnp
from jax.experimental import pallas as pl
from jax.experimental.pallas import tpu as pltpu

GAMMA_RELU = (0.5 * (1.0 - 1.0 / np.pi)) ** 0.5   # relu nonlinearity divisor
WS_EPS = 1e-4
C_OUT_PAD = 128      # all conv output channels zero-padded to one lane width

_VMEM = pl.BlockSpec(memory_space=pltpu.MemorySpace.VMEM)


def _round_up(x, m):
    return ((x + m - 1) // m) * m


def _pick_tm(m):
    """M tile: >=2 tiles when possible (v7x megacore), capped at 256 (MXU)."""
    m8 = _round_up(m, 8)
    if m8 < 128:
        return m8                       # tiny layer: one tile
    if m8 >= 512:
        return 256
    return min(256, _round_up(m8 // 2, 8))


# ----------------------------------------------------------------------------
# Fused conv-as-matmul kernel (single full-K dot per M tile):
#   out = patches(tm, K) @ w_std(K, 128) + bias  [+relu]  [+residual]
# Weights are already standardized / gain- and scale-folded at prep time.
# ----------------------------------------------------------------------------
def _conv_kernel(a_ref, w_ref, b_ref, *rest, relu_out, add_residual):
    if add_residual:
        res_ref, o_ref = rest
    else:
        (o_ref,) = rest
    y = jnp.dot(a_ref[...], w_ref[...], preferred_element_type=jnp.float32)
    y = y + b_ref[...]
    if relu_out:
        y = jnp.maximum(y, 0.0)
    if add_residual:
        y = res_ref[...].astype(jnp.float32) + y
    o_ref[...] = y.astype(o_ref.dtype)


def conv_matmul_pallas(patches, w_std, bias, residual, *, tm, relu_out,
                       out_dtype=jnp.bfloat16):
    m_pad, k_pad = patches.shape
    n_out = w_std.shape[1]                  # 128 (lane-dense output channels)
    add_res = residual is not None

    kernel = functools.partial(_conv_kernel, relu_out=relu_out,
                               add_residual=add_res)

    in_specs = [
        pl.BlockSpec((tm, k_pad), lambda mi: (mi, 0)),     # im2col patches
        pl.BlockSpec((k_pad, n_out), lambda mi: (0, 0)),   # standardized W
        pl.BlockSpec((1, n_out), lambda mi: (0, 0)),       # folded bias
    ]
    args = [patches, w_std, bias]
    if add_res:
        in_specs.append(pl.BlockSpec((tm, n_out), lambda mi: (mi, 0)))
        args.append(residual)

    return pl.pallas_call(
        kernel,
        out_shape=jax.ShapeDtypeStruct((m_pad, n_out), out_dtype),
        grid=(m_pad // tm,),
        in_specs=in_specs,
        out_specs=pl.BlockSpec((tm, n_out), lambda mi: (mi, 0)),
        compiler_params=pltpu.CompilerParams(
            dimension_semantics=("parallel",)),
    )(*args)


# ----------------------------------------------------------------------------
# Global-avg-pool + linear head (tiny: single whole-array VMEM call)
# ----------------------------------------------------------------------------
def _head_kernel(x_ref, w_ref, b_ref, o_ref):
    pooled = jnp.mean(x_ref[...].astype(jnp.float32), axis=1)   # (N, 128)
    o_ref[...] = (jnp.dot(pooled, w_ref[...],
                          preferred_element_type=jnp.float32) + b_ref[...])


def head(feat, w_t, bias):
    n = feat.shape[0]
    c = w_t.shape[1]
    return pl.pallas_call(
        _head_kernel,
        out_shape=jax.ShapeDtypeStruct((n, c), jnp.float32),
        in_specs=[_VMEM, _VMEM, _VMEM],
        out_specs=_VMEM,
    )(feat, w_t, bias)


# ----------------------------------------------------------------------------
# Hypernetwork weight generators (tiny parameter-prep; plain JAX, run ONCE)
# ----------------------------------------------------------------------------
def init_hypernet(key, out_dim, units=(16, 32, 64), noise_shape=1):
    params = []
    in_f = noise_shape
    for u in list(units) + [int(out_dim)]:
        key, kw, kb = jax.random.split(key, 3)
        bound = 1.0 / np.sqrt(in_f)
        w = jax.random.uniform(kw, (u, in_f), jnp.float32, -bound, bound)
        b = jax.random.uniform(kb, (u,), jnp.float32, -bound, bound)
        params.append((w, b))
        in_f = u
    return params


def hypernet_forward(params, z):
    h = z  # (1, noise_shape)
    n = len(params)
    for i, (w, b) in enumerate(params):
        h = h @ w.T + b
        if i < n - 1:
            h = jnp.where(h >= 0.0, h, 0.1 * h)   # LeakyReLU(0.1)
    return h[0]


# ----------------------------------------------------------------------------
# ScaledWSConv2d: raw params + one-time weight preparation
# ----------------------------------------------------------------------------
def init_ws_conv(key, cin, cout, k, units):
    kw, kb, kg, kz = jax.random.split(key, 4)
    z = jax.random.normal(kz, (3, 1, 1), jnp.float32)  # deterministic "noise"
    return dict(
        w_net=init_hypernet(kw, cout * k * k * cin, units),
        b_net=init_hypernet(kb, cout, units),
        g_net=init_hypernet(kg, cout, units),
        zw=z[0], zb=z[1], zg=z[2],
        cin=cin, cout=cout, k=k,
    )


def prepare_ws_conv(p, *, w_scale=1.0, b_scale=1.0, eps=WS_EPS):
    """Hypernet forward + weight standardization + scale folding + layout.

    Input-independent, so it runs once at prep time (hoisted out of forward).
    Matches the PyTorch reference: mean/var (unbiased) over (cin,kh,kw),
    weight = (w - mean) / sqrt(var * fan_in + eps) * gain.
    """
    cin, cout, k = p["cin"], p["cout"], p["k"]
    fan_in = cin * k * k

    w = hypernet_forward(p["w_net"], p["zw"]).reshape(cout, fan_in)
    b = hypernet_forward(p["b_net"], p["zb"]).reshape(cout)
    g = hypernet_forward(p["g_net"], p["zg"]).reshape(cout)

    mean = jnp.mean(w, axis=1, keepdims=True)
    var = jnp.var(w, axis=1, keepdims=True, ddof=1)          # torch.var default
    w_std = (w - mean) / jnp.sqrt(var * fan_in + eps)
    w_std = w_std * (g * w_scale)[:, None]

    # (cout, cin, kh, kw) -> (kh, kw, cin, cout) -> compact (k*k*cin, cout)
    w_std = (w_std.reshape(cout, cin, k, k)
                   .transpose(2, 3, 1, 0)
                   .reshape(fan_in, cout))
    k_pad = _round_up(fan_in, 128)
    w_std = jnp.pad(w_std, ((0, k_pad - fan_in),
                            (0, C_OUT_PAD - cout))).astype(jnp.bfloat16)
    bias = jnp.pad(b * b_scale, (0, C_OUT_PAD - cout)) \
              .reshape(1, C_OUT_PAD).astype(jnp.float32)
    return dict(w=w_std, b=bias, cin=cin, cout=cout, k=k, k_pad=k_pad)


def _im2col(x, cin, k, stride, padding, relu_in):
    # x: (N, H, W, C_stored) bf16.  Slice to the real cin channels so the
    # contraction K axis is compact; optional pre-activation ReLU is applied
    # once per activation here (fuses with the gather), not once per tap.
    x = x[..., :cin]
    if relu_in:
        x = jnp.maximum(x, 0)
    if padding:
        x = jnp.pad(x, ((0, 0), (padding, padding), (padding, padding), (0, 0)))
    n, hp, wp, c = x.shape
    ho = (hp - k) // stride + 1
    wo = (wp - k) // stride + 1
    if k == 1:
        patches = x[:, ::stride, ::stride, :].reshape(n * ho * wo, c)
    else:
        cols = []
        for kh in range(k):
            for kw in range(k):
                cols.append(
                    x[:, kh:kh + (ho - 1) * stride + 1:stride,
                         kw:kw + (wo - 1) * stride + 1:stride, :])
        patches = jnp.stack(cols, axis=3).reshape(n * ho * wo, k * k * c)
    return patches, (n, ho, wo)


def ws_conv_apply(wp, x, stride, padding, *, relu_in=False, relu_out=False,
                  residual=None):
    cin, k, k_pad = wp["cin"], wp["k"], wp["k_pad"]
    fan_in = k * k * cin

    patches, (n, ho, wo) = _im2col(x, cin, k, stride, padding, relu_in)
    m = n * ho * wo
    if k_pad != fan_in:
        patches = jnp.pad(patches, ((0, 0), (0, k_pad - fan_in)))

    tm = _pick_tm(m)
    m_pad = _round_up(m, tm)
    res2 = None if residual is None else residual.reshape(m, C_OUT_PAD)
    if m_pad != m:
        patches = jnp.pad(patches, ((0, m_pad - m), (0, 0)))
        if res2 is not None:
            res2 = jnp.pad(res2, ((0, m_pad - m), (0, 0)))

    out = conv_matmul_pallas(patches, wp["w"], wp["b"], res2,
                             tm=tm, relu_out=relu_out)
    return out[:m].reshape(n, ho, wo, C_OUT_PAD)


# ----------------------------------------------------------------------------
# NF basic block + full model
# ----------------------------------------------------------------------------
def init_block(key, in_planes, planes, stride, units):
    k1, k2, k3 = jax.random.split(key, 3)
    p = dict(
        conv1=init_ws_conv(k1, in_planes, planes, 3, units),
        conv2=init_ws_conv(k2, planes, planes, 3, units),
        stride=stride,
    )
    if stride != 1 or in_planes != planes:
        p["shortcut"] = init_ws_conv(k3, in_planes, planes, 1, units)
    return p


def prepare_block(p, beta, alpha):
    # act(x)/beta with act = relu/GAMMA_RELU: the 1/(GAMMA_RELU*beta) scale is
    # folded into the consuming convs' weights; conv2 additionally folds the
    # post-act 1/GAMMA_RELU and the residual alpha into its weight/bias.
    s_in = 1.0 / (GAMMA_RELU * beta)
    bp = dict(
        stride=p["stride"],
        conv1=prepare_ws_conv(p["conv1"], w_scale=s_in),
        conv2=prepare_ws_conv(p["conv2"], w_scale=alpha / GAMMA_RELU,
                              b_scale=alpha),
    )
    if "shortcut" in p:
        bp["shortcut"] = prepare_ws_conv(p["shortcut"], w_scale=s_in)
    return bp


def block_apply(bp, x):
    stride = bp["stride"]
    if "shortcut" in bp:
        shortcut = ws_conv_apply(bp["shortcut"], x, stride, 0, relu_in=True)
    else:
        shortcut = x
    # conv1: pre-act relu (scale folded in weight) + post-act relu
    h = ws_conv_apply(bp["conv1"], x, stride, 1, relu_in=True, relu_out=True)
    # conv2: alpha-scaled residual add fused in the kernel epilogue
    out = ws_conv_apply(bp["conv2"], h, 1, 1, residual=shortcut)
    return out


def init_nf_resnet(key, num_blocks=(1, 1, 1), num_classes=10, alpha=0.2,
                   units=(16, 32, 64)):
    params = {"alpha": alpha, "num_classes": num_classes}
    key, k = jax.random.split(key)
    params["conv1"] = init_ws_conv(k, 3, 16, 3, units)

    in_planes = 16
    expected_var = 1.0
    layers, betas = [], []
    for planes, nb, stride in zip((16, 32, 64), num_blocks, (1, 2, 2)):
        beta = expected_var ** 0.5
        blocks = []
        strides = [stride] + [1] * (nb - 1)
        for s in strides:
            key, k = jax.random.split(key)
            blocks.append(init_block(k, in_planes, planes, s, units))
            in_planes = planes
        layers.append(blocks)
        betas.append(beta)
        expected_var += alpha ** 2
    params["layers"], params["betas"] = layers, betas

    key, kw, kb, kz = jax.random.split(key, 4)
    params["lin_w_net"] = init_hypernet(kw, 64 * num_classes, units)
    params["lin_b_net"] = init_hypernet(kb, num_classes, units)
    z = jax.random.normal(kz, (2, 1, 1), jnp.float32)
    params["lin_zw"], params["lin_zb"] = z[0], z[1]
    return params


def prepare_nf_resnet(params):
    """One-time, input-independent weight preparation (runs outside forward)."""
    ncls = params["num_classes"]
    alpha = params["alpha"]
    prep = {"num_classes": ncls}
    prep["conv1"] = prepare_ws_conv(params["conv1"])
    prep["layers"] = [[prepare_block(bp, beta, alpha) for bp in blocks]
                      for blocks, beta in zip(params["layers"],
                                              params["betas"])]
    lin_w = hypernet_forward(params["lin_w_net"],
                             params["lin_zw"]).reshape(ncls, 64)
    lin_b = hypernet_forward(params["lin_b_net"],
                             params["lin_zb"]).reshape(ncls)
    prep["lin_w_t"] = jnp.pad(lin_w.T, ((0, C_OUT_PAD - 64),
                                        (0, C_OUT_PAD - ncls))).astype(jnp.float32)
    prep["lin_b"] = jnp.pad(lin_b, (0, C_OUT_PAD - ncls)) \
                       .reshape(1, C_OUT_PAD).astype(jnp.float32)
    return prep


def nf_resnet_forward(prep, x_nchw):
    # Accept PyTorch NCHW; compute in NHWC bf16; conv outputs are 128-lane padded.
    x = jnp.transpose(x_nchw.astype(jnp.float32), (0, 2, 3, 1)).astype(jnp.bfloat16)

    out = ws_conv_apply(prep["conv1"], x, 1, 1)            # stem
    for blocks in prep["layers"]:
        for bp in blocks:
            out = block_apply(bp, out)

    n, ho, wo, _ = out.shape
    feat = out.reshape(n, ho * wo, C_OUT_PAD)
    logits = head(feat, prep["lin_w_t"], prep["lin_b"])    # Pallas pool+linear
    return logits[:, :prep["num_classes"]]


if __name__ == "__main__":
    key = jax.random.PRNGKey(0)
    kp, kx = jax.random.split(key)
    params = init_nf_resnet(kp, num_blocks=(1, 1, 1), num_classes=10, alpha=0.2)
    prep = prepare_nf_resnet(params)          # hypernets + WS run once, here

    x = jax.random.normal(kx, (2, 3, 16, 16), jnp.float32)  # NCHW like PyTorch
    fwd = jax.jit(functools.partial(nf_resnet_forward, prep))
    logits = fwd(x)
    jax.block_until_ready(logits)
    assert logits.shape == (2, 10), logits.shape
    assert bool(jnp.all(jnp.isfinite(logits)))
    print("KERNEL_OK")
</pallas_src>

<mosaic_0001>
module attributes {stable_mosaic.version = 11 : i64} {
  func.func @_conv_kernel(%arg0: i32, %arg1: memref<256x128xbf16, #tpu.memory_space<vmem>>, %arg2: memref<128x128xbf16, #tpu.memory_space<vmem>>, %arg3: memref<1x128xf32, #tpu.memory_space<vmem>>, %arg4: memref<256x128xbf16, #tpu.memory_space<vmem>>) attributes {dimension_semantics = [#tpu.dimension_semantics<parallel>], iteration_bounds = array<i64: 2>, scalar_prefetch = 0 : i64, scratch_operands = 0 : i64, tpu.core_type = #tpu.core_type<tc>, window_params = [{transform_indices = @transform_0, window_bounds = array<i64: 256, 128>}, {pipeline_mode = #tpu.pipeline_mode<synchronous>, transform_indices = @transform_1, window_bounds = array<i64: 128, 128>}, {pipeline_mode = #tpu.pipeline_mode<synchronous>, transform_indices = @transform_2, window_bounds = array<i64: 1, 128>}, {transform_indices = @transform_3, window_bounds = array<i64: 256, 128>}]} {
    %c0 = arith.constant 0 : index
    %c0_0 = arith.constant 0 : index
    %0 = vector.load %arg1[%c0, %c0_0] : memref<256x128xbf16, #tpu.memory_space<vmem>>, vector<256x128xbf16>
    %c0_1 = arith.constant 0 : index
    %c0_2 = arith.constant 0 : index
    %1 = vector.load %arg2[%c0_1, %c0_2] : memref<128x128xbf16, #tpu.memory_space<vmem>>, vector<128x128xbf16>
    %cst = arith.constant dense<0.000000e+00> : vector<256x128xf32>
    %2 = tpu.matmul %0, %1, %cst {dimension_numbers = #tpu.dot_dimension_numbers<[1], [0], [0], [1], [0, 0, 1, 1], [], []>} : vector<256x128xbf16>, vector<128x128xbf16>, vector<256x128xf32> -> vector<256x128xf32>
    %c0_3 = arith.constant 0 : index
    %c0_4 = arith.constant 0 : index
    %3 = vector.load %arg3[%c0_3, %c0_4] : memref<1x128xf32, #tpu.memory_space<vmem>>, vector<1x128xf32>
    %4 = vector.broadcast %3 : vector<1x128xf32> to vector<256x128xf32>
    %5 = arith.addf %2, %4 : vector<256x128xf32>
    %6 = arith.truncf %5 : vector<256x128xf32> to vector<256x128xbf16>
    %c0_5 = arith.constant 0 : index
    %c0_6 = arith.constant 0 : index
    %7 = vector.load %arg4[%c0_5, %c0_6] : memref<256x128xbf16, #tpu.memory_space<vmem>>, vector<256x128xbf16>
    tpu.vector_store %arg4[%c0_5, %c0_6], %6 {strides = array<i32>} : memref<256x128xbf16, #tpu.memory_space<vmem>>, vector<256x128xbf16>,
    return
  }
  func.func @transform_0(%arg0: i32) -> (i32, i32) {
    %c0_i32 = arith.constant 0 : i32
    %c0_i32_0 = arith.constant 0 : i32
    return %arg0, %c0_i32 : i32, i32
  }
  func.func @transform_1(%arg0: i32) -> (i32, i32) {
    %c0_i32 = arith.constant 0 : i32
    %c0_i32_0 = arith.constant 0 : i32
    %c0_i32_1 = arith.constant 0 : i32
    return %c0_i32, %c0_i32_0 : i32, i32
  }
  func.func @transform_2(%arg0: i32) -> (i32, i32) {
    %c0_i32 = arith.constant 0 : i32
    %c0_i32_0 = arith.constant 0 : i32
    %c0_i32_1 = arith.constant 0 : i32
    return %c0_i32, %c0_i32_0 : i32, i32
  }
  func.func @transform_3(%arg0: i32) -> (i32, i32) {
    %c0_i32 = arith.constant 0 : i32
    %c0_i32_0 = arith.constant 0 : i32
    return %arg0, %c0_i32 : i32, i32
  }
}

module attributes {stable_mosaic.version = 11 : i64} {
  func.func @_conv_kernel(%arg0: i32, %arg1: memref<256x256xbf16, #tpu.memory_space<vmem>>, %arg2: memref<256x128xbf16, #tpu.memory_space<vmem>>, %arg3: memref<1x128xf32, #tpu.memory_space<vmem>>, %arg4: memref<256x128xbf16, #tpu.memory_space<vmem>>) attributes {dimension_semantics = [#tpu.dimension_semantics<parallel>], iteration_bounds = array<i64: 2>, scalar_prefetch = 0 : i64, scratch_operands = 0 : i64, tpu.core_type = #tpu.core_type<tc>, window_params = [{transform_indices = @transform_0, window_bounds = array<i64: 256, 256>}, {pipeline_mode = #tpu.pipeline_mode<synchronous>, transform_indices = @transform_1, window_bounds = array<i64: 256, 128>}, {pipeline_mode = #tpu.pipeline_mode<synchronous>, transform_indices = @transform_2, window_bounds = array<i64: 1, 128>}, {transform_indices = @transform_3, window_bounds = array<i64: 256, 128>}]} {
    %c0 = arith.constant 0 : index
    %c0_0 = arith.constant 0 : index
    %0 = vector.load %arg1[%c0, %c0_0] : memref<256x256xbf16, #tpu.memory_space<vmem>>, vector<256x256xbf16>
    %c0_1 = arith.constant 0 : index
    %c0_2 = arith.constant 0 : index
    %1 = vector.load %arg2[%c0_1, %c0_2] : memref<256x128xbf16, #tpu.memory_space<vmem>>, vector<256x128xbf16>
    %cst = arith.constant dense<0.000000e+00> : vector<256x128xf32>
    %2 = tpu.matmul %0, %1, %cst {dimension_numbers = #tpu.dot_dimension_numbers<[1], [0], [0], [1], [0, 0, 1, 1], [], []>} : vector<256x256xbf16>, vector<256x128xbf16>, vector<256x128xf32> -> vector<256x128xf32>
    %c0_3 = arith.constant 0 : index
    %c0_4 = arith.constant 0 : index
    %3 = vector.load %arg3[%c0_3, %c0_4] : memref<1x128xf32, #tpu.memory_space<vmem>>, vector<1x128xf32>
    %4 = vector.broadcast %3 : vector<1x128xf32> to vector<256x128xf32>
    %5 = arith.addf %2, %4 : vector<256x128xf32>
    %cst_5 = arith.constant 0.000000e+00 : f32
    %6 = vector.broadcast %cst_5 : f32 to vector<256x128xf32>
    %7 = arith.maximumf %5, %6 : vector<256x128xf32>
    %8 = arith.truncf %7 : vector<256x128xf32> to vector<256x128xbf16>
    %c0_6 = arith.constant 0 : index
    %c0_7 = arith.constant 0 : index
    %9 = vector.load %arg4[%c0_6, %c0_7] : memref<256x128xbf16, #tpu.memory_space<vmem>>, vector<256x128xbf16>
    tpu.vector_store %arg4[%c0_6, %c0_7], %8 {strides = array<i32>} : memref<256x128xbf16, #tpu.memory_space<vmem>>, vector<256x128xbf16>,
    return
  }
  func.func @transform_0(%arg0: i32) -> (i32, i32) {
    %c0_i32 = arith.constant 0 : i32
    %c0_i32_0 = arith.constant 0 : i32
    return %arg0, %c0_i32 : i32, i32
  }
  func.func @transform_1(%arg0: i32) -> (i32, i32) {
    %c0_i32 = arith.constant 0 : i32
    %c0_i32_0 = arith.constant 0 : i32
    %c0_i32_1 = arith.constant 0 : i32
    return %c0_i32, %c0_i32_0 : i32, i32
  }
  func.func @transform_2(%arg0: i32) -> (i32, i32) {
    %c0_i32 = arith.constant 0 : i32
    %c0_i32_0 = arith.constant 0 : i32
    %c0_i32_1 = arith.constant 0 : i32
    return %c0_i32, %c0_i32_0 : i32, i32
  }
  func.func @transform_3(%arg0: i32) -> (i32, i32) {
    %c0_i32 = arith.constant 0 : i32
    %c0_i32_0 = arith.constant 0 : i32
    return %arg0, %c0_i32 : i32, i32
  }
}

module attributes {stable_mosaic.version = 11 : i64} {
  func.func @_conv_kernel(%arg0: i32, %arg1: memref<256x256xbf16, #tpu.memory_space<vmem>>, %arg2: memref<256x128xbf16, #tpu.memory_space<vmem>>, %arg3: memref<1x128xf32, #tpu.memory_space<vmem>>, %arg4: memref<256x128xbf16, #tpu.memory_space<vmem>>, %arg5: memref<256x128xbf16, #tpu.memory_space<vmem>>) attributes {dimension_semantics = [#tpu.dimension_semantics<parallel>], iteration_bounds = array<i64: 2>, scalar_prefetch = 0 : i64, scratch_operands = 0 : i64, tpu.core_type = #tpu.core_type<tc>, window_params = [{transform_indices = @transform_0, window_bounds = array<i64: 256, 256>}, {pipeline_mode = #tpu.pipeline_mode<synchronous>, transform_indices = @transform_1, window_bounds = array<i64: 256, 128>}, {pipeline_mode = #tpu.pipeline_mode<synchronous>, transform_indices = @transform_2, window_bounds = array<i64: 1, 128>}, {transform_indices = @transform_3, window_bounds = array<i64: 256, 128>}, {transform_indices = @transform_4, window_bounds = array<i64: 256, 128>}]} {
    %c0 = arith.constant 0 : index
    %c0_0 = arith.constant 0 : index
    %0 = vector.load %arg1[%c0, %c0_0] : memref<256x256xbf16, #tpu.memory_space<vmem>>, vector<256x256xbf16>
    %c0_1 = arith.constant 0 : index
    %c0_2 = arith.constant 0 : index
    %1 = vector.load %arg2[%c0_1, %c0_2] : memref<256x128xbf16, #tpu.memory_space<vmem>>, vector<256x128xbf16>
    %cst = arith.constant dense<0.000000e+00> : vector<256x128xf32>
    %2 = tpu.matmul %0, %1, %cst {dimension_numbers = #tpu.dot_dimension_numbers<[1], [0], [0], [1], [0, 0, 1, 1], [], []>} : vector<256x256xbf16>, vector<256x128xbf16>, vector<256x128xf32> -> vector<256x128xf32>
    %c0_3 = arith.constant 0 : index
    %c0_4 = arith.constant 0 : index
    %3 = vector.load %arg3[%c0_3, %c0_4] : memref<1x128xf32, #tpu.memory_space<vmem>>, vector<1x128xf32>
    %4 = vector.broadcast %3 : vector<1x128xf32> to vector<256x128xf32>
    %5 = arith.addf %2, %4 : vector<256x128xf32>
    %c0_5 = arith.constant 0 : index
    %c0_6 = arith.constant 0 : index
    %6 = vector.load %arg4[%c0_5, %c0_6] : memref<256x128xbf16, #tpu.memory_space<vmem>>, vector<256x128xbf16>
    %7 = arith.extf %6 : vector<256x128xbf16> to vector<256x128xf32>
    %8 = arith.addf %7, %5 : vector<256x128xf32>
    %9 = arith.truncf %8 : vector<256x128xf32> to vector<256x128xbf16>
    %c0_7 = arith.constant 0 : index
    %c0_8 = arith.constant 0 : index
    %10 = vector.load %arg5[%c0_7, %c0_8] : memref<256x128xbf16, #tpu.memory_space<vmem>>, vector<256x128xbf16>
    tpu.vector_store %arg5[%c0_7, %c0_8], %9 {strides = array<i32>} : memref<256x128xbf16, #tpu.memory_space<vmem>>, vector<256x128xbf16>,
    return
  }
  func.func @transform_0(%arg0: i32) -> (i32, i32) {
    %c0_i32 = arith.constant 0 : i32
    %c0_i32_0 = arith.constant 0 : i32
    return %arg0, %c0_i32 : i32, i32
  }
  func.func @transform_1(%arg0: i32) -> (i32, i32) {
    %c0_i32 = arith.constant 0 : i32
    %c0_i32_0 = arith.constant 0 : i32
    %c0_i32_1 = arith.constant 0 : i32
    return %c0_i32, %c0_i32_0 : i32, i32
  }
  func.func @transform_2(%arg0: i32) -> (i32, i32) {
    %c0_i32 = arith.constant 0 : i32
    %c0_i32_0 = arith.constant 0 : i32
    %c0_i32_1 = arith.constant 0 : i32
    return %c0_i32, %c0_i32_0 : i32, i32
  }
  func.func @transform_3(%arg0: i32) -> (i32, i32) {
    %c0_i32 = arith.constant 0 : i32
    %c0_i32_0 = arith.constant 0 : i32
    return %arg0, %c0_i32 : i32, i32
  }
  func.func @transform_4(%arg0: i32) -> (i32, i32) {
    %c0_i32 = arith.constant 0 : i32
    %c0_i32_0 = arith.constant 0 : i32
    return %arg0, %c0_i32 : i32, i32
  }
}

module attributes {stable_mosaic.version = 11 : i64} {
  func.func @_conv_kernel(%arg0: i32, %arg1: memref<64x128xbf16, #tpu.memory_space<vmem>>, %arg2: memref<128x128xbf16, #tpu.memory_space<vmem>>, %arg3: memref<1x128xf32, #tpu.memory_space<vmem>>, %arg4: memref<64x128xbf16, #tpu.memory_space<vmem>>) attributes {dimension_semantics = [#tpu.dimension_semantics<parallel>], iteration_bounds = array<i64: 2>, scalar_prefetch = 0 : i64, scratch_operands = 0 : i64, tpu.core_type = #tpu.core_type<tc>, window_params = [{transform_indices = @transform_0, window_bounds = array<i64: 64, 128>}, {pipeline_mode = #tpu.pipeline_mode<synchronous>, transform_indices = @transform_1, window_bounds = array<i64: 128, 128>}, {pipeline_mode = #tpu.pipeline_mode<synchronous>, transform_indices = @transform_2, window_bounds = array<i64: 1, 128>}, {transform_indices = @transform_3, window_bounds = array<i64: 64, 128>}]} {
    %c0 = arith.constant 0 : index
    %c0_0 = arith.constant 0 : index
    %0 = vector.load %arg1[%c0, %c0_0] : memref<64x128xbf16, #tpu.memory_space<vmem>>, vector<64x128xbf16>
    %c0_1 = arith.constant 0 : index
    %c0_2 = arith.constant 0 : index
    %1 = vector.load %arg2[%c0_1, %c0_2] : memref<128x128xbf16, #tpu.memory_space<vmem>>, vector<128x128xbf16>
    %cst = arith.constant dense<0.000000e+00> : vector<64x128xf32>
    %2 = tpu.matmul %0, %1, %cst {dimension_numbers = #tpu.dot_dimension_numbers<[1], [0], [0], [1], [0, 0, 1, 1], [], []>} : vector<64x128xbf16>, vector<128x128xbf16>, vector<64x128xf32> -> vector<64x128xf32>
    %c0_3 = arith.constant 0 : index
    %c0_4 = arith.constant 0 : index
    %3 = vector.load %arg3[%c0_3, %c0_4] : memref<1x128xf32, #tpu.memory_space<vmem>>, vector<1x128xf32>
    %4 = vector.broadcast %3 : vector<1x128xf32> to vector<64x128xf32>
    %5 = arith.addf %2, %4 : vector<64x128xf32>
    %6 = arith.truncf %5 : vector<64x128xf32> to vector<64x128xbf16>
    %c0_5 = arith.constant 0 : index
    %c0_6 = arith.constant 0 : index
    %7 = vector.load %arg4[%c0_5, %c0_6] : memref<64x128xbf16, #tpu.memory_space<vmem>>, vector<64x128xbf16>
    tpu.vector_store %arg4[%c0_5, %c0_6], %6 {strides = array<i32>} : memref<64x128xbf16, #tpu.memory_space<vmem>>, vector<64x128xbf16>,
    return
  }
  func.func @transform_0(%arg0: i32) -> (i32, i32) {
    %c0_i32 = arith.constant 0 : i32
    %c0_i32_0 = arith.constant 0 : i32
    return %arg0, %c0_i32 : i32, i32
  }
  func.func @transform_1(%arg0: i32) -> (i32, i32) {
    %c0_i32 = arith.constant 0 : i32
    %c0_i32_0 = arith.constant 0 : i32
    %c0_i32_1 = arith.constant 0 : i32
    return %c0_i32, %c0_i32_0 : i32, i32
  }
  func.func @transform_2(%arg0: i32) -> (i32, i32) {
    %c0_i32 = arith.constant 0 : i32
    %c0_i32_0 = arith.constant 0 : i32
    %c0_i32_1 = arith.constant 0 : i32
    return %c0_i32, %c0_i32_0 : i32, i32
  }
  func.func @transform_3(%arg0: i32) -> (i32, i32) {
    %c0_i32 = arith.constant 0 : i32
    %c0_i32_0 = arith.constant 0 : i32
    return %arg0, %c0_i32 : i32, i32
  }
}

module attributes {stable_mosaic.version = 11 : i64} {
  func.func @_conv_kernel(%arg0: i32, %arg1: memref<64x256xbf16, #tpu.memory_space<vmem>>, %arg2: memref<256x128xbf16, #tpu.memory_space<vmem>>, %arg3: memref<1x128xf32, #tpu.memory_space<vmem>>, %arg4: memref<64x128xbf16, #tpu.memory_space<vmem>>) attributes {dimension_semantics = [#tpu.dimension_semantics<parallel>], iteration_bounds = array<i64: 2>, scalar_prefetch = 0 : i64, scratch_operands = 0 : i64, tpu.core_type = #tpu.core_type<tc>, window_params = [{transform_indices = @transform_0, window_bounds = array<i64: 64, 256>}, {pipeline_mode = #tpu.pipeline_mode<synchronous>, transform_indices = @transform_1, window_bounds = array<i64: 256, 128>}, {pipeline_mode = #tpu.pipeline_mode<synchronous>, transform_indices = @transform_2, window_bounds = array<i64: 1, 128>}, {transform_indices = @transform_3, window_bounds = array<i64: 64, 128>}]} {
    %c0 = arith.constant 0 : index
    %c0_0 = arith.constant 0 : index
    %0 = vector.load %arg1[%c0, %c0_0] : memref<64x256xbf16, #tpu.memory_space<vmem>>, vector<64x256xbf16>
    %c0_1 = arith.constant 0 : index
    %c0_2 = arith.constant 0 : index
    %1 = vector.load %arg2[%c0_1, %c0_2] : memref<256x128xbf16, #tpu.memory_space<vmem>>, vector<256x128xbf16>
    %cst = arith.constant dense<0.000000e+00> : vector<64x128xf32>
    %2 = tpu.matmul %0, %1, %cst {dimension_numbers = #tpu.dot_dimension_numbers<[1], [0], [0], [1], [0, 0, 1, 1], [], []>} : vector<64x256xbf16>, vector<256x128xbf16>, vector<64x128xf32> -> vector<64x128xf32>
    %c0_3 = arith.constant 0 : index
    %c0_4 = arith.constant 0 : index
    %3 = vector.load %arg3[%c0_3, %c0_4] : memref<1x128xf32, #tpu.memory_space<vmem>>, vector<1x128xf32>
    %4 = vector.broadcast %3 : vector<1x128xf32> to vector<64x128xf32>
    %5 = arith.addf %2, %4 : vector<64x128xf32>
    %cst_5 = arith.constant 0.000000e+00 : f32
    %6 = vector.broadcast %cst_5 : f32 to vector<64x128xf32>
    %7 = arith.maximumf %5, %6 : vector<64x128xf32>
    %8 = arith.truncf %7 : vector<64x128xf32> to vector<64x128xbf16>
    %c0_6 = arith.constant 0 : index
    %c0_7 = arith.constant 0 : index
    %9 = vector.load %arg4[%c0_6, %c0_7] : memref<64x128xbf16, #tpu.memory_space<vmem>>, vector<64x128xbf16>
    tpu.vector_store %arg4[%c0_6, %c0_7], %8 {strides = array<i32>} : memref<64x128xbf16, #tpu.memory_space<vmem>>, vector<64x128xbf16>,
    return
  }
  func.func @transform_0(%arg0: i32) -> (i32, i32) {
    %c0_i32 = arith.constant 0 : i32
    %c0_i32_0 = arith.constant 0 : i32
    return %arg0, %c0_i32 : i32, i32
  }
  func.func @transform_1(%arg0: i32) -> (i32, i32) {
    %c0_i32 = arith.constant 0 : i32
    %c0_i32_0 = arith.constant 0 : i32
    %c0_i32_1 = arith.constant 0 : i32
    return %c0_i32, %c0_i32_0 : i32, i32
  }
  func.func @transform_2(%arg0: i32) -> (i32, i32) {
    %c0_i32 = arith.constant 0 : i32
    %c0_i32_0 = arith.constant 0 : i32
    %c0_i32_1 = arith.constant 0 : i32
    return %c0_i32, %c0_i32_0 : i32, i32
  }
  func.func @transform_3(%arg0: i32) -> (i32, i32) {
    %c0_i32 = arith.constant 0 : i32
    %c0_i32_0 = arith.constant 0 : i32
    return %arg0, %c0_i32 : i32, i32
  }
}

module attributes {stable_mosaic.version = 11 : i64} {
  func.func @_conv_kernel(%arg0: i32, %arg1: memref<64x384xbf16, #tpu.memory_space<vmem>>, %arg2: memref<384x128xbf16, #tpu.memory_space<vmem>>, %arg3: memref<1x128xf32, #tpu.memory_space<vmem>>, %arg4: memref<64x128xbf16, #tpu.memory_space<vmem>>, %arg5: memref<64x128xbf16, #tpu.memory_space<vmem>>) attributes {dimension_semantics = [#tpu.dimension_semantics<parallel>], iteration_bounds = array<i64: 2>, scalar_prefetch = 0 : i64, scratch_operands = 0 : i64, tpu.core_type = #tpu.core_type<tc>, window_params = [{transform_indices = @transform_0, window_bounds = array<i64: 64, 384>}, {pipeline_mode = #tpu.pipeline_mode<synchronous>, transform_indices = @transform_1, window_bounds = array<i64: 384, 128>}, {pipeline_mode = #tpu.pipeline_mode<synchronous>, transform_indices = @transform_2, window_bounds = array<i64: 1, 128>}, {transform_indices = @transform_3, window_bounds = array<i64: 64, 128>}, {transform_indices = @transform_4, window_bounds = array<i64: 64, 128>}]} {
    %c0 = arith.constant 0 : index
    %c0_0 = arith.constant 0 : index
    %0 = vector.load %arg1[%c0, %c0_0] : memref<64x384xbf16, #tpu.memory_space<vmem>>, vector<64x384xbf16>
    %c0_1 = arith.constant 0 : index
    %c0_2 = arith.constant 0 : index
    %1 = vector.load %arg2[%c0_1, %c0_2] : memref<384x128xbf16, #tpu.memory_space<vmem>>, vector<384x128xbf16>
    %cst = arith.constant dense<0.000000e+00> : vector<64x128xf32>
    %2 = tpu.matmul %0, %1, %cst {dimension_numbers = #tpu.dot_dimension_numbers<[1], [0], [0], [1], [0, 0, 1, 1], [], []>} : vector<64x384xbf16>, vector<384x128xbf16>, vector<64x128xf32> -> vector<64x128xf32>
    %c0_3 = arith.constant 0 : index
    %c0_4 = arith.constant 0 : index
    %3 = vector.load %arg3[%c0_3, %c0_4] : memref<1x128xf32, #tpu.memory_space<vmem>>, vector<1x128xf32>
    %4 = vector.broadcast %3 : vector<1x128xf32> to vector<64x128xf32>
    %5 = arith.addf %2, %4 : vector<64x128xf32>
    %c0_5 = arith.constant 0 : index
    %c0_6 = arith.constant 0 : index
    %6 = vector.load %arg4[%c0_5, %c0_6] : memref<64x128xbf16, #tpu.memory_space<vmem>>, vector<64x128xbf16>
    %7 = arith.extf %6 : vector<64x128xbf16> to vector<64x128xf32>
    %8 = arith.addf %7, %5 : vector<64x128xf32>
    %9 = arith.truncf %8 : vector<64x128xf32> to vector<64x128xbf16>
    %c0_7 = arith.constant 0 : index
    %c0_8 = arith.constant 0 : index
    %10 = vector.load %arg5[%c0_7, %c0_8] : memref<64x128xbf16, #tpu.memory_space<vmem>>, vector<64x128xbf16>
    tpu.vector_store %arg5[%c0_7, %c0_8], %9 {strides = array<i32>} : memref<64x128xbf16, #tpu.memory_space<vmem>>, vector<64x128xbf16>,
    return
  }
  func.func @transform_0(%arg0: i32) -> (i32, i32) {
    %c0_i32 = arith.constant 0 : i32
    %c0_i32_0 = arith.constant 0 : i32
    return %arg0, %c0_i32 : i32, i32
  }
  func.func @transform_1(%arg0: i32) -> (i32, i32) {
    %c0_i32 = arith.constant 0 : i32
    %c0_i32_0 = arith.constant 0 : i32
    %c0_i32_1 = arith.constant 0 : i32
    return %c0_i32, %c0_i32_0 : i32, i32
  }
  func.func @transform_2(%arg0: i32) -> (i32, i32) {
    %c0_i32 = arith.constant 0 : i32
    %c0_i32_0 = arith.constant 0 : i32
    %c0_i32_1 = arith.constant 0 : i32
    return %c0_i32, %c0_i32_0 : i32, i32
  }
  func.func @transform_3(%arg0: i32) -> (i32, i32) {
    %c0_i32 = arith.constant 0 : i32
    %c0_i32_0 = arith.constant 0 : i32
    return %arg0, %c0_i32 : i32, i32
  }
  func.func @transform_4(%arg0: i32) -> (i32, i32) {
    %c0_i32 = arith.constant 0 : i32
    %c0_i32_0 = arith.constant 0 : i32
    return %arg0, %c0_i32 : i32, i32
  }
}

module attributes {stable_mosaic.version = 11 : i64} {
  func.func @_conv_kernel(%arg0: i32, %arg1: memref<32x128xbf16, #tpu.memory_space<vmem>>, %arg2: memref<128x128xbf16, #tpu.memory_space<vmem>>, %arg3: memref<1x128xf32, #tpu.memory_space<vmem>>, %arg4: memref<32x128xbf16, #tpu.memory_space<vmem>>) attributes {dimension_semantics = [#tpu.dimension_semantics<parallel>], iteration_bounds = array<i64: 1>, scalar_prefetch = 0 : i64, scratch_operands = 0 : i64, tpu.core_type = #tpu.core_type<tc>, window_params = [{transform_indices = @transform_0, window_bounds = array<i64: 32, 128>}, {pipeline_mode = #tpu.pipeline_mode<synchronous>, transform_indices = @transform_1, window_bounds = array<i64: 128, 128>}, {pipeline_mode = #tpu.pipeline_mode<synchronous>, transform_indices = @transform_2, window_bounds = array<i64: 1, 128>}, {transform_indices = @transform_3, window_bounds = array<i64: 32, 128>}]} {
    %c0 = arith.constant 0 : index
    %c0_0 = arith.constant 0 : index
    %0 = vector.load %arg1[%c0, %c0_0] : memref<32x128xbf16, #tpu.memory_space<vmem>>, vector<32x128xbf16>
    %c0_1 = arith.constant 0 : index
    %c0_2 = arith.constant 0 : index
    %1 = vector.load %arg2[%c0_1, %c0_2] : memref<128x128xbf16, #tpu.memory_space<vmem>>, vector<128x128xbf16>
    %cst = arith.constant dense<0.000000e+00> : vector<32x128xf32>
    %2 = tpu.matmul %0, %1, %cst {dimension_numbers = #tpu.dot_dimension_numbers<[1], [0], [0], [1], [0, 0, 1, 1], [], []>} : vector<32x128xbf16>, vector<128x128xbf16>, vector<32x128xf32> -> vector<32x128xf32>
    %c0_3 = arith.constant 0 : index
    %c0_4 = arith.constant 0 : index
    %3 = vector.load %arg3[%c0_3, %c0_4] : memref<1x128xf32, #tpu.memory_space<vmem>>, vector<1x128xf32>
    %4 = vector.broadcast %3 : vector<1x128xf32> to vector<32x128xf32>
    %5 = arith.addf %2, %4 : vector<32x128xf32>
    %6 = arith.truncf %5 : vector<32x128xf32> to vector<32x128xbf16>
    %c0_5 = arith.constant 0 : index
    %c0_6 = arith.constant 0 : index
    %7 = vector.load %arg4[%c0_5, %c0_6] : memref<32x128xbf16, #tpu.memory_space<vmem>>, vector<32x128xbf16>
    tpu.vector_store %arg4[%c0_5, %c0_6], %6 {strides = array<i32>} : memref<32x128xbf16, #tpu.memory_space<vmem>>, vector<32x128xbf16>,
    return
  }
  func.func @transform_0(%arg0: i32) -> (i32, i32) {
    %c0_i32 = arith.constant 0 : i32
    %c0_i32_0 = arith.constant 0 : i32
    return %arg0, %c0_i32 : i32, i32
  }
  func.func @transform_1(%arg0: i32) -> (i32, i32) {
    %c0_i32 = arith.constant 0 : i32
    %c0_i32_0 = arith.constant 0 : i32
    %c0_i32_1 = arith.constant 0 : i32
    return %c0_i32, %c0_i32_0 : i32, i32
  }
  func.func @transform_2(%arg0: i32) -> (i32, i32) {
    %c0_i32 = arith.constant 0 : i32
    %c0_i32_0 = arith.constant 0 : i32
    %c0_i32_1 = arith.constant 0 : i32
    return %c0_i32, %c0_i32_0 : i32, i32
  }
  func.func @transform_3(%arg0: i32) -> (i32, i32) {
    %c0_i32 = arith.constant 0 : i32
    %c0_i32_0 = arith.constant 0 : i32
    return %arg0, %c0_i32 : i32, i32
  }
}

module attributes {stable_mosaic.version = 11 : i64} {
  func.func @_conv_kernel(%arg0: i32, %arg1: memref<32x384xbf16, #tpu.memory_space<vmem>>, %arg2: memref<384x128xbf16, #tpu.memory_space<vmem>>, %arg3: memref<1x128xf32, #tpu.memory_space<vmem>>, %arg4: memref<32x128xbf16, #tpu.memory_space<vmem>>) attributes {dimension_semantics = [#tpu.dimension_semantics<parallel>], iteration_bounds = array<i64: 1>, scalar_prefetch = 0 : i64, scratch_operands = 0 : i64, tpu.core_type = #tpu.core_type<tc>, window_params = [{transform_indices = @transform_0, window_bounds = array<i64: 32, 384>}, {pipeline_mode = #tpu.pipeline_mode<synchronous>, transform_indices = @transform_1, window_bounds = array<i64: 384, 128>}, {pipeline_mode = #tpu.pipeline_mode<synchronous>, transform_indices = @transform_2, window_bounds = array<i64: 1, 128>}, {transform_indices = @transform_3, window_bounds = array<i64: 32, 128>}]} {
    %c0 = arith.constant 0 : index
    %c0_0 = arith.constant 0 : index
    %0 = vector.load %arg1[%c0, %c0_0] : memref<32x384xbf16, #tpu.memory_space<vmem>>, vector<32x384xbf16>
    %c0_1 = arith.constant 0 : index
    %c0_2 = arith.constant 0 : index
    %1 = vector.load %arg2[%c0_1, %c0_2] : memref<384x128xbf16, #tpu.memory_space<vmem>>, vector<384x128xbf16>
    %cst = arith.constant dense<0.000000e+00> : vector<32x128xf32>
    %2 = tpu.matmul %0, %1, %cst {dimension_numbers = #tpu.dot_dimension_numbers<[1], [0], [0], [1], [0, 0, 1, 1], [], []>} : vector<32x384xbf16>, vector<384x128xbf16>, vector<32x128xf32> -> vector<32x128xf32>
    %c0_3 = arith.constant 0 : index
    %c0_4 = arith.constant 0 : index
    %3 = vector.load %arg3[%c0_3, %c0_4] : memref<1x128xf32, #tpu.memory_space<vmem>>, vector<1x128xf32>
    %4 = vector.broadcast %3 : vector<1x128xf32> to vector<32x128xf32>
    %5 = arith.addf %2, %4 : vector<32x128xf32>
    %cst_5 = arith.constant 0.000000e+00 : f32
    %6 = vector.broadcast %cst_5 : f32 to vector<32x128xf32>
    %7 = arith.maximumf %5, %6 : vector<32x128xf32>
    %8 = arith.truncf %7 : vector<32x128xf32> to vector<32x128xbf16>
    %c0_6 = arith.constant 0 : index
    %c0_7 = arith.constant 0 : index
    %9 = vector.load %arg4[%c0_6, %c0_7] : memref<32x128xbf16, #tpu.memory_space<vmem>>, vector<32x128xbf16>
    tpu.vector_store %arg4[%c0_6, %c0_7], %8 {strides = array<i32>} : memref<32x128xbf16, #tpu.memory_space<vmem>>, vector<32x128xbf16>,
    return
  }
  func.func @transform_0(%arg0: i32) -> (i32, i32) {
    %c0_i32 = arith.constant 0 : i32
    %c0_i32_0 = arith.constant 0 : i32
    return %arg0, %c0_i32 : i32, i32
  }
  func.func @transform_1(%arg0: i32) -> (i32, i32) {
    %c0_i32 = arith.constant 0 : i32
    %c0_i32_0 = arith.constant 0 : i32
    %c0_i32_1 = arith.constant 0 : i32
    return %c0_i32, %c0_i32_0 : i32, i32
  }
  func.func @transform_2(%arg0: i32) -> (i32, i32) {
    %c0_i32 = arith.constant 0 : i32
    %c0_i32_0 = arith.constant 0 : i32
    %c0_i32_1 = arith.constant 0 : i32
    return %c0_i32, %c0_i32_0 : i32, i32
  }
  func.func @transform_3(%arg0: i32) -> (i32, i32) {
    %c0_i32 = arith.constant 0 : i32
    %c0_i32_0 = arith.constant 0 : i32
    return %arg0, %c0_i32 : i32, i32
  }
}

module attributes {stable_mosaic.version = 11 : i64} {
  func.func @_conv_kernel(%arg0: i32, %arg1: memref<32x640xbf16, #tpu.memory_space<vmem>>, %arg2: memref<640x128xbf16, #tpu.memory_space<vmem>>, %arg3: memref<1x128xf32, #tpu.memory_space<vmem>>, %arg4: memref<32x128xbf16, #tpu.memory_space<vmem>>, %arg5: memref<32x128xbf16, #tpu.memory_space<vmem>>) attributes {dimension_semantics = [#tpu.dimension_semantics<parallel>], iteration_bounds = array<i64: 1>, scalar_prefetch = 0 : i64, scratch_operands = 0 : i64, tpu.core_type = #tpu.core_type<tc>, window_params = [{transform_indices = @transform_0, window_bounds = array<i64: 32, 640>}, {pipeline_mode = #tpu.pipeline_mode<synchronous>, transform_indices = @transform_1, window_bounds = array<i64: 640, 128>}, {pipeline_mode = #tpu.pipeline_mode<synchronous>, transform_indices = @transform_2, window_bounds = array<i64: 1, 128>}, {transform_indices = @transform_3, window_bounds = array<i64: 32, 128>}, {transform_indices = @transform_4, window_bounds = array<i64: 32, 128>}]} {
    %c0 = arith.constant 0 : index
    %c0_0 = arith.constant 0 : index
    %0 = vector.load %arg1[%c0, %c0_0] : memref<32x640xbf16, #tpu.memory_space<vmem>>, vector<32x640xbf16>
    %c0_1 = arith.constant 0 : index
    %c0_2 = arith.constant 0 : index
    %1 = vector.load %arg2[%c0_1, %c0_2] : memref<640x128xbf16, #tpu.memory_space<vmem>>, vector<640x128xbf16>
    %cst = arith.constant dense<0.000000e+00> : vector<32x128xf32>
    %2 = tpu.matmul %0, %1, %cst {dimension_numbers = #tpu.dot_dimension_numbers<[1], [0], [0], [1], [0, 0, 1, 1], [], []>} : vector<32x640xbf16>, vector<640x128xbf16>, vector<32x128xf32> -> vector<32x128xf32>
    %c0_3 = arith.constant 0 : index
    %c0_4 = arith.constant 0 : index
    %3 = vector.load %arg3[%c0_3, %c0_4] : memref<1x128xf32, #tpu.memory_space<vmem>>, vector<1x128xf32>
    %4 = vector.broadcast %3 : vector<1x128xf32> to vector<32x128xf32>
    %5 = arith.addf %2, %4 : vector<32x128xf32>
    %c0_5 = arith.constant 0 : index
    %c0_6 = arith.constant 0 : index
    %6 = vector.load %arg4[%c0_5, %c0_6] : memref<32x128xbf16, #tpu.memory_space<vmem>>, vector<32x128xbf16>
    %7 = arith.extf %6 : vector<32x128xbf16> to vector<32x128xf32>
    %8 = arith.addf %7, %5 : vector<32x128xf32>
    %9 = arith.truncf %8 : vector<32x128xf32> to vector<32x128xbf16>
    %c0_7 = arith.constant 0 : index
    %c0_8 = arith.constant 0 : index
    %10 = vector.load %arg5[%c0_7, %c0_8] : memref<32x128xbf16, #tpu.memory_space<vmem>>, vector<32x128xbf16>
    tpu.vector_store %arg5[%c0_7, %c0_8], %9 {strides = array<i32>} : memref<32x128xbf16, #tpu.memory_space<vmem>>, vector<32x128xbf16>,
    return
  }
  func.func @transform_0(%arg0: i32) -> (i32, i32) {
    %c0_i32 = arith.constant 0 : i32
    %c0_i32_0 = arith.constant 0 : i32
    return %arg0, %c0_i32 : i32, i32
  }
  func.func @transform_1(%arg0: i32) -> (i32, i32) {
    %c0_i32 = arith.constant 0 : i32
    %c0_i32_0 = arith.constant 0 : i32
    %c0_i32_1 = arith.constant 0 : i32
    return %c0_i32, %c0_i32_0 : i32, i32
  }
  func.func @transform_2(%arg0: i32) -> (i32, i32) {
    %c0_i32 = arith.constant 0 : i32
    %c0_i32_0 = arith.constant 0 : i32
    %c0_i32_1 = arith.constant 0 : i32
    return %c0_i32, %c0_i32_0 : i32, i32
  }
  func.func @transform_3(%arg0: i32) -> (i32, i32) {
    %c0_i32 = arith.constant 0 : i32
    %c0_i32_0 = arith.constant 0 : i32
    return %arg0, %c0_i32 : i32, i32
  }
  func.func @transform_4(%arg0: i32) -> (i32, i32) {
    %c0_i32 = arith.constant 0 : i32
    %c0_i32_0 = arith.constant 0 : i32
    return %arg0, %c0_i32 : i32, i32
  }
}

module attributes {stable_mosaic.version = 11 : i64} {
  func.func @_head_kernel(%arg0: memref<2x16x128xbf16, #tpu.memory_space<vmem>>, %arg1: memref<128x128xf32, #tpu.memory_space<vmem>>, %arg2: memref<1x128xf32, #tpu.memory_space<vmem>>, %arg3: memref<2x128xf32, #tpu.memory_space<vmem>>) attributes {dimension_semantics = [], scalar_prefetch = 0 : i64, scratch_operands = 0 : i64, tpu.core_type = #tpu.core_type<tc>} {
    %c0 = arith.constant 0 : index
    %c0_0 = arith.constant 0 : index
    %c0_1 = arith.constant 0 : index
    %0 = vector.load %arg0[%c0, %c0_0, %c0_1] : memref<2x16x128xbf16, #tpu.memory_space<vmem>>, vector<2x16x128xbf16>
    %1 = arith.extf %0 : vector<2x16x128xbf16> to vector<2x16x128xf32>
    %cst = arith.constant dense<0.000000e+00> : vector<2x128xf32>
    %2 = vector.multi_reduction <add>, %1, %cst [1] : vector<2x16x128xf32> to vector<2x128xf32>
    %cst_2 = arith.constant 1.600000e+01 : f32
    %3 = vector.broadcast %cst_2 : f32 to vector<2x128xf32>
    %4 = arith.divf %2, %3 : vector<2x128xf32>
    %c0_3 = arith.constant 0 : index
    %c0_4 = arith.constant 0 : index
    %5 = vector.load %arg1[%c0_3, %c0_4] : memref<128x128xf32, #tpu.memory_space<vmem>>, vector<128x128xf32>
    %cst_5 = arith.constant dense<0.000000e+00> : vector<2x128xf32>
    %6 = tpu.matmul %4, %5, %cst_5 {dimension_numbers = #tpu.dot_dimension_numbers<[1], [0], [0], [1], [0, 0, 1, 1], [], []>} : vector<2x128xf32>, vector<128x128xf32>, vector<2x128xf32> -> vector<2x128xf32>
    %c0_6 = arith.constant 0 : index
    %c0_7 = arith.constant 0 : index
    %7 = vector.load %arg2[%c0_6, %c0_7] : memref<1x128xf32, #tpu.memory_space<vmem>>, vector<1x128xf32>
    %8 = vector.broadcast %7 : vector<1x128xf32> to vector<2x128xf32>
    %9 = arith.addf %6, %8 : vector<2x128xf32>
    %c0_8 = arith.constant 0 : index
    %c0_9 = arith.constant 0 : index
    %10 = vector.load %arg3[%c0_8, %c0_9] : memref<2x128xf32, #tpu.memory_space<vmem>>, vector<2x128xf32>
    tpu.vector_store %arg3[%c0_8, %c0_9], %9 {strides = array<i32>} : memref<2x128xf32, #tpu.memory_space<vmem>>, vector<2x128xf32>,
    return
  }
}

</mosaic_0001>

<bundles_post_ra>
// kernel: nf_resnet_forward.10
= control target key start
LH: loop header
LB: loop body
LE: loop exit
PB: predicated region body
PF: predicated region fallthrough
CT: control target
= control target key end

     0   :  { %s866_s12 = smov 0   ;;  %s987_s0 = inlined_call_operand.vmem [shape: bf16[512,128], index: 0, kind: input, shape index: {}]   ;;  %s988_s1 = inlined_call_operand.vmem [shape: bf16[128,128], index: 1, kind: input, shape index: {}]   ;;  %s989_s2 = inlined_call_operand.vmem [shape: f32[1,128], index: 2, kind: input, shape index: {}]   ;;  %s990_s3 = inlined_call_operand.vmem [shape: bf16[512,128], index: 3, kind: output, shape index: {}]  }
   0x1 LB: > { %s579_s13 = sadd.s32 4294967295, %s844_s12   ;;  %p583_p0 = scmp.ge.s32.totalorder %s844_s12, 1  ;;  %s844_s12 = sphi %s866_s12, %s13_s12  }
   0x2   : > { %p138_p1 = scmp.lt.s32.totalorder %s844_s12, 3 }
   0x4   : > { %p139_p2 = pnand %p583_p0, %p138_p1 }
   0x5   : > { %s584_s22 = sshll.u32 (!%p139_p2), %s579_s13, 5 }
   0x6   : > { %142 = sbr.rel (%p139_p2) target bundleno = 238 (0xee), region = 32  ;;  %p163_p3 = scmp.lt.s32.totalorder (!%p139_p2), %s584_s22, 63 }
   0xb   : > { %v709_v0 = vld [vmem:[%s988_s1 + $0x38] sm:$0xff]  ;;  %v708_v1 = vld [vmem:[%s988_s1 + $0x30] sm:$0xff]  ;;  %v707_v2 = vld [vmem:[%s988_s1 + $0x28] sm:$0xff]  ;;  %s992_s22 = smov (!%p163_p3, %s584_s22), 63 }
   0xc   : > { %370 = vmatpush.bf16.msra.mxu0 %v709_v0  ;;  %805 = vmatpush.bf16.msra.mxu1 %v709_v0  ;;  %v706_v3 = vld [vmem:[%s988_s1 + $0x20] sm:$0xff]  ;;  %v705_v4 = vld [vmem:[%s988_s1 + $0x18] sm:$0xff]  ;;  %v704_v5 = vld [vmem:[%s988_s1 + $0x10] sm:$0xff]  ;;  %s585_s29 = sshll.u32 %s992_s22, 2 }
   0xd   : > { %806 = vmatpush.bf16.msra.mxu2 %v709_v0  ;;  %807 = vmatpush.bf16.msra.mxu3 %v709_v0  ;;  %v703_v6 = vld [vmem:[%s988_s1 + $0x8] sm:$0xff]  ;;  %v702_v7 = vld [vmem:[%s988_s1] sm:$0xff]  ;;  %s906_s7 = scalar_lea.vmem %s987_s0, %s585_s29  ;;  %s938_s13 = scalar_lea.vmem %s990_s3, %s585_s29 }
   0xe   : > { %v686_v8 = vld [vmem:[%s906_s7] sm:$0xff]  ;;  %v687_v12 = vld [vmem:[%s906_s7 + $0x8] sm:$0xff]  ;;  %v688_v16 = vld [vmem:[%s906_s7 + $0x10] sm:$0xff] }
   0xf   : > { %v690_v9 = vld [vmem:[%s906_s7 + $0x20] sm:$0xff]  ;;  %v691_v13 = vld [vmem:[%s906_s7 + $0x28] sm:$0xff]  ;;  %v692_v17 = vld [vmem:[%s906_s7 + $0x30] sm:$0xff] }
  0x10   : > { %371 = vmatpush.bf16.msra.mxu0 %v708_v1  ;;  %808 = vmatpush.bf16.msra.mxu1 %v708_v1  ;;  %v694_v10 = vld [vmem:[%s906_s7 + $0x40] sm:$0xff]  ;;  %v695_v14 = vld [vmem:[%s906_s7 + $0x48] sm:$0xff]  ;;  %v696_v18 = vld [vmem:[%s906_s7 + $0x50] sm:$0xff] }
  0x11   : > { %809 = vmatpush.bf16.msra.mxu2 %v708_v1  ;;  %810 = vmatpush.bf16.msra.mxu3 %v708_v1  ;;  %v698_v11 = vld [vmem:[%s906_s7 + $0x60] sm:$0xff]  ;;  %v699_v15 = vld [vmem:[%s906_s7 + $0x68] sm:$0xff]  ;;  %v700_v19 = vld [vmem:[%s906_s7 + $0x70] sm:$0xff] }
  0x12   : > { %v689_v20 = vld [vmem:[%s906_s7 + $0x18] sm:$0xff]  ;;  %v927_v26 = vld [vmem:[%s989_s2] ss:$0 sm:$0xff] }
  0x13   : > { %v693_v21 = vld [vmem:[%s906_s7 + $0x38] sm:$0xff] }
  0x14   : > { %372 = vmatpush.bf16.msra.mxu0 %v707_v2  ;;  %811 = vmatpush.bf16.msra.mxu1 %v707_v2  ;;  %v697_v22 = vld [vmem:[%s906_s7 + $0x58] sm:$0xff] }
  0x15   : > { %812 = vmatpush.bf16.msra.mxu2 %v707_v2  ;;  %813 = vmatpush.bf16.msra.mxu3 %v707_v2  ;;  %v701_v23 = vld [vmem:[%s906_s7 + $0x78] sm:$0xff] }
  0x18   : > { %373 = vmatpush.bf16.msra.mxu0 %v706_v3  ;;  %814 = vmatpush.bf16.msra.mxu1 %v706_v3 }
  0x19   : > { %815 = vmatpush.bf16.msra.mxu2 %v706_v3  ;;  %816 = vmatpush.bf16.msra.mxu3 %v706_v3 }
  0x1c   : > { %374 = vmatpush.bf16.msra.mxu0 %v705_v4  ;;  %817 = vmatpush.bf16.msra.mxu1 %v705_v4 }
  0x1d   : > { %818 = vmatpush.bf16.msra.mxu2 %v705_v4  ;;  %819 = vmatpush.bf16.msra.mxu3 %v705_v4 }
  0x20   : > { %375 = vmatpush.bf16.msra.mxu0 %v704_v5  ;;  %820 = vmatpush.bf16.msra.mxu1 %v704_v5 }
  0x21   : > { %821 = vmatpush.bf16.msra.mxu2 %v704_v5  ;;  %822 = vmatpush.bf16.msra.mxu3 %v704_v5 }
  0x24   : > { %376 = vmatpush.bf16.msra.mxu0 %v703_v6  ;;  %823 = vmatpush.bf16.msra.mxu1 %v703_v6 }
  0x25   : > { %824 = vmatpush.bf16.msra.mxu2 %v703_v6  ;;  %825 = vmatpush.bf16.msra.mxu3 %v703_v6 }
  0x28   : > { %377 = vmatpush.bf16.msra.mxu0 %v702_v7  ;;  %826 = vmatpush.bf16.msra.mxu1 %v702_v7 }
  0x29   : > { %827 = vmatpush.bf16.msra.mxu2 %v702_v7  ;;  %828 = vmatpush.bf16.msra.mxu3 %v702_v7 }
  0x2b   : > { %378 = vmatmul.bf16.vlgmr.msra.gmra.mxu0 %v686_v8  ;;  %398 = vmatmul.bf16.vlgmr.msra.gmra.mxu1 %v690_v9 }
  0x2c   : > { %418 = vmatmul.bf16.vlgmr.msra.gmra.mxu2 %v694_v10  ;;  %438 = vmatmul.bf16.vlgmr.msra.gmra.mxu3 %v698_v11 }
  0x3b   : > { %383 = vmatmul.bf16.gmra.mxu0 %v687_v12  ;;  %403 = vmatmul.bf16.gmra.mxu1 %v691_v13 }
  0x3c   : > { %423 = vmatmul.bf16.gmra.mxu2 %v695_v14  ;;  %443 = vmatmul.bf16.gmra.mxu3 %v699_v15 }
  0x4b   : > { %388 = vmatmul.bf16.gmra.mxu0 %v688_v16  ;;  %408 = vmatmul.bf16.gmra.mxu1 %v692_v17 }
  0x4c   : > { %428 = vmatmul.bf16.gmra.mxu2 %v696_v18  ;;  %448 = vmatmul.bf16.gmra.mxu3 %v700_v19 }
  0x5b   : > { %393 = vmatmul.bf16.gmra.mxu0 %v689_v20  ;;  %413 = vmatmul.bf16.gmra.mxu1 %v693_v21 }
  0x5c   : > { %433 = vmatmul.bf16.gmra.mxu2 %v697_v22  ;;  %453 = vmatmul.bf16.gmra.mxu3 %v701_v23 }
  0xa8   : > { %v379_v24 = vpop.f32.mrf.mxu0  ;;  %v399_v25 = vpop.f32.mrf.mxu1 }
  0xa9   : > { %v380_v31 = vadd.f32 %v927_v26, %v379_v24  ;;  %v400_v32 = vadd.f32 %v927_v26, %v399_v25 }
  0xaf   : > { %v419_v27 = vpop.f32.mrf.mxu2  ;;  %v439_v28 = vpop.f32.mrf.mxu3 }
  0xb0   : > { %v381_v29 = vpop.f32.mrf.mxu0  ;;  %v401_v30 = vpop.f32.mrf.mxu1  ;;  %v420_v39 = vadd.f32 %v927_v26, %v419_v27  ;;  %v440_v40 = vadd.f32 %v927_v26, %v439_v28 }
  0xb1   : > { %v382_v33 = vadd.f32 %v927_v26, %v381_v29  ;;  %v402_v34 = vadd.f32 %v927_v26, %v401_v30 }
  0xb3   : > { %v713_v35 = vpack.c.bf16 %v382_v33, %v380_v31  ;;  %v733_v36 = vpack.c.bf16 %v402_v34, %v400_v32 }
  0xb5   : > { %714 = vst [vmem:[%s938_s13] sm:$0xff] %v713_v35  }
  0xb6   : > { %793 = vst [vmem:[%s938_s13 + $0x20] sm:$0xff] %v733_v36  }
  0xb7   : > { %v421_v37 = vpop.f32.mrf.mxu2  ;;  %v441_v38 = vpop.f32.mrf.mxu3 }
  0xb8   : > { %v422_v41 = vadd.f32 %v927_v26, %v421_v37  ;;  %v442_v42 = vadd.f32 %v927_v26, %v441_v38  ;;  %v384_v43 = vpop.f32.mrf.mxu0  ;;  %v404_v44 = vpop.f32.mrf.mxu1 }
  0xb9   : > { %v385_v51 = vadd.f32 %v927_v26, %v384_v43  ;;  %v405_v52 = vadd.f32 %v927_v26, %v404_v44 }
  0xba   : > { %v753_v45 = vpack.c.bf16 %v422_v41, %v420_v39  ;;  %v773_v46 = vpack.c.bf16 %v442_v42, %v440_v40 }
  0xbc   : > { %797 = vst [vmem:[%s938_s13 + $0x40] sm:$0xff] %v753_v45  }
  0xbd   : > { %801 = vst [vmem:[%s938_s13 + $0x60] sm:$0xff] %v773_v46  }
  0xbf   : > { %v424_v47 = vpop.f32.mrf.mxu2  ;;  %v444_v48 = vpop.f32.mrf.mxu3 }
  0xc0   : > { %v386_v49 = vpop.f32.mrf.mxu0  ;;  %v406_v50 = vpop.f32.mrf.mxu1  ;;  %v425_v59 = vadd.f32 %v927_v26, %v424_v47  ;;  %v445_v60 = vadd.f32 %v927_v26, %v444_v48 }
  0xc1   : > { %v387_v53 = vadd.f32 %v927_v26, %v386_v49  ;;  %v407_v54 = vadd.f32 %v927_v26, %v406_v50 }
  0xc3   : > { %v718_v55 = vpack.c.bf16 %v387_v53, %v385_v51  ;;  %v738_v56 = vpack.c.bf16 %v407_v54, %v405_v52 }
  0xc5   : > { %790 = vst [vmem:[%s938_s13 + $0x8] sm:$0xff] %v718_v55  }
  0xc6   : > { %794 = vst [vmem:[%s938_s13 + $0x28] sm:$0xff] %v738_v56  }
  0xc7   : > { %v426_v57 = vpop.f32.mrf.mxu2  ;;  %v446_v58 = vpop.f32.mrf.mxu3 }
  0xc8   : > { %v427_v61 = vadd.f32 %v927_v26, %v426_v57  ;;  %v447_v62 = vadd.f32 %v927_v26, %v446_v58  ;;  %v389_v63 = vpop.f32.mrf.mxu0  ;;  %v409_v0 = vpop.f32.mrf.mxu1 }
  0xc9   : > { %v390_v7 = vadd.f32 %v927_v26, %v389_v63  ;;  %v410_v8 = vadd.f32 %v927_v26, %v409_v0 }
  0xca   : > { %v758_v1 = vpack.c.bf16 %v427_v61, %v425_v59  ;;  %v778_v2 = vpack.c.bf16 %v447_v62, %v445_v60 }
  0xcc   : > { %798 = vst [vmem:[%s938_s13 + $0x48] sm:$0xff] %v758_v1  }
  0xcd   : > { %802 = vst [vmem:[%s938_s13 + $0x68] sm:$0xff] %v778_v2  }
  0xcf   : > { %v429_v3 = vpop.f32.mrf.mxu2  ;;  %v449_v4 = vpop.f32.mrf.mxu3 }
  0xd0   : > { %v391_v5 = vpop.f32.mrf.mxu0  ;;  %v411_v6 = vpop.f32.mrf.mxu1  ;;  %v430_v15 = vadd.f32 %v927_v26, %v429_v3  ;;  %v450_v16 = vadd.f32 %v927_v26, %v449_v4 }
  0xd1   : > { %v392_v9 = vadd.f32 %v927_v26, %v391_v5  ;;  %v412_v10 = vadd.f32 %v927_v26, %v411_v6 }
  0xd3   : > { %v723_v11 = vpack.c.bf16 %v392_v9, %v390_v7  ;;  %v743_v12 = vpack.c.bf16 %v412_v10, %v410_v8 }
  0xd5   : > { %791 = vst [vmem:[%s938_s13 + $0x10] sm:$0xff] %v723_v11  }
  0xd6   : > { %795 = vst [vmem:[%s938_s13 + $0x30] sm:$0xff] %v743_v12  }
  0xd7   : > { %v431_v13 = vpop.f32.mrf.mxu2  ;;  %v451_v14 = vpop.f32.mrf.mxu3 }
  0xd8   : > { %v432_v17 = vadd.f32 %v927_v26, %v431_v13  ;;  %v452_v18 = vadd.f32 %v927_v26, %v451_v14  ;;  %v394_v19 = vpop.f32.mrf.mxu0  ;;  %v414_v20 = vpop.f32.mrf.mxu1 }
  0xd9   : > { %v395_v28 = vadd.f32 %v927_v26, %v394_v19  ;;  %v415_v29 = vadd.f32 %v927_v26, %v414_v20 }
  0xda   : > { %v763_v21 = vpack.c.bf16 %v432_v17, %v430_v15  ;;  %v783_v22 = vpack.c.bf16 %v452_v18, %v450_v16 }
  0xdc   : > { %799 = vst [vmem:[%s938_s13 + $0x50] sm:$0xff] %v763_v21  }
  0xdd   : > { %803 = vst [vmem:[%s938_s13 + $0x70] sm:$0xff] %v783_v22  }
  0xdf   : > { %v434_v23 = vpop.f32.mrf.mxu2  ;;  %v454_v24 = vpop.f32.mrf.mxu3 }
  0xe0   : > { %v396_v25 = vpop.f32.mrf.mxu0  ;;  %v416_v27 = vpop.f32.mrf.mxu1  ;;  %v435_v36 = vadd.f32 %v927_v26, %v434_v23  ;;  %v455_v37 = vadd.f32 %v927_v26, %v454_v24 }
  0xe1   : > { %v397_v30 = vadd.f32 %v927_v26, %v396_v25  ;;  %v417_v31 = vadd.f32 %v927_v26, %v416_v27 }
  0xe3   : > { %v728_v32 = vpack.c.bf16 %v397_v30, %v395_v28  ;;  %v748_v33 = vpack.c.bf16 %v417_v31, %v415_v29 }
  0xe5   : > { %792 = vst [vmem:[%s938_s13 + $0x18] sm:$0xff] %v728_v32  }
  0xe6   : > { %796 = vst [vmem:[%s938_s13 + $0x38] sm:$0xff] %v748_v33  }
  0xe7   : > { %v436_v34 = vpop.f32.mrf.mxu2  ;;  %v456_v35 = vpop.f32.mrf.mxu3 }
  0xe8   : > { %v437_v38 = vadd.f32 %v927_v26, %v436_v34  ;;  %v457_v39 = vadd.f32 %v927_v26, %v456_v35 }
  0xea   : > { %v768_v40 = vpack.c.bf16 %v437_v38, %v435_v36  ;;  %v788_v41 = vpack.c.bf16 %v457_v39, %v455_v37 }
  0xec   : > { %800 = vst [vmem:[%s938_s13 + $0x58] sm:$0xff] %v768_v40  }
  0xed   : > { %804 = vst [vmem:[%s938_s13 + $0x78] sm:$0xff] %v788_v41  }
  0xee PF: > { %s13_s12 = sadd.s32 1, %s844_s12  }
  0xef   : > { %p10_p4 = scmp.ge.s32.totalorder %s13_s12, 4  }
  0xf1   :  { %12 = sbr.rel (!%p10_p4) target bundleno = 1 (0x1), region = 62 }

// kernel: nf_resnet_forward.11
= control target key start
LH: loop header
LB: loop body
LE: loop exit
PB: predicated region body
PF: predicated region fallthrough
CT: control target
= control target key end

     0   :  { %s1232_s12 = smov 0   ;;  %s1422_s0 = inlined_call_operand.vmem [shape: bf16[512,256], index: 0, kind: input, shape index: {}]   ;;  %s1423_s1 = inlined_call_operand.vmem [shape: bf16[256,128], index: 1, kind: input, shape index: {}]   ;;  %s1424_s2 = inlined_call_operand.vmem [shape: f32[1,128], index: 2, kind: input, shape index: {}]   ;;  %s1425_s3 = inlined_call_operand.vmem [shape: bf16[512,128], index: 3, kind: output, shape index: {}]  }
   0x1 LB: > { %s831_s13 = sadd.s32 4294967295, %s1210_s12   ;;  %p835_p0 = scmp.ge.s32.totalorder %s1210_s12, 1  ;;  %s1210_s12 = sphi %s1232_s12, %s13_s12  }
   0x2   : > { %p139_p1 = scmp.lt.s32.totalorder %s1210_s12, 3 }
   0x4   : > { %p140_p2 = pnand %p835_p0, %p139_p1 }
   0x5   : > { %s836_s26 = sshll.u32 (!%p140_p2), %s831_s13, 5 }
   0x6   : > { %143 = sbr.rel (%p140_p2) target bundleno = 304 (0x130), region = 32  ;;  %p165_p3 = scmp.lt.s32.totalorder (!%p140_p2), %s836_s26, 63 }
   0xb   : > { %v1075_v0 = vld [vmem:[%s1423_s1 + $0x38] sm:$0xff]  ;;  %v1074_v2 = vld [vmem:[%s1423_s1 + $0x30] sm:$0xff]  ;;  %v1073_v4 = vld [vmem:[%s1423_s1 + $0x28] sm:$0xff]  ;;  %s1427_s26 = smov (!%p165_p3, %s836_s26), 63 }
   0xc   : > { %v1083_v1 = vld [vmem:[%s1423_s1 + $0x78] sm:$0xff]  ;;  %501 = vmatpush.bf16.msra.mxu0 %v1075_v0  ;;  %1179 = vmatpush.bf16.msra.mxu2 %v1075_v0  ;;  %v1082_v3 = vld [vmem:[%s1423_s1 + $0x70] sm:$0xff]  ;;  %v1081_v5 = vld [vmem:[%s1423_s1 + $0x68] sm:$0xff]  ;;  %s1035_s13 = sshll.u32 %s1427_s26, 3  ;;  %s840_s28 = sshll.u32 %s1427_s26, 2 }
   0xd   : > { %590 = vmatpush.bf16.msra.mxu1 %v1083_v1  ;;  %1187 = vmatpush.bf16.msra.mxu3 %v1083_v1  ;;  %v1072_v6 = vld [vmem:[%s1423_s1 + $0x20] sm:$0xff]  ;;  %v1071_v8 = vld [vmem:[%s1423_s1 + $0x18] sm:$0xff]  ;;  %v1070_v10 = vld [vmem:[%s1423_s1 + $0x10] sm:$0xff]  ;;  %s1285_s18 = scalar_lea.vmem %s1422_s0, %s1035_s13  ;;  %s1372_s4 = scalar_lea.vmem %s1425_s3, %s840_s28 }
   0xe   : > { %v1080_v7 = vld [vmem:[%s1423_s1 + $0x60] sm:$0xff]  ;;  %v1079_v9 = vld [vmem:[%s1423_s1 + $0x58] sm:$0xff]  ;;  %v1078_v11 = vld [vmem:[%s1423_s1 + $0x50] sm:$0xff] }
   0xf   : > { %v1069_v12 = vld [vmem:[%s1423_s1 + $0x8] sm:$0xff]  ;;  %v1068_v14 = vld [vmem:[%s1423_s1] sm:$0xff]  ;;  %v851_v28 = vld [vmem:[%s1285_s18 + $0x10] sm:$0xf] }
  0x10   : > { %502 = vmatpush.bf16.msra.mxu0 %v1074_v2  ;;  %1180 = vmatpush.bf16.msra.mxu2 %v1074_v2  ;;  %v1077_v13 = vld [vmem:[%s1423_s1 + $0x48] sm:$0xff]  ;;  %v1076_v15 = vld [vmem:[%s1423_s1 + $0x40] sm:$0xff]  ;;  %v1039_v29 = vld [vmem:[%s1285_s18 + $0x14] sm:$0xf0] }
  0x11   : > { %591 = vmatpush.bf16.msra.mxu1 %v1082_v3  ;;  %1188 = vmatpush.bf16.msra.mxu3 %v1082_v3  ;;  %v843_v16 = vld [vmem:[%s1285_s18] sm:$0xf]  ;;  %v1037_v17 = vld [vmem:[%s1285_s18 + $0x4] sm:$0xf0]  ;;  %v1036_v20 = vld [vmem:[%s1285_s18 + $0x4] sm:$0xf]  ;;  %v852_v36 = vor.u32 %v1039_v29, %v851_v28 }
  0x12   : > { %v907_v18 = vld [vmem:[%s1285_s18 + $0x80] sm:$0xf]  ;;  %v1053_v19 = vld [vmem:[%s1285_s18 + $0x84] sm:$0xf0]  ;;  %v845_v21 = vld [vmem:[%s1285_s18 + $0x8] sm:$0xf0]  ;;  %v844_v24 = vor.u32 %v1037_v17, %v843_v16 }
  0x13   : > { %v1052_v22 = vld [vmem:[%s1285_s18 + $0x84] sm:$0xf]  ;;  %v909_v23 = vld [vmem:[%s1285_s18 + $0x88] sm:$0xf0]  ;;  %v908_v25 = vor.u32 %v1053_v19, %v907_v18  ;;  %v848_v26 = vor.u32 %v1036_v20, %v845_v21  ;;  %v915_v30 = vld [vmem:[%s1285_s18 + $0x90] sm:$0xf] }
  0x14   : > { %503 = vmatpush.bf16.msra.mxu0 %v1073_v4  ;;  %1181 = vmatpush.bf16.msra.mxu2 %v1073_v4  ;;  %v912_v27 = vor.u32 %v1052_v22, %v909_v23  ;;  %v1055_v31 = vld [vmem:[%s1285_s18 + $0x94] sm:$0xf0]  ;;  %v1038_v32 = vld [vmem:[%s1285_s18 + $0x14] sm:$0xf]  ;;  %v853_v33 = vld [vmem:[%s1285_s18 + $0x18] sm:$0xf0] }
  0x15   : > { %592 = vmatpush.bf16.msra.mxu1 %v1081_v5  ;;  %1189 = vmatpush.bf16.msra.mxu3 %v1081_v5  ;;  %v1054_v34 = vld [vmem:[%s1285_s18 + $0x94] sm:$0xf]  ;;  %v917_v35 = vld [vmem:[%s1285_s18 + $0x98] sm:$0xf0]  ;;  %v916_v37 = vor.u32 %v1055_v31, %v915_v30  ;;  %v856_v38 = vor.u32 %v1038_v32, %v853_v33  ;;  %v859_v40 = vld [vmem:[%s1285_s18 + $0x20] sm:$0xf] }
  0x16   : > { %v920_v39 = vor.u32 %v1054_v34, %v917_v35  ;;  %v1041_v41 = vld [vmem:[%s1285_s18 + $0x24] sm:$0xf0]  ;;  %v923_v42 = vld [vmem:[%s1285_s18 + $0xa0] sm:$0xf]  ;;  %v1040_v44 = vld [vmem:[%s1285_s18 + $0x24] sm:$0xf] }
  0x17   : > { %v1057_v43 = vld [vmem:[%s1285_s18 + $0xa4] sm:$0xf0]  ;;  %v861_v45 = vld [vmem:[%s1285_s18 + $0x28] sm:$0xf0]  ;;  %v1056_v46 = vld [vmem:[%s1285_s18 + $0xa4] sm:$0xf]  ;;  %v860_v48 = vor.u32 %v1041_v41, %v859_v40 }
  0x18   : > { %504 = vmatpush.bf16.msra.mxu0 %v1072_v6  ;;  %1182 = vmatpush.bf16.msra.mxu2 %v1072_v6  ;;  %v925_v47 = vld [vmem:[%s1285_s18 + $0xa8] sm:$0xf0]  ;;  %v924_v49 = vor.u32 %v1057_v43, %v923_v42  ;;  %v864_v50 = vor.u32 %v1040_v44, %v861_v45  ;;  %v867_v52 = vld [vmem:[%s1285_s18 + $0x30] sm:$0xf]  ;;  %v1043_v53 = vld [vmem:[%s1285_s18 + $0x34] sm:$0xf0] }
  0x19   : > { %593 = vmatpush.bf16.msra.mxu1 %v1080_v7  ;;  %1190 = vmatpush.bf16.msra.mxu3 %v1080_v7  ;;  %v928_v51 = vor.u32 %v1056_v46, %v925_v47  ;;  %v931_v54 = vld [vmem:[%s1285_s18 + $0xb0] sm:$0xf]  ;;  %v1059_v55 = vld [vmem:[%s1285_s18 + $0xb4] sm:$0xf0]  ;;  %v1042_v56 = vld [vmem:[%s1285_s18 + $0x34] sm:$0xf]  ;;  %v868_v60 = vor.u32 %v1043_v53, %v867_v52 }
  0x1a   : > { %v869_v57 = vld [vmem:[%s1285_s18 + $0x38] sm:$0xf0]  ;;  %v1058_v58 = vld [vmem:[%s1285_s18 + $0xb4] sm:$0xf]  ;;  %v932_v61 = vor.u32 %v1059_v55, %v931_v54  ;;  %v875_v0 = vld [vmem:[%s1285_s18 + $0x40] sm:$0xf] }
  0x1b   : > { %v933_v59 = vld [vmem:[%s1285_s18 + $0xb8] sm:$0xf0]  ;;  %v872_v62 = vor.u32 %v1042_v56, %v869_v57  ;;  %v1045_v1 = vld [vmem:[%s1285_s18 + $0x44] sm:$0xf0]  ;;  %v939_v2 = vld [vmem:[%s1285_s18 + $0xc0] sm:$0xf] }
  0x1c   : > { %505 = vmatpush.bf16.msra.mxu0 %v1071_v8  ;;  %1183 = vmatpush.bf16.msra.mxu2 %v1071_v8  ;;  %v936_v63 = vor.u32 %v1058_v58, %v933_v59  ;;  %v1061_v3 = vld [vmem:[%s1285_s18 + $0xc4] sm:$0xf0]  ;;  %v1044_v4 = vld [vmem:[%s1285_s18 + $0x44] sm:$0xf]  ;;  %v877_v5 = vld [vmem:[%s1285_s18 + $0x48] sm:$0xf0]  ;;  %v876_v8 = vor.u32 %v1045_v1, %v875_v0 }
  0x1d   : > { %594 = vmatpush.bf16.msra.mxu1 %v1079_v9  ;;  %1191 = vmatpush.bf16.msra.mxu3 %v1079_v9  ;;  %v1060_v6 = vld [vmem:[%s1285_s18 + $0xc4] sm:$0xf]  ;;  %v941_v7 = vld [vmem:[%s1285_s18 + $0xc8] sm:$0xf0]  ;;  %v940_v9 = vor.u32 %v1061_v3, %v939_v2  ;;  %v1046_v16 = vld [vmem:[%s1285_s18 + $0x54] sm:$0xf] }
  0x1e   : > { %v885_v17 = vld [vmem:[%s1285_s18 + $0x58] sm:$0xf0]  ;;  %v1062_v18 = vld [vmem:[%s1285_s18 + $0xd4] sm:$0xf]  ;;  %v1048_v28 = vld [vmem:[%s1285_s18 + $0x64] sm:$0xf] }
  0x1f   : > { %v949_v19 = vld [vmem:[%s1285_s18 + $0xd8] sm:$0xf0]  ;;  %v888_v22 = vor.u32 %v1046_v16, %v885_v17  ;;  %v893_v29 = vld [vmem:[%s1285_s18 + $0x68] sm:$0xf0]  ;;  %v1064_v30 = vld [vmem:[%s1285_s18 + $0xe4] sm:$0xf] }
  0x20   : > { %506 = vmatpush.bf16.msra.mxu0 %v1070_v10  ;;  %1184 = vmatpush.bf16.msra.mxu2 %v1070_v10  ;;  %v880_v10 = vor.u32 %v1044_v4, %v877_v5  ;;  %v952_v23 = vor.u32 %v1062_v18, %v949_v19  ;;  %v957_v31 = vld [vmem:[%s1285_s18 + $0xe8] sm:$0xf0]  ;;  %v896_v34 = vor.u32 %v1048_v28, %v893_v29  ;;  %v1050_v40 = vld [vmem:[%s1285_s18 + $0x74] sm:$0xf]  ;;  %v901_v41 = vld [vmem:[%s1285_s18 + $0x78] sm:$0xf0] }
  0x21   : > { %595 = vmatpush.bf16.msra.mxu1 %v1078_v11  ;;  %1192 = vmatpush.bf16.msra.mxu3 %v1078_v11  ;;  %v944_v11 = vor.u32 %v1060_v6, %v941_v7  ;;  %v960_v35 = vor.u32 %v1064_v30, %v957_v31  ;;  %v1066_v42 = vld [vmem:[%s1285_s18 + $0xf4] sm:$0xf]  ;;  %v965_v43 = vld [vmem:[%s1285_s18 + $0xf8] sm:$0xf0]  ;;  %v904_v46 = vor.u32 %v1050_v40, %v901_v41 }
  0x22   : > { %v968_v47 = vor.u32 %v1066_v42, %v965_v43 }
  0x24   : > { %507 = vmatpush.bf16.msra.mxu0 %v1069_v12  ;;  %1185 = vmatpush.bf16.msra.mxu2 %v1069_v12  ;;  %v883_v12 = vld [vmem:[%s1285_s18 + $0x50] sm:$0xf] }
  0x25   : > { %596 = vmatpush.bf16.msra.mxu1 %v1077_v13  ;;  %1193 = vmatpush.bf16.msra.mxu3 %v1077_v13  ;;  %v1047_v13 = vld [vmem:[%s1285_s18 + $0x54] sm:$0xf0] }
  0x26   : > { %v884_v20 = vor.u32 %v1047_v13, %v883_v12 }
  0x28   : > { %508 = vmatpush.bf16.msra.mxu0 %v1068_v14  ;;  %1186 = vmatpush.bf16.msra.mxu2 %v1068_v14  ;;  %v947_v14 = vld [vmem:[%s1285_s18 + $0xd0] sm:$0xf] }
  0x29   : > { %597 = vmatpush.bf16.msra.mxu1 %v1076_v15  ;;  %1194 = vmatpush.bf16.msra.mxu3 %v1076_v15  ;;  %v1063_v15 = vld [vmem:[%s1285_s18 + $0xd4] sm:$0xf0] }
  0x2a   : > { %v948_v21 = vor.u32 %v1063_v15, %v947_v14 }
  0x2b   : > { %509 = vmatmul.bf16.vlgmr.msra.gmra.mxu0 %v844_v24  ;;  %549 = vmatmul.bf16.vlgmr.msra.gmra.mxu2 %v908_v25  ;;  %v891_v24 = vld [vmem:[%s1285_s18 + $0x60] sm:$0xf]  ;;  %v1049_v25 = vld [vmem:[%s1285_s18 + $0x64] sm:$0xf0] }
  0x2c   : > { %598 = vmatmul.bf16.vlgmr.msra.gmra.mxu1 %v848_v26  ;;  %638 = vmatmul.bf16.vlgmr.msra.gmra.mxu3 %v912_v27  ;;  %v955_v26 = vld [vmem:[%s1285_s18 + $0xe0] sm:$0xf]  ;;  %v1065_v27 = vld [vmem:[%s1285_s18 + $0xe4] sm:$0xf0]  ;;  %v892_v32 = vor.u32 %v1049_v25, %v891_v24 }
  0x2d   : > { %v956_v33 = vor.u32 %v1065_v27, %v955_v26 }
  0x3b   : > { %514 = vmatmul.bf16.gmra.mxu0 %v852_v36  ;;  %554 = vmatmul.bf16.gmra.mxu2 %v916_v37  ;;  %v899_v36 = vld [vmem:[%s1285_s18 + $0x70] sm:$0xf]  ;;  %v1051_v37 = vld [vmem:[%s1285_s18 + $0x74] sm:$0xf0] }
  0x3c   : > { %603 = vmatmul.bf16.gmra.mxu1 %v856_v38  ;;  %643 = vmatmul.bf16.gmra.mxu3 %v920_v39  ;;  %v963_v38 = vld [vmem:[%s1285_s18 + $0xf0] sm:$0xf]  ;;  %v1067_v39 = vld [vmem:[%s1285_s18 + $0xf4] sm:$0xf0]  ;;  %v900_v44 = vor.u32 %v1051_v37, %v899_v36 }
  0x3d   : > { %v964_v45 = vor.u32 %v1067_v39, %v963_v38 }
  0x4b   : > { %519 = vmatmul.bf16.gmra.mxu0 %v860_v48  ;;  %559 = vmatmul.bf16.gmra.mxu2 %v924_v49  ;;  %v1363_v49 = vld [vmem:[%s1424_s2] ss:$0 sm:$0xff] }
  0x4c   : > { %608 = vmatmul.bf16.gmra.mxu1 %v864_v50  ;;  %648 = vmatmul.bf16.gmra.mxu3 %v928_v51 }
  0x5b   : > { %524 = vmatmul.bf16.gmra.mxu0 %v868_v60  ;;  %564 = vmatmul.bf16.gmra.mxu2 %v932_v61 }
  0x5c   : > { %613 = vmatmul.bf16.gmra.mxu1 %v872_v62  ;;  %653 = vmatmul.bf16.gmra.mxu3 %v936_v63 }
  0x6b   : > { %529 = vmatmul.bf16.gmra.mxu0 %v876_v8  ;;  %569 = vmatmul.bf16.gmra.mxu2 %v940_v9 }
  0x6c   : > { %618 = vmatmul.bf16.gmra.mxu1 %v880_v10  ;;  %658 = vmatmul.bf16.gmra.mxu3 %v944_v11 }
  0x7b   : > { %534 = vmatmul.bf16.gmra.mxu0 %v884_v20  ;;  %574 = vmatmul.bf16.gmra.mxu2 %v948_v21 }
  0x7c   : > { %623 = vmatmul.bf16.gmra.mxu1 %v888_v22  ;;  %663 = vmatmul.bf16.gmra.mxu3 %v952_v23 }
  0x8b   : > { %539 = vmatmul.bf16.gmra.mxu0 %v892_v32  ;;  %579 = vmatmul.bf16.gmra.mxu2 %v956_v33 }
  0x8c   : > { %628 = vmatmul.bf16.gmra.mxu1 %v896_v34  ;;  %668 = vmatmul.bf16.gmra.mxu3 %v960_v35 }
  0x9b   : > { %544 = vmatmul.bf16.gmra.mxu0 %v900_v44  ;;  %584 = vmatmul.bf16.gmra.mxu2 %v964_v45 }
  0x9c   : > { %633 = vmatmul.bf16.gmra.mxu1 %v904_v46  ;;  %673 = vmatmul.bf16.gmra.mxu3 %v968_v47 }
  0xa8   : > { %v510_v48 = vpop.f32.mrf.mxu0 }
  0xa9   : > { %v599_v50 = vpop.f32.mrf.mxu1  ;;  %v511_v51 = vadd.f32 %v1363_v49, %v510_v48 }
  0xab   : > { %v600_v55 = vadd.f32 %v599_v50, %v511_v51 }
  0xad   : > { %v679_v60 = vmax.f32 %v600_v55, 0.0 }
  0xae   : > { %v550_v52 = vpop.f32.mrf.mxu2 }
  0xaf   : > { %v639_v53 = vpop.f32.mrf.mxu3  ;;  %v551_v58 = vadd.f32 %v1363_v49, %v550_v52 }
  0xb0   : > { %v512_v54 = vpop.f32.mrf.mxu0 }
  0xb1   : > { %v513_v56 = vadd.f32 %v1363_v49, %v512_v54  ;;  %v601_v57 = vpop.f32.mrf.mxu1  ;;  %v640_v63 = vadd.f32 %v639_v53, %v551_v58 }
  0xb3   : > { %v602_v59 = vadd.f32 %v601_v57, %v513_v56  ;;  %v695_v6 = vmax.f32 %v640_v63, 0.0 }
  0xb5   : > { %v680_v61 = vmax.f32 %v602_v59, 0.0 }
  0xb6   : > { %v552_v62 = vpop.f32.mrf.mxu2 }
  0xb7   : > { %v1087_v0 = vpack.c.bf16 %v680_v61, %v679_v60  ;;  %v553_v1 = vadd.f32 %v1363_v49, %v552_v62  ;;  %v641_v2 = vpop.f32.mrf.mxu3 }
  0xb8   : > { %v515_v3 = vpop.f32.mrf.mxu0 }
  0xb9   : > { %1088 = vst [vmem:[%s1372_s4] sm:$0xff] %v1087_v0   ;;  %v642_v4 = vadd.f32 %v641_v2, %v553_v1  ;;  %v604_v5 = vpop.f32.mrf.mxu1  ;;  %v516_v9 = vadd.f32 %v1363_v49, %v515_v3 }
  0xbb   : > { %v696_v7 = vmax.f32 %v642_v4, 0.0  ;;  %v605_v13 = vadd.f32 %v604_v5, %v516_v9 }
  0xbd   : > { %v1127_v8 = vpack.c.bf16 %v696_v7, %v695_v6  ;;  %v681_v18 = vmax.f32 %v605_v13, 0.0 }
  0xbe   : > { %v555_v10 = vpop.f32.mrf.mxu2 }
  0xbf   : > { %1171 = vst [vmem:[%s1372_s4 + $0x40] sm:$0xff] %v1127_v8   ;;  %v644_v11 = vpop.f32.mrf.mxu3  ;;  %v556_v16 = vadd.f32 %v1363_v49, %v555_v10 }
  0xc0   : > { %v517_v12 = vpop.f32.mrf.mxu0 }
  0xc1   : > { %v518_v14 = vadd.f32 %v1363_v49, %v517_v12  ;;  %v606_v15 = vpop.f32.mrf.mxu1  ;;  %v645_v21 = vadd.f32 %v644_v11, %v556_v16 }
  0xc3   : > { %v607_v17 = vadd.f32 %v606_v15, %v518_v14  ;;  %v697_v28 = vmax.f32 %v645_v21, 0.0 }
  0xc5   : > { %v682_v19 = vmax.f32 %v607_v17, 0.0 }
  0xc6   : > { %v557_v20 = vpop.f32.mrf.mxu2 }
  0xc7   : > { %v1092_v22 = vpack.c.bf16 %v682_v19, %v681_v18  ;;  %v558_v23 = vadd.f32 %v1363_v49, %v557_v20  ;;  %v646_v24 = vpop.f32.mrf.mxu3 }
  0xc8   : > { %v520_v25 = vpop.f32.mrf.mxu0 }
  0xc9   : > { %1164 = vst [vmem:[%s1372_s4 + $0x8] sm:$0xff] %v1092_v22   ;;  %v647_v26 = vadd.f32 %v646_v24, %v558_v23  ;;  %v609_v27 = vpop.f32.mrf.mxu1  ;;  %v521_v31 = vadd.f32 %v1363_v49, %v520_v25 }
  0xcb   : > { %v698_v29 = vmax.f32 %v647_v26, 0.0  ;;  %v610_v35 = vadd.f32 %v609_v27, %v521_v31 }
  0xcd   : > { %v1132_v30 = vpack.c.bf16 %v698_v29, %v697_v28  ;;  %v683_v40 = vmax.f32 %v610_v35, 0.0 }
  0xce   : > { %v560_v32 = vpop.f32.mrf.mxu2 }
  0xcf   : > { %1172 = vst [vmem:[%s1372_s4 + $0x48] sm:$0xff] %v1132_v30   ;;  %v649_v33 = vpop.f32.mrf.mxu3  ;;  %v561_v38 = vadd.f32 %v1363_v49, %v560_v32 }
  0xd0   : > { %v522_v34 = vpop.f32.mrf.mxu0 }
  0xd1   : > { %v523_v36 = vadd.f32 %v1363_v49, %v522_v34  ;;  %v611_v37 = vpop.f32.mrf.mxu1  ;;  %v650_v43 = vadd.f32 %v649_v33, %v561_v38 }
  0xd3   : > { %v612_v39 = vadd.f32 %v611_v37, %v523_v36  ;;  %v699_v51 = vmax.f32 %v650_v43, 0.0 }
  0xd5   : > { %v684_v41 = vmax.f32 %v612_v39, 0.0 }
  0xd6   : > { %v562_v42 = vpop.f32.mrf.mxu2 }
  0xd7   : > { %v1097_v44 = vpack.c.bf16 %v684_v41, %v683_v40  ;;  %v563_v45 = vadd.f32 %v1363_v49, %v562_v42  ;;  %v651_v46 = vpop.f32.mrf.mxu3 }
  0xd8   : > { %v525_v47 = vpop.f32.mrf.mxu0 }
  0xd9   : > { %1165 = vst [vmem:[%s1372_s4 + $0x10] sm:$0xff] %v1097_v44   ;;  %v652_v48 = vadd.f32 %v651_v46, %v563_v45  ;;  %v614_v50 = vpop.f32.mrf.mxu1  ;;  %v526_v54 = vadd.f32 %v1363_v49, %v525_v47 }
  0xdb   : > { %v700_v52 = vmax.f32 %v652_v48, 0.0  ;;  %v615_v58 = vadd.f32 %v614_v50, %v526_v54 }
  0xdd   : > { %v1137_v53 = vpack.c.bf16 %v700_v52, %v699_v51  ;;  %v685_v63 = vmax.f32 %v615_v58, 0.0 }
  0xde   : > { %v565_v55 = vpop.f32.mrf.mxu2 }
  0xdf   : > { %1173 = vst [vmem:[%s1372_s4 + $0x50] sm:$0xff] %v1137_v53   ;;  %v654_v56 = vpop.f32.mrf.mxu3  ;;  %v566_v61 = vadd.f32 %v1363_v49, %v565_v55 }
  0xe0   : > { %v527_v57 = vpop.f32.mrf.mxu0 }
  0xe1   : > { %v528_v59 = vadd.f32 %v1363_v49, %v527_v57  ;;  %v616_v60 = vpop.f32.mrf.mxu1  ;;  %v655_v2 = vadd.f32 %v654_v56, %v566_v61 }
  0xe3   : > { %v617_v62 = vadd.f32 %v616_v60, %v528_v59  ;;  %v701_v9 = vmax.f32 %v655_v2, 0.0 }
  0xe5   : > { %v686_v0 = vmax.f32 %v617_v62, 0.0 }
  0xe6   : > { %v567_v1 = vpop.f32.mrf.mxu2 }
  0xe7   : > { %v1102_v3 = vpack.c.bf16 %v686_v0, %v685_v63  ;;  %v568_v4 = vadd.f32 %v1363_v49, %v567_v1  ;;  %v656_v5 = vpop.f32.mrf.mxu3 }
  0xe8   : > { %v530_v6 = vpop.f32.mrf.mxu0 }
  0xe9   : > { %1166 = vst [vmem:[%s1372_s4 + $0x18] sm:$0xff] %v1102_v3   ;;  %v657_v7 = vadd.f32 %v656_v5, %v568_v4  ;;  %v619_v8 = vpop.f32.mrf.mxu1  ;;  %v531_v12 = vadd.f32 %v1363_v49, %v530_v6 }
  0xeb   : > { %v702_v10 = vmax.f32 %v657_v7, 0.0  ;;  %v620_v16 = vadd.f32 %v619_v8, %v531_v12 }
  0xed   : > { %v1142_v11 = vpack.c.bf16 %v702_v10, %v701_v9  ;;  %v687_v21 = vmax.f32 %v620_v16, 0.0 }
  0xee   : > { %v570_v13 = vpop.f32.mrf.mxu2 }
  0xef   : > { %1174 = vst [vmem:[%s1372_s4 + $0x58] sm:$0xff] %v1142_v11   ;;  %v659_v14 = vpop.f32.mrf.mxu3  ;;  %v571_v19 = vadd.f32 %v1363_v49, %v570_v13 }
  0xf0   : > { %v532_v15 = vpop.f32.mrf.mxu0 }
  0xf1   : > { %v533_v17 = vadd.f32 %v1363_v49, %v532_v15  ;;  %v621_v18 = vpop.f32.mrf.mxu1  ;;  %v660_v24 = vadd.f32 %v659_v14, %v571_v19 }
  0xf3   : > { %v622_v20 = vadd.f32 %v621_v18, %v533_v17  ;;  %v703_v31 = vmax.f32 %v660_v24, 0.0 }
  0xf5   : > { %v688_v22 = vmax.f32 %v622_v20, 0.0 }
  0xf6   : > { %v572_v23 = vpop.f32.mrf.mxu2 }
  0xf7   : > { %v1107_v25 = vpack.c.bf16 %v688_v22, %v687_v21  ;;  %v573_v26 = vadd.f32 %v1363_v49, %v572_v23  ;;  %v661_v27 = vpop.f32.mrf.mxu3 }
  0xf8   : > { %v535_v28 = vpop.f32.mrf.mxu0 }
  0xf9   : > { %1167 = vst [vmem:[%s1372_s4 + $0x20] sm:$0xff] %v1107_v25   ;;  %v662_v29 = vadd.f32 %v661_v27, %v573_v26  ;;  %v624_v30 = vpop.f32.mrf.mxu1  ;;  %v536_v34 = vadd.f32 %v1363_v49, %v535_v28 }
  0xfb   : > { %v704_v32 = vmax.f32 %v662_v29, 0.0  ;;  %v625_v38 = vadd.f32 %v624_v30, %v536_v34 }
  0xfd   : > { %v1147_v33 = vpack.c.bf16 %v704_v32, %v703_v31  ;;  %v689_v43 = vmax.f32 %v625_v38, 0.0 }
  0xfe   : > { %v575_v35 = vpop.f32.mrf.mxu2 }
  0xff   : > { %1175 = vst [vmem:[%s1372_s4 + $0x60] sm:$0xff] %v1147_v33   ;;  %v664_v36 = vpop.f32.mrf.mxu3  ;;  %v576_v41 = vadd.f32 %v1363_v49, %v575_v35 }
 0x100   : > { %v537_v37 = vpop.f32.mrf.mxu0 }
 0x101   : > { %v538_v39 = vadd.f32 %v1363_v49, %v537_v37  ;;  %v626_v40 = vpop.f32.mrf.mxu1  ;;  %v665_v46 = vadd.f32 %v664_v36, %v576_v41 }
 0x103   : > { %v627_v42 = vadd.f32 %v626_v40, %v538_v39  ;;  %v705_v54 = vmax.f32 %v665_v46, 0.0 }
 0x105   : > { %v690_v44 = vmax.f32 %v627_v42, 0.0 }
 0x106   : > { %v577_v45 = vpop.f32.mrf.mxu2 }
 0x107   : > { %v1112_v47 = vpack.c.bf16 %v690_v44, %v689_v43  ;;  %v578_v48 = vadd.f32 %v1363_v49, %v577_v45  ;;  %v666_v50 = vpop.f32.mrf.mxu3 }
 0x108   : > { %v540_v51 = vpop.f32.mrf.mxu0 }
 0x109   : > { %1168 = vst [vmem:[%s1372_s4 + $0x28] sm:$0xff] %v1112_v47   ;;  %v667_v52 = vadd.f32 %v666_v50, %v578_v48  ;;  %v629_v53 = vpop.f32.mrf.mxu1  ;;  %v541_v57 = vadd.f32 %v1363_v49, %v540_v51 }
 0x10b   : > { %v706_v55 = vmax.f32 %v667_v52, 0.0  ;;  %v630_v61 = vadd.f32 %v629_v53, %v541_v57 }
 0x10d   : > { %v1152_v56 = vpack.c.bf16 %v706_v55, %v705_v54  ;;  %v691_v2 = vmax.f32 %v630_v61, 0.0 }
 0x10e   : > { %v580_v58 = vpop.f32.mrf.mxu2 }
 0x10f   : > { %1176 = vst [vmem:[%s1372_s4 + $0x68] sm:$0xff] %v1152_v56   ;;  %v669_v59 = vpop.f32.mrf.mxu3  ;;  %v581_v0 = vadd.f32 %v1363_v49, %v580_v58 }
 0x110   : > { %v542_v60 = vpop.f32.mrf.mxu0 }
 0x111   : > { %v543_v62 = vadd.f32 %v1363_v49, %v542_v60  ;;  %v631_v63 = vpop.f32.mrf.mxu1  ;;  %v670_v5 = vadd.f32 %v669_v59, %v581_v0 }
 0x113   : > { %v632_v1 = vadd.f32 %v631_v63, %v543_v62  ;;  %v707_v12 = vmax.f32 %v670_v5, 0.0 }
 0x115   : > { %v692_v3 = vmax.f32 %v632_v1, 0.0 }
 0x116   : > { %v582_v4 = vpop.f32.mrf.mxu2 }
 0x117   : > { %v1117_v6 = vpack.c.bf16 %v692_v3, %v691_v2  ;;  %v583_v7 = vadd.f32 %v1363_v49, %v582_v4  ;;  %v671_v8 = vpop.f32.mrf.mxu3 }
 0x118   : > { %v545_v9 = vpop.f32.mrf.mxu0 }
 0x119   : > { %1169 = vst [vmem:[%s1372_s4 + $0x30] sm:$0xff] %v1117_v6   ;;  %v672_v10 = vadd.f32 %v671_v8, %v583_v7  ;;  %v634_v11 = vpop.f32.mrf.mxu1  ;;  %v546_v15 = vadd.f32 %v1363_v49, %v545_v9 }
 0x11b   : > { %v708_v13 = vmax.f32 %v672_v10, 0.0  ;;  %v635_v19 = vadd.f32 %v634_v11, %v546_v15 }
 0x11d   : > { %v1157_v14 = vpack.c.bf16 %v708_v13, %v707_v12  ;;  %v693_v24 = vmax.f32 %v635_v19, 0.0 }
 0x11e   : > { %v585_v16 = vpop.f32.mrf.mxu2 }
 0x11f   : > { %1177 = vst [vmem:[%s1372_s4 + $0x70] sm:$0xff] %v1157_v14   ;;  %v674_v17 = vpop.f32.mrf.mxu3  ;;  %v586_v22 = vadd.f32 %v1363_v49, %v585_v16 }
 0x120   : > { %v547_v18 = vpop.f32.mrf.mxu0 }
 0x121   : > { %v548_v20 = vadd.f32 %v1363_v49, %v547_v18  ;;  %v636_v21 = vpop.f32.mrf.mxu1  ;;  %v675_v27 = vadd.f32 %v674_v17, %v586_v22 }
 0x123   : > { %v637_v23 = vadd.f32 %v636_v21, %v548_v20  ;;  %v709_v32 = vmax.f32 %v675_v27, 0.0 }
 0x125   : > { %v694_v25 = vmax.f32 %v637_v23, 0.0 }
 0x126   : > { %v587_v26 = vpop.f32.mrf.mxu2 }
 0x127   : > { %v1122_v28 = vpack.c.bf16 %v694_v25, %v693_v24  ;;  %v588_v29 = vadd.f32 %v1363_v49, %v587_v26  ;;  %v676_v30 = vpop.f32.mrf.mxu3 }
 0x129   : > { %1170 = vst [vmem:[%s1372_s4 + $0x38] sm:$0xff] %v1122_v28   ;;  %v677_v31 = vadd.f32 %v676_v30, %v588_v29 }
 0x12b   : > { %v710_v33 = vmax.f32 %v677_v31, 0.0 }
 0x12d   : > { %v1162_v34 = vpack.c.bf16 %v710_v33, %v709_v32 }
 0x12f   : > { %1178 = vst [vmem:[%s1372_s4 + $0x78] sm:$0xff] %v1162_v34  }
 0x130 PF: > { %s13_s12 = sadd.s32 1, %s1210_s12  }
 0x131   : > { %p10_p4 = scmp.ge.s32.totalorder %s13_s12, 4  }
 0x133   :  { %12 = sbr.rel (!%p10_p4) target bundleno = 1 (0x1), region = 62 }

// kernel: nf_resnet_forward.12
= control target key start
LH: loop header
LB: loop body
LE: loop exit
PB: predicated region body
PF: predicated region fallthrough
CT: control target
= control target key end

     0   :  { %s1443_s15 = smov 0   ;;  %s1654_s0 = inlined_call_operand.vmem [shape: bf16[512,256], index: 0, kind: input, shape index: {}]   ;;  %s1655_s1 = inlined_call_operand.vmem [shape: bf16[256,128], index: 1, kind: input, shape index: {}]   ;;  %s1656_s2 = inlined_call_operand.vmem [shape: f32[1,128], index: 2, kind: input, shape index: {}]   ;;  %s1657_s3 = inlined_call_operand.vmem [shape: bf16[512,128], index: 3, kind: input, shape index: {}]   ;;  %s1658_s4 = inlined_call_operand.vmem [shape: bf16[512,128], index: 4, kind: output, shape index: {}]  }
   0x1 LB: > { %s956_s16 = sadd.s32 4294967295, %s1416_s15   ;;  %p960_p0 = scmp.ge.s32.totalorder %s1416_s15, 1  ;;  %s1416_s15 = sphi %s1443_s15, %s14_s15  }
   0x2   : > { %p175_p1 = scmp.lt.s32.totalorder %s1416_s15, 3 }
   0x4   : > { %p176_p2 = pnand %p960_p0, %p175_p1 }
   0x5   : > { %s961_s29 = sshll.u32 (!%p176_p2), %s956_s16, 5 }
   0x6   : > { %179 = sbr.rel (%p176_p2) target bundleno = 304 (0x130), region = 36  ;;  %p208_p3 = scmp.lt.s32.totalorder (!%p176_p2), %s961_s29, 63 }
   0xb   : > { %v1202_v0 = vld [vmem:[%s1655_s1 + $0x38] sm:$0xff]  ;;  %v1201_v2 = vld [vmem:[%s1655_s1 + $0x30] sm:$0xff]  ;;  %v1200_v4 = vld [vmem:[%s1655_s1 + $0x28] sm:$0xff]  ;;  %s1660_s29 = smov (!%p208_p3, %s961_s29), 63 }
   0xc   : > { %v1210_v1 = vld [vmem:[%s1655_s1 + $0x78] sm:$0xff]  ;;  %550 = vmatpush.bf16.msra.mxu0 %v1202_v0  ;;  %1385 = vmatpush.bf16.msra.mxu2 %v1202_v0  ;;  %v1209_v3 = vld [vmem:[%s1655_s1 + $0x70] sm:$0xff]  ;;  %v1208_v5 = vld [vmem:[%s1655_s1 + $0x68] sm:$0xff]  ;;  %s1162_s17 = sshll.u32 %s1660_s29, 3  ;;  %s965_s30 = sshll.u32 %s1660_s29, 2 }
   0xd   : > { %639 = vmatpush.bf16.msra.mxu1 %v1210_v1  ;;  %1393 = vmatpush.bf16.msra.mxu3 %v1210_v1  ;;  %v1199_v6 = vld [vmem:[%s1655_s1 + $0x20] sm:$0xff]  ;;  %v1198_v8 = vld [vmem:[%s1655_s1 + $0x18] sm:$0xff]  ;;  %v1197_v10 = vld [vmem:[%s1655_s1 + $0x10] sm:$0xff]  ;;  %s1496_s22 = scalar_lea.vmem %s1654_s0, %s1162_s17  ;;  %s1580_s9 = scalar_lea.vmem %s1657_s3, %s965_s30 }
   0xe   : > { %v1207_v7 = vld [vmem:[%s1655_s1 + $0x60] sm:$0xff]  ;;  %v1206_v9 = vld [vmem:[%s1655_s1 + $0x58] sm:$0xff]  ;;  %v1205_v11 = vld [vmem:[%s1655_s1 + $0x50] sm:$0xff]  ;;  %s1590_s11 = scalar_lea.vmem %s1658_s4, %s965_s30 }
   0xf   : > { %v1196_v12 = vld [vmem:[%s1655_s1 + $0x8] sm:$0xff]  ;;  %v1195_v14 = vld [vmem:[%s1655_s1] sm:$0xff]  ;;  %v978_v28 = vld [vmem:[%s1496_s22 + $0x10] sm:$0xf] }
  0x10   : > { %551 = vmatpush.bf16.msra.mxu0 %v1201_v2  ;;  %1386 = vmatpush.bf16.msra.mxu2 %v1201_v2  ;;  %v1204_v13 = vld [vmem:[%s1655_s1 + $0x48] sm:$0xff]  ;;  %v1203_v15 = vld [vmem:[%s1655_s1 + $0x40] sm:$0xff]  ;;  %v1166_v29 = vld [vmem:[%s1496_s22 + $0x14] sm:$0xf0] }
  0x11   : > { %640 = vmatpush.bf16.msra.mxu1 %v1209_v3  ;;  %1394 = vmatpush.bf16.msra.mxu3 %v1209_v3  ;;  %v970_v16 = vld [vmem:[%s1496_s22] sm:$0xf]  ;;  %v1164_v17 = vld [vmem:[%s1496_s22 + $0x4] sm:$0xf0]  ;;  %v1163_v20 = vld [vmem:[%s1496_s22 + $0x4] sm:$0xf]  ;;  %v979_v36 = vor.u32 %v1166_v29, %v978_v28 }
  0x12   : > { %v1034_v18 = vld [vmem:[%s1496_s22 + $0x80] sm:$0xf]  ;;  %v1180_v19 = vld [vmem:[%s1496_s22 + $0x84] sm:$0xf0]  ;;  %v972_v21 = vld [vmem:[%s1496_s22 + $0x8] sm:$0xf0]  ;;  %v971_v24 = vor.u32 %v1164_v17, %v970_v16 }
  0x13   : > { %v1179_v22 = vld [vmem:[%s1496_s22 + $0x84] sm:$0xf]  ;;  %v1036_v23 = vld [vmem:[%s1496_s22 + $0x88] sm:$0xf0]  ;;  %v1035_v25 = vor.u32 %v1180_v19, %v1034_v18  ;;  %v975_v26 = vor.u32 %v1163_v20, %v972_v21  ;;  %v1042_v30 = vld [vmem:[%s1496_s22 + $0x90] sm:$0xf] }
  0x14   : > { %552 = vmatpush.bf16.msra.mxu0 %v1200_v4  ;;  %1387 = vmatpush.bf16.msra.mxu2 %v1200_v4  ;;  %v1039_v27 = vor.u32 %v1179_v22, %v1036_v23  ;;  %v1182_v31 = vld [vmem:[%s1496_s22 + $0x94] sm:$0xf0]  ;;  %v1165_v32 = vld [vmem:[%s1496_s22 + $0x14] sm:$0xf]  ;;  %v980_v33 = vld [vmem:[%s1496_s22 + $0x18] sm:$0xf0] }
  0x15   : > { %641 = vmatpush.bf16.msra.mxu1 %v1208_v5  ;;  %1395 = vmatpush.bf16.msra.mxu3 %v1208_v5  ;;  %v1181_v34 = vld [vmem:[%s1496_s22 + $0x94] sm:$0xf]  ;;  %v1044_v35 = vld [vmem:[%s1496_s22 + $0x98] sm:$0xf0]  ;;  %v1043_v37 = vor.u32 %v1182_v31, %v1042_v30  ;;  %v983_v38 = vor.u32 %v1165_v32, %v980_v33  ;;  %v986_v40 = vld [vmem:[%s1496_s22 + $0x20] sm:$0xf] }
  0x16   : > { %v1047_v39 = vor.u32 %v1181_v34, %v1044_v35  ;;  %v1168_v41 = vld [vmem:[%s1496_s22 + $0x24] sm:$0xf0]  ;;  %v1050_v42 = vld [vmem:[%s1496_s22 + $0xa0] sm:$0xf]  ;;  %v1167_v44 = vld [vmem:[%s1496_s22 + $0x24] sm:$0xf] }
  0x17   : > { %v1184_v43 = vld [vmem:[%s1496_s22 + $0xa4] sm:$0xf0]  ;;  %v988_v45 = vld [vmem:[%s1496_s22 + $0x28] sm:$0xf0]  ;;  %v1183_v46 = vld [vmem:[%s1496_s22 + $0xa4] sm:$0xf]  ;;  %v987_v48 = vor.u32 %v1168_v41, %v986_v40 }
  0x18   : > { %553 = vmatpush.bf16.msra.mxu0 %v1199_v6  ;;  %1388 = vmatpush.bf16.msra.mxu2 %v1199_v6  ;;  %v1052_v47 = vld [vmem:[%s1496_s22 + $0xa8] sm:$0xf0]  ;;  %v1051_v49 = vor.u32 %v1184_v43, %v1050_v42  ;;  %v991_v50 = vor.u32 %v1167_v44, %v988_v45  ;;  %v994_v52 = vld [vmem:[%s1496_s22 + $0x30] sm:$0xf]  ;;  %v1170_v53 = vld [vmem:[%s1496_s22 + $0x34] sm:$0xf0] }
  0x19   : > { %642 = vmatpush.bf16.msra.mxu1 %v1207_v7  ;;  %1396 = vmatpush.bf16.msra.mxu3 %v1207_v7  ;;  %v1055_v51 = vor.u32 %v1183_v46, %v1052_v47  ;;  %v1058_v54 = vld [vmem:[%s1496_s22 + $0xb0] sm:$0xf]  ;;  %v1186_v55 = vld [vmem:[%s1496_s22 + $0xb4] sm:$0xf0]  ;;  %v1169_v56 = vld [vmem:[%s1496_s22 + $0x34] sm:$0xf]  ;;  %v995_v60 = vor.u32 %v1170_v53, %v994_v52 }
  0x1a   : > { %v996_v57 = vld [vmem:[%s1496_s22 + $0x38] sm:$0xf0]  ;;  %v1185_v58 = vld [vmem:[%s1496_s22 + $0xb4] sm:$0xf]  ;;  %v1059_v61 = vor.u32 %v1186_v55, %v1058_v54  ;;  %v1002_v0 = vld [vmem:[%s1496_s22 + $0x40] sm:$0xf] }
  0x1b   : > { %v1060_v59 = vld [vmem:[%s1496_s22 + $0xb8] sm:$0xf0]  ;;  %v999_v62 = vor.u32 %v1169_v56, %v996_v57  ;;  %v1172_v1 = vld [vmem:[%s1496_s22 + $0x44] sm:$0xf0]  ;;  %v1066_v2 = vld [vmem:[%s1496_s22 + $0xc0] sm:$0xf] }
  0x1c   : > { %554 = vmatpush.bf16.msra.mxu0 %v1198_v8  ;;  %1389 = vmatpush.bf16.msra.mxu2 %v1198_v8  ;;  %v1063_v63 = vor.u32 %v1185_v58, %v1060_v59  ;;  %v1188_v3 = vld [vmem:[%s1496_s22 + $0xc4] sm:$0xf0]  ;;  %v1171_v4 = vld [vmem:[%s1496_s22 + $0x44] sm:$0xf]  ;;  %v1004_v5 = vld [vmem:[%s1496_s22 + $0x48] sm:$0xf0]  ;;  %v1003_v8 = vor.u32 %v1172_v1, %v1002_v0 }
  0x1d   : > { %643 = vmatpush.bf16.msra.mxu1 %v1206_v9  ;;  %1397 = vmatpush.bf16.msra.mxu3 %v1206_v9  ;;  %v1187_v6 = vld [vmem:[%s1496_s22 + $0xc4] sm:$0xf]  ;;  %v1068_v7 = vld [vmem:[%s1496_s22 + $0xc8] sm:$0xf0]  ;;  %v1067_v9 = vor.u32 %v1188_v3, %v1066_v2  ;;  %v1173_v16 = vld [vmem:[%s1496_s22 + $0x54] sm:$0xf] }
  0x1e   : > { %v1012_v17 = vld [vmem:[%s1496_s22 + $0x58] sm:$0xf0]  ;;  %v1189_v18 = vld [vmem:[%s1496_s22 + $0xd4] sm:$0xf]  ;;  %v1175_v28 = vld [vmem:[%s1496_s22 + $0x64] sm:$0xf] }
  0x1f   : > { %v1076_v19 = vld [vmem:[%s1496_s22 + $0xd8] sm:$0xf0]  ;;  %v1015_v22 = vor.u32 %v1173_v16, %v1012_v17  ;;  %v1020_v29 = vld [vmem:[%s1496_s22 + $0x68] sm:$0xf0]  ;;  %v1191_v30 = vld [vmem:[%s1496_s22 + $0xe4] sm:$0xf] }
  0x20   : > { %555 = vmatpush.bf16.msra.mxu0 %v1197_v10  ;;  %1390 = vmatpush.bf16.msra.mxu2 %v1197_v10  ;;  %v1007_v10 = vor.u32 %v1171_v4, %v1004_v5  ;;  %v1079_v23 = vor.u32 %v1189_v18, %v1076_v19  ;;  %v1084_v31 = vld [vmem:[%s1496_s22 + $0xe8] sm:$0xf0]  ;;  %v1023_v34 = vor.u32 %v1175_v28, %v1020_v29  ;;  %v1177_v40 = vld [vmem:[%s1496_s22 + $0x74] sm:$0xf]  ;;  %v1028_v41 = vld [vmem:[%s1496_s22 + $0x78] sm:$0xf0] }
  0x21   : > { %644 = vmatpush.bf16.msra.mxu1 %v1205_v11  ;;  %1398 = vmatpush.bf16.msra.mxu3 %v1205_v11  ;;  %v1071_v11 = vor.u32 %v1187_v6, %v1068_v7  ;;  %v1087_v35 = vor.u32 %v1191_v30, %v1084_v31  ;;  %v1193_v42 = vld [vmem:[%s1496_s22 + $0xf4] sm:$0xf]  ;;  %v1092_v43 = vld [vmem:[%s1496_s22 + $0xf8] sm:$0xf0]  ;;  %v1031_v46 = vor.u32 %v1177_v40, %v1028_v41  ;;  %v1212_v52 = vld [vmem:[%s1580_s9] sm:$0xff]  }
  0x22   : > { %v1095_v47 = vor.u32 %v1193_v42, %v1092_v43  ;;  %v1213_v57 = vunpack.c.l.bf16 %v1212_v52  ;;  %v1355_v16 = vld [vmem:[%s1580_s9 + $0x8] sm:$0xff]  }
  0x24   : > { %556 = vmatpush.bf16.msra.mxu0 %v1196_v12  ;;  %1391 = vmatpush.bf16.msra.mxu2 %v1196_v12  ;;  %v1010_v12 = vld [vmem:[%s1496_s22 + $0x50] sm:$0xf] }
  0x25   : > { %645 = vmatpush.bf16.msra.mxu1 %v1204_v13  ;;  %1399 = vmatpush.bf16.msra.mxu3 %v1204_v13  ;;  %v1174_v13 = vld [vmem:[%s1496_s22 + $0x54] sm:$0xf0] }
  0x26   : > { %v1011_v20 = vor.u32 %v1174_v13, %v1010_v12 }
  0x28   : > { %557 = vmatpush.bf16.msra.mxu0 %v1195_v14  ;;  %1392 = vmatpush.bf16.msra.mxu2 %v1195_v14  ;;  %v1074_v14 = vld [vmem:[%s1496_s22 + $0xd0] sm:$0xf] }
  0x29   : > { %646 = vmatpush.bf16.msra.mxu1 %v1203_v15  ;;  %1400 = vmatpush.bf16.msra.mxu3 %v1203_v15  ;;  %v1190_v15 = vld [vmem:[%s1496_s22 + $0xd4] sm:$0xf0] }
  0x2a   : > { %v1075_v21 = vor.u32 %v1190_v15, %v1074_v14 }
  0x2b   : > { %558 = vmatmul.bf16.vlgmr.msra.gmra.mxu0 %v971_v24  ;;  %598 = vmatmul.bf16.vlgmr.msra.gmra.mxu2 %v1035_v25  ;;  %v1018_v24 = vld [vmem:[%s1496_s22 + $0x60] sm:$0xf]  ;;  %v1176_v25 = vld [vmem:[%s1496_s22 + $0x64] sm:$0xf0] }
  0x2c   : > { %647 = vmatmul.bf16.vlgmr.msra.gmra.mxu1 %v975_v26  ;;  %687 = vmatmul.bf16.vlgmr.msra.gmra.mxu3 %v1039_v27  ;;  %v1082_v26 = vld [vmem:[%s1496_s22 + $0xe0] sm:$0xf]  ;;  %v1192_v27 = vld [vmem:[%s1496_s22 + $0xe4] sm:$0xf0]  ;;  %v1019_v32 = vor.u32 %v1176_v25, %v1018_v24  ;;  %v1218_v24 = vunpack.c.h.bf16 %v1355_v16 }
  0x2d   : > { %v1083_v33 = vor.u32 %v1192_v27, %v1082_v26  ;;  %v1363_v26 = vld [vmem:[%s1580_s9 + $0x48] sm:$0xff]  }
  0x2e   : > { %v1249_v30 = vunpack.c.l.bf16 %v1363_v26 }
  0x3b   : > { %563 = vmatmul.bf16.gmra.mxu0 %v979_v36  ;;  %603 = vmatmul.bf16.gmra.mxu2 %v1043_v37  ;;  %v1026_v36 = vld [vmem:[%s1496_s22 + $0x70] sm:$0xf]  ;;  %v1178_v37 = vld [vmem:[%s1496_s22 + $0x74] sm:$0xf0] }
  0x3c   : > { %652 = vmatmul.bf16.gmra.mxu1 %v983_v38  ;;  %692 = vmatmul.bf16.gmra.mxu3 %v1047_v39  ;;  %v1090_v38 = vld [vmem:[%s1496_s22 + $0xf0] sm:$0xf]  ;;  %v1194_v39 = vld [vmem:[%s1496_s22 + $0xf4] sm:$0xf0]  ;;  %v1027_v44 = vor.u32 %v1178_v37, %v1026_v36  ;;  %v1250_v36 = vunpack.c.h.bf16 %v1363_v26 }
  0x3d   : > { %v1091_v45 = vor.u32 %v1194_v39, %v1090_v38 }
  0x4b   : > { %568 = vmatmul.bf16.gmra.mxu0 %v987_v48  ;;  %608 = vmatmul.bf16.gmra.mxu2 %v1051_v49  ;;  %v1575_v49 = vld [vmem:[%s1656_s2] ss:$0 sm:$0xff] }
  0x4c   : > { %657 = vmatmul.bf16.gmra.mxu1 %v991_v50  ;;  %697 = vmatmul.bf16.gmra.mxu3 %v1055_v51 }
  0x5b   : > { %573 = vmatmul.bf16.gmra.mxu0 %v995_v60  ;;  %613 = vmatmul.bf16.gmra.mxu2 %v1059_v61  ;;  %v1214_v60 = vunpack.c.h.bf16 %v1212_v52 }
  0x5c   : > { %662 = vmatmul.bf16.gmra.mxu1 %v999_v62  ;;  %702 = vmatmul.bf16.gmra.mxu3 %v1063_v63  ;;  %v1362_v62 = vld [vmem:[%s1580_s9 + $0x40] sm:$0xff]  }
  0x5d   : > { %v1245_v2 = vunpack.c.l.bf16 %v1362_v62 }
  0x6b   : > { %578 = vmatmul.bf16.gmra.mxu0 %v1003_v8  ;;  %618 = vmatmul.bf16.gmra.mxu2 %v1067_v9  ;;  %v1246_v8 = vunpack.c.h.bf16 %v1362_v62 }
  0x6c   : > { %667 = vmatmul.bf16.gmra.mxu1 %v1007_v10  ;;  %707 = vmatmul.bf16.gmra.mxu3 %v1071_v11 }
  0x7b   : > { %583 = vmatmul.bf16.gmra.mxu0 %v1011_v20  ;;  %623 = vmatmul.bf16.gmra.mxu2 %v1075_v21  ;;  %v1217_v21 = vunpack.c.l.bf16 %v1355_v16 }
  0x7c   : > { %672 = vmatmul.bf16.gmra.mxu1 %v1015_v22  ;;  %712 = vmatmul.bf16.gmra.mxu3 %v1079_v23 }
  0x8b   : > { %588 = vmatmul.bf16.gmra.mxu0 %v1019_v32  ;;  %628 = vmatmul.bf16.gmra.mxu2 %v1083_v33 }
  0x8c   : > { %677 = vmatmul.bf16.gmra.mxu1 %v1023_v34  ;;  %717 = vmatmul.bf16.gmra.mxu3 %v1087_v35 }
  0x9b   : > { %593 = vmatmul.bf16.gmra.mxu0 %v1027_v44  ;;  %633 = vmatmul.bf16.gmra.mxu2 %v1091_v45  ;;  %v1356_v44 = vld [vmem:[%s1580_s9 + $0x10] sm:$0xff]  }
  0x9c   : > { %682 = vmatmul.bf16.gmra.mxu1 %v1031_v46  ;;  %722 = vmatmul.bf16.gmra.mxu3 %v1095_v47 }
  0xa8   : > { %v559_v48 = vpop.f32.mrf.mxu0 }
  0xa9   : > { %v648_v50 = vpop.f32.mrf.mxu1  ;;  %v560_v51 = vadd.f32 %v1575_v49, %v559_v48 }
  0xab   : > { %v649_v56 = vadd.f32 %v648_v50, %v560_v51  ;;  %v1221_v50 = vunpack.c.l.bf16 %v1356_v44 }
  0xad   : > { %v792_v0 = vadd.f32 %v1213_v57, %v649_v56 }
  0xae   : > { %v599_v53 = vpop.f32.mrf.mxu2 }
  0xaf   : > { %v688_v54 = vpop.f32.mrf.mxu3  ;;  %v600_v61 = vadd.f32 %v1575_v49, %v599_v53  ;;  %v1222_v53 = vunpack.c.h.bf16 %v1356_v44 }
  0xb0   : > { %v561_v55 = vpop.f32.mrf.mxu0 }
  0xb1   : > { %v562_v58 = vadd.f32 %v1575_v49, %v561_v55  ;;  %v650_v59 = vpop.f32.mrf.mxu1  ;;  %v689_v4 = vadd.f32 %v688_v54, %v600_v61  ;;  %v1364_v55 = vld [vmem:[%s1580_s9 + $0x50] sm:$0xff]  }
  0xb3   : > { %v651_v63 = vadd.f32 %v650_v59, %v562_v58  ;;  %v808_v12 = vadd.f32 %v1245_v2, %v689_v4  ;;  %v1253_v59 = vunpack.c.l.bf16 %v1364_v55 }
  0xb5   : > { %v793_v1 = vadd.f32 %v1214_v60, %v651_v63 }
  0xb6   : > { %v601_v3 = vpop.f32.mrf.mxu2 }
  0xb7   : > { %v1278_v5 = vpack.c.bf16 %v793_v1, %v792_v0  ;;  %v602_v6 = vadd.f32 %v1575_v49, %v601_v3  ;;  %v690_v7 = vpop.f32.mrf.mxu3  ;;  %v1254_v1 = vunpack.c.h.bf16 %v1364_v55 }
  0xb8   : > { %v564_v9 = vpop.f32.mrf.mxu0 }
  0xb9   : > { %1279 = vst [vmem:[%s1590_s11] sm:$0xff] %v1278_v5   ;;  %v691_v10 = vadd.f32 %v690_v7, %v602_v6  ;;  %v653_v11 = vpop.f32.mrf.mxu1  ;;  %v565_v15 = vadd.f32 %v1575_v49, %v564_v9  ;;  %v1357_v9 = vld [vmem:[%s1580_s9 + $0x18] sm:$0xff]  }
  0xbb   : > { %v809_v13 = vadd.f32 %v1246_v8, %v691_v10  ;;  %v654_v20 = vadd.f32 %v653_v11, %v565_v15 }
  0xbd   : > { %v1318_v14 = vpack.c.bf16 %v809_v13, %v808_v12  ;;  %v794_v28 = vadd.f32 %v1217_v21, %v654_v20 }
  0xbe   : > { %v604_v17 = vpop.f32.mrf.mxu2 }
  0xbf   : > { %1377 = vst [vmem:[%s1590_s11 + $0x40] sm:$0xff] %v1318_v14   ;;  %v693_v18 = vpop.f32.mrf.mxu3  ;;  %v605_v25 = vadd.f32 %v1575_v49, %v604_v17  ;;  %v1225_v14 = vunpack.c.l.bf16 %v1357_v9  ;;  %v1226_v17 = vunpack.c.h.bf16 %v1357_v9 }
  0xc0   : > { %v566_v19 = vpop.f32.mrf.mxu0 }
  0xc1   : > { %v567_v22 = vadd.f32 %v1575_v49, %v566_v19  ;;  %v655_v23 = vpop.f32.mrf.mxu1  ;;  %v694_v32 = vadd.f32 %v693_v18, %v605_v25  ;;  %v1365_v19 = vld [vmem:[%s1580_s9 + $0x58] sm:$0xff]  }
  0xc3   : > { %v656_v27 = vadd.f32 %v655_v23, %v567_v22  ;;  %v810_v40 = vadd.f32 %v1249_v30, %v694_v32  ;;  %v1257_v23 = vunpack.c.l.bf16 %v1365_v19 }
  0xc5   : > { %v795_v29 = vadd.f32 %v1218_v24, %v656_v27 }
  0xc6   : > { %v606_v31 = vpop.f32.mrf.mxu2 }
  0xc7   : > { %v1283_v33 = vpack.c.bf16 %v795_v29, %v794_v28  ;;  %v607_v34 = vadd.f32 %v1575_v49, %v606_v31  ;;  %v695_v35 = vpop.f32.mrf.mxu3  ;;  %v1258_v29 = vunpack.c.h.bf16 %v1365_v19 }
  0xc8   : > { %v569_v37 = vpop.f32.mrf.mxu0 }
  0xc9   : > { %1370 = vst [vmem:[%s1590_s11 + $0x8] sm:$0xff] %v1283_v33   ;;  %v696_v38 = vadd.f32 %v695_v35, %v607_v34  ;;  %v658_v39 = vpop.f32.mrf.mxu1  ;;  %v570_v43 = vadd.f32 %v1575_v49, %v569_v37  ;;  %v1358_v37 = vld [vmem:[%s1580_s9 + $0x20] sm:$0xff]  }
  0xcb   : > { %v811_v41 = vadd.f32 %v1250_v36, %v696_v38  ;;  %v659_v48 = vadd.f32 %v658_v39, %v570_v43 }
  0xcd   : > { %v1323_v42 = vpack.c.bf16 %v811_v41, %v810_v40  ;;  %v796_v57 = vadd.f32 %v1221_v50, %v659_v48 }
  0xce   : > { %v609_v45 = vpop.f32.mrf.mxu2 }
  0xcf   : > { %1378 = vst [vmem:[%s1590_s11 + $0x48] sm:$0xff] %v1323_v42   ;;  %v698_v46 = vpop.f32.mrf.mxu3  ;;  %v610_v54 = vadd.f32 %v1575_v49, %v609_v45  ;;  %v1229_v42 = vunpack.c.l.bf16 %v1358_v37  ;;  %v1230_v45 = vunpack.c.h.bf16 %v1358_v37 }
  0xd0   : > { %v571_v47 = vpop.f32.mrf.mxu0 }
  0xd1   : > { %v572_v51 = vadd.f32 %v1575_v49, %v571_v47  ;;  %v660_v52 = vpop.f32.mrf.mxu1  ;;  %v699_v61 = vadd.f32 %v698_v46, %v610_v54  ;;  %v1366_v47 = vld [vmem:[%s1580_s9 + $0x60] sm:$0xff]  }
  0xd3   : > { %v661_v56 = vadd.f32 %v660_v52, %v572_v51  ;;  %v812_v5 = vadd.f32 %v1253_v59, %v699_v61  ;;  %v1261_v52 = vunpack.c.l.bf16 %v1366_v47 }
  0xd5   : > { %v797_v58 = vadd.f32 %v1222_v53, %v661_v56 }
  0xd6   : > { %v611_v60 = vpop.f32.mrf.mxu2 }
  0xd7   : > { %v1288_v62 = vpack.c.bf16 %v797_v58, %v796_v57  ;;  %v612_v63 = vadd.f32 %v1575_v49, %v611_v60  ;;  %v700_v0 = vpop.f32.mrf.mxu3  ;;  %v1262_v58 = vunpack.c.h.bf16 %v1366_v47 }
  0xd8   : > { %v574_v2 = vpop.f32.mrf.mxu0 }
  0xd9   : > { %1371 = vst [vmem:[%s1590_s11 + $0x10] sm:$0xff] %v1288_v62   ;;  %v701_v3 = vadd.f32 %v700_v0, %v612_v63  ;;  %v663_v4 = vpop.f32.mrf.mxu1  ;;  %v575_v8 = vadd.f32 %v1575_v49, %v574_v2  ;;  %v1359_v2 = vld [vmem:[%s1580_s9 + $0x28] sm:$0xff]  }
  0xdb   : > { %v813_v6 = vadd.f32 %v1254_v1, %v701_v3  ;;  %v664_v13 = vadd.f32 %v663_v4, %v575_v8 }
  0xdd   : > { %v1328_v7 = vpack.c.bf16 %v813_v6, %v812_v5  ;;  %v798_v21 = vadd.f32 %v1225_v14, %v664_v13 }
  0xde   : > { %v614_v10 = vpop.f32.mrf.mxu2 }
  0xdf   : > { %1379 = vst [vmem:[%s1590_s11 + $0x50] sm:$0xff] %v1328_v7   ;;  %v703_v11 = vpop.f32.mrf.mxu3  ;;  %v615_v18 = vadd.f32 %v1575_v49, %v614_v10  ;;  %v1233_v7 = vunpack.c.l.bf16 %v1359_v2  ;;  %v1234_v10 = vunpack.c.h.bf16 %v1359_v2 }
  0xe0   : > { %v576_v12 = vpop.f32.mrf.mxu0 }
  0xe1   : > { %v577_v15 = vadd.f32 %v1575_v49, %v576_v12  ;;  %v665_v16 = vpop.f32.mrf.mxu1  ;;  %v704_v25 = vadd.f32 %v703_v11, %v615_v18  ;;  %v1367_v12 = vld [vmem:[%s1580_s9 + $0x68] sm:$0xff]  }
  0xe3   : > { %v666_v20 = vadd.f32 %v665_v16, %v577_v15  ;;  %v814_v33 = vadd.f32 %v1257_v23, %v704_v25  ;;  %v1265_v16 = vunpack.c.l.bf16 %v1367_v12 }
  0xe5   : > { %v799_v22 = vadd.f32 %v1226_v17, %v666_v20 }
  0xe6   : > { %v616_v24 = vpop.f32.mrf.mxu2 }
  0xe7   : > { %v1293_v26 = vpack.c.bf16 %v799_v22, %v798_v21  ;;  %v617_v27 = vadd.f32 %v1575_v49, %v616_v24  ;;  %v705_v28 = vpop.f32.mrf.mxu3  ;;  %v1266_v22 = vunpack.c.h.bf16 %v1367_v12 }
  0xe8   : > { %v579_v30 = vpop.f32.mrf.mxu0 }
  0xe9   : > { %1372 = vst [vmem:[%s1590_s11 + $0x18] sm:$0xff] %v1293_v26   ;;  %v706_v31 = vadd.f32 %v705_v28, %v617_v27  ;;  %v668_v32 = vpop.f32.mrf.mxu1  ;;  %v580_v36 = vadd.f32 %v1575_v49, %v579_v30  ;;  %v1360_v30 = vld [vmem:[%s1580_s9 + $0x30] sm:$0xff]  }
  0xeb   : > { %v815_v34 = vadd.f32 %v1258_v29, %v706_v31  ;;  %v669_v41 = vadd.f32 %v668_v32, %v580_v36 }
  0xed   : > { %v1333_v35 = vpack.c.bf16 %v815_v34, %v814_v33  ;;  %v800_v50 = vadd.f32 %v1229_v42, %v669_v41 }
  0xee   : > { %v619_v38 = vpop.f32.mrf.mxu2 }
  0xef   : > { %1380 = vst [vmem:[%s1590_s11 + $0x58] sm:$0xff] %v1333_v35   ;;  %v708_v39 = vpop.f32.mrf.mxu3  ;;  %v620_v46 = vadd.f32 %v1575_v49, %v619_v38  ;;  %v1237_v35 = vunpack.c.l.bf16 %v1360_v30  ;;  %v1238_v38 = vunpack.c.h.bf16 %v1360_v30 }
  0xf0   : > { %v581_v40 = vpop.f32.mrf.mxu0 }
  0xf1   : > { %v582_v43 = vadd.f32 %v1575_v49, %v581_v40  ;;  %v670_v44 = vpop.f32.mrf.mxu1  ;;  %v709_v54 = vadd.f32 %v708_v39, %v620_v46  ;;  %v1368_v40 = vld [vmem:[%s1580_s9 + $0x70] sm:$0xff]  }
  0xf3   : > { %v671_v48 = vadd.f32 %v670_v44, %v582_v43  ;;  %v816_v62 = vadd.f32 %v1261_v52, %v709_v54  ;;  %v1269_v44 = vunpack.c.l.bf16 %v1368_v40 }
  0xf5   : > { %v801_v51 = vadd.f32 %v1230_v45, %v671_v48 }
  0xf6   : > { %v621_v53 = vpop.f32.mrf.mxu2 }
  0xf7   : > { %v1298_v55 = vpack.c.bf16 %v801_v51, %v800_v50  ;;  %v622_v56 = vadd.f32 %v1575_v49, %v621_v53  ;;  %v710_v57 = vpop.f32.mrf.mxu3  ;;  %v1270_v51 = vunpack.c.h.bf16 %v1368_v40 }
  0xf8   : > { %v584_v59 = vpop.f32.mrf.mxu0 }
  0xf9   : > { %1373 = vst [vmem:[%s1590_s11 + $0x20] sm:$0xff] %v1298_v55   ;;  %v711_v60 = vadd.f32 %v710_v57, %v622_v56  ;;  %v673_v61 = vpop.f32.mrf.mxu1  ;;  %v585_v1 = vadd.f32 %v1575_v49, %v584_v59  ;;  %v1361_v59 = vld [vmem:[%s1580_s9 + $0x38] sm:$0xff]  }
  0xfa   : > { %v1242_v2 = vunpack.c.h.bf16 %v1361_v59 }
  0xfb   : > { %v817_v63 = vadd.f32 %v1262_v58, %v711_v60  ;;  %v674_v6 = vadd.f32 %v673_v61, %v585_v1 }
  0xfd   : > { %v1338_v0 = vpack.c.bf16 %v817_v63, %v816_v62  ;;  %v802_v14 = vadd.f32 %v1233_v7, %v674_v6 }
  0xfe   : > { %v624_v3 = vpop.f32.mrf.mxu2 }
  0xff   : > { %1381 = vst [vmem:[%s1590_s11 + $0x60] sm:$0xff] %v1338_v0   ;;  %v713_v4 = vpop.f32.mrf.mxu3  ;;  %v625_v11 = vadd.f32 %v1575_v49, %v624_v3  ;;  %v1241_v0 = vunpack.c.l.bf16 %v1361_v59 }
 0x100   : > { %v586_v5 = vpop.f32.mrf.mxu0 }
 0x101   : > { %v587_v8 = vadd.f32 %v1575_v49, %v586_v5  ;;  %v675_v9 = vpop.f32.mrf.mxu1  ;;  %v714_v18 = vadd.f32 %v713_v4, %v625_v11  ;;  %v1369_v5 = vld [vmem:[%s1580_s9 + $0x78] sm:$0xff]  }
 0x103   : > { %v676_v13 = vadd.f32 %v675_v9, %v587_v8  ;;  %v818_v26 = vadd.f32 %v1265_v16, %v714_v18  ;;  %v1273_v9 = vunpack.c.l.bf16 %v1369_v5 }
 0x105   : > { %v803_v15 = vadd.f32 %v1234_v10, %v676_v13 }
 0x106   : > { %v626_v17 = vpop.f32.mrf.mxu2 }
 0x107   : > { %v1303_v19 = vpack.c.bf16 %v803_v15, %v802_v14  ;;  %v627_v20 = vadd.f32 %v1575_v49, %v626_v17  ;;  %v715_v21 = vpop.f32.mrf.mxu3  ;;  %v1274_v14 = vunpack.c.h.bf16 %v1369_v5 }
 0x108   : > { %v589_v23 = vpop.f32.mrf.mxu0 }
 0x109   : > { %1374 = vst [vmem:[%s1590_s11 + $0x28] sm:$0xff] %v1303_v19   ;;  %v716_v24 = vadd.f32 %v715_v21, %v627_v20  ;;  %v678_v25 = vpop.f32.mrf.mxu1  ;;  %v590_v29 = vadd.f32 %v1575_v49, %v589_v23 }
 0x10b   : > { %v819_v27 = vadd.f32 %v1266_v22, %v716_v24  ;;  %v679_v34 = vadd.f32 %v678_v25, %v590_v29 }
 0x10d   : > { %v1343_v28 = vpack.c.bf16 %v819_v27, %v818_v26  ;;  %v804_v42 = vadd.f32 %v1237_v35, %v679_v34 }
 0x10e   : > { %v629_v31 = vpop.f32.mrf.mxu2 }
 0x10f   : > { %1382 = vst [vmem:[%s1590_s11 + $0x68] sm:$0xff] %v1343_v28   ;;  %v718_v32 = vpop.f32.mrf.mxu3  ;;  %v630_v39 = vadd.f32 %v1575_v49, %v629_v31 }
 0x110   : > { %v591_v33 = vpop.f32.mrf.mxu0 }
 0x111   : > { %v592_v36 = vadd.f32 %v1575_v49, %v591_v33  ;;  %v680_v37 = vpop.f32.mrf.mxu1  ;;  %v719_v46 = vadd.f32 %v718_v32, %v630_v39 }
 0x113   : > { %v681_v41 = vadd.f32 %v680_v37, %v592_v36  ;;  %v820_v55 = vadd.f32 %v1269_v44, %v719_v46 }
 0x115   : > { %v805_v43 = vadd.f32 %v1238_v38, %v681_v41 }
 0x116   : > { %v631_v45 = vpop.f32.mrf.mxu2 }
 0x117   : > { %v1308_v47 = vpack.c.bf16 %v805_v43, %v804_v42  ;;  %v632_v48 = vadd.f32 %v1575_v49, %v631_v45  ;;  %v720_v50 = vpop.f32.mrf.mxu3 }
 0x118   : > { %v594_v52 = vpop.f32.mrf.mxu0 }
 0x119   : > { %1375 = vst [vmem:[%s1590_s11 + $0x30] sm:$0xff] %v1308_v47   ;;  %v721_v53 = vadd.f32 %v720_v50, %v632_v48  ;;  %v683_v54 = vpop.f32.mrf.mxu1  ;;  %v595_v58 = vadd.f32 %v1575_v49, %v594_v52 }
 0x11b   : > { %v821_v56 = vadd.f32 %v1270_v51, %v721_v53  ;;  %v684_v63 = vadd.f32 %v683_v54, %v595_v58 }
 0x11d   : > { %v1348_v57 = vpack.c.bf16 %v821_v56, %v820_v55  ;;  %v806_v7 = vadd.f32 %v1241_v0, %v684_v63 }
 0x11e   : > { %v634_v60 = vpop.f32.mrf.mxu2 }
 0x11f   : > { %1383 = vst [vmem:[%s1590_s11 + $0x70] sm:$0xff] %v1348_v57   ;;  %v723_v61 = vpop.f32.mrf.mxu3  ;;  %v635_v4 = vadd.f32 %v1575_v49, %v634_v60 }
 0x120   : > { %v596_v62 = vpop.f32.mrf.mxu0 }
 0x121   : > { %v597_v1 = vadd.f32 %v1575_v49, %v596_v62  ;;  %v685_v3 = vpop.f32.mrf.mxu1  ;;  %v724_v11 = vadd.f32 %v723_v61, %v635_v4 }
 0x123   : > { %v686_v6 = vadd.f32 %v685_v3, %v597_v1  ;;  %v822_v17 = vadd.f32 %v1273_v9, %v724_v11 }
 0x125   : > { %v807_v8 = vadd.f32 %v1242_v2, %v686_v6 }
 0x126   : > { %v636_v10 = vpop.f32.mrf.mxu2 }
 0x127   : > { %v1313_v12 = vpack.c.bf16 %v807_v8, %v806_v7  ;;  %v637_v13 = vadd.f32 %v1575_v49, %v636_v10  ;;  %v725_v15 = vpop.f32.mrf.mxu3 }
 0x129   : > { %1376 = vst [vmem:[%s1590_s11 + $0x38] sm:$0xff] %v1313_v12   ;;  %v726_v16 = vadd.f32 %v725_v15, %v637_v13 }
 0x12b   : > { %v823_v18 = vadd.f32 %v1274_v14, %v726_v16 }
 0x12d   : > { %v1353_v19 = vpack.c.bf16 %v823_v18, %v822_v17 }
 0x12f   : > { %1384 = vst [vmem:[%s1590_s11 + $0x78] sm:$0xff] %v1353_v19  }
 0x130 PF: > { %s14_s15 = sadd.s32 1, %s1416_s15  }
 0x131   : > { %p11_p4 = scmp.ge.s32.totalorder %s14_s15, 4  }
 0x133   :  { %13 = sbr.rel (!%p11_p4) target bundleno = 1 (0x1), region = 69 }

// kernel: nf_resnet_forward.13
= control target key start
LH: loop header
LB: loop body
LE: loop exit
PB: predicated region body
PF: predicated region fallthrough
CT: control target
= control target key end

     0   :  { %s530_s12 = smov 0   ;;  %s581_s0 = inlined_call_operand.vmem [shape: bf16[128,128], index: 0, kind: input, shape index: {}]   ;;  %s582_s1 = inlined_call_operand.vmem [shape: bf16[128,128], index: 1, kind: input, shape index: {}]   ;;  %s583_s2 = inlined_call_operand.vmem [shape: f32[1,128], index: 2, kind: input, shape index: {}]   ;;  %s584_s3 = inlined_call_operand.vmem [shape: bf16[128,128], index: 3, kind: output, shape index: {}]  }
   0x1 LB: > { %s375_s13 = sadd.s32 4294967295, %s508_s12   ;;  %p379_p0 = scmp.ge.s32.totalorder %s508_s12, 1  ;;  %s508_s12 = sphi %s530_s12, %s13_s12  }
   0x2   : > { %p138_p1 = scmp.lt.s32.totalorder %s508_s12, 3 }
   0x4   : > { %p139_p2 = pnand %p379_p0, %p138_p1 }
   0x5   : > { %s380_s22 = sshll.u32 (!%p139_p2), %s375_s13, 3 }
   0x6   : > { %142 = sbr.rel (%p139_p2) target bundleno = 190 (0xbe), region = 32  ;;  %p163_p3 = scmp.lt.s32.totalorder (!%p139_p2), %s380_s22, 15 }
   0xb   : > { %v445_v0 = vld [vmem:[%s582_s1 + $0x38] sm:$0xff]  ;;  %v444_v1 = vld [vmem:[%s582_s1 + $0x30] sm:$0xff]  ;;  %v443_v2 = vld [vmem:[%s582_s1 + $0x28] sm:$0xff]  ;;  %s586_s22 = smov (!%p163_p3, %s380_s22), 15 }
   0xc   : > { %274 = vmatpush.bf16.msra.mxu0 %v445_v0  ;;  %469 = vmatpush.bf16.msra.mxu1 %v445_v0  ;;  %v442_v3 = vld [vmem:[%s582_s1 + $0x20] sm:$0xff]  ;;  %v441_v4 = vld [vmem:[%s582_s1 + $0x18] sm:$0xff]  ;;  %v440_v5 = vld [vmem:[%s582_s1 + $0x10] sm:$0xff]  ;;  %s381_s29 = sshll.u32 %s586_s22, 2 }
   0xd   : > { %470 = vmatpush.bf16.msra.mxu2 %v445_v0  ;;  %471 = vmatpush.bf16.msra.mxu3 %v445_v0  ;;  %v439_v6 = vld [vmem:[%s582_s1 + $0x8] sm:$0xff]  ;;  %v438_v7 = vld [vmem:[%s582_s1] sm:$0xff]  ;;  %s166_s7 = scalar_lea.vmem %s581_s0, %s381_s29  ;;  %s172_s13 = scalar_lea.vmem %s584_s3, %s381_s29 }
   0xe   : > { %v434_v8 = vld [vmem:[%s166_s7] sm:$0xff]  ;;  %v435_v9 = vld [vmem:[%s166_s7 + $0x8] sm:$0xff]  ;;  %v436_v10 = vld [vmem:[%s166_s7 + $0x10] sm:$0xff] }
   0xf   : > { %v437_v11 = vld [vmem:[%s166_s7 + $0x18] sm:$0xff]  ;;  %v501_v14 = vld [vmem:[%s583_s2] ss:$0 sm:$0xff] }
  0x10   : > { %275 = vmatpush.bf16.msra.mxu0 %v444_v1  ;;  %472 = vmatpush.bf16.msra.mxu1 %v444_v1 }
  0x11   : > { %473 = vmatpush.bf16.msra.mxu2 %v444_v1  ;;  %474 = vmatpush.bf16.msra.mxu3 %v444_v1 }
  0x14   : > { %276 = vmatpush.bf16.msra.mxu0 %v443_v2  ;;  %475 = vmatpush.bf16.msra.mxu1 %v443_v2 }
  0x15   : > { %476 = vmatpush.bf16.msra.mxu2 %v443_v2  ;;  %477 = vmatpush.bf16.msra.mxu3 %v443_v2 }
  0x18   : > { %277 = vmatpush.bf16.msra.mxu0 %v442_v3  ;;  %478 = vmatpush.bf16.msra.mxu1 %v442_v3 }
  0x19   : > { %479 = vmatpush.bf16.msra.mxu2 %v442_v3  ;;  %480 = vmatpush.bf16.msra.mxu3 %v442_v3 }
  0x1c   : > { %278 = vmatpush.bf16.msra.mxu0 %v441_v4  ;;  %481 = vmatpush.bf16.msra.mxu1 %v441_v4 }
  0x1d   : > { %482 = vmatpush.bf16.msra.mxu2 %v441_v4  ;;  %483 = vmatpush.bf16.msra.mxu3 %v441_v4 }
  0x20   : > { %279 = vmatpush.bf16.msra.mxu0 %v440_v5  ;;  %484 = vmatpush.bf16.msra.mxu1 %v440_v5 }
  0x21   : > { %485 = vmatpush.bf16.msra.mxu2 %v440_v5  ;;  %486 = vmatpush.bf16.msra.mxu3 %v440_v5 }
  0x24   : > { %280 = vmatpush.bf16.msra.mxu0 %v439_v6  ;;  %487 = vmatpush.bf16.msra.mxu1 %v439_v6 }
  0x25   : > { %488 = vmatpush.bf16.msra.mxu2 %v439_v6  ;;  %489 = vmatpush.bf16.msra.mxu3 %v439_v6 }
  0x28   : > { %281 = vmatpush.bf16.msra.mxu0 %v438_v7  ;;  %490 = vmatpush.bf16.msra.mxu1 %v438_v7 }
  0x29   : > { %491 = vmatpush.bf16.msra.mxu2 %v438_v7  ;;  %492 = vmatpush.bf16.msra.mxu3 %v438_v7 }
  0x2b   : > { %282 = vmatmul.bf16.vlgmr.msra.gmra.mxu0 %v434_v8  ;;  %287 = vmatmul.bf16.vlgmr.msra.gmra.mxu1 %v435_v9 }
  0x2c   : > { %292 = vmatmul.bf16.vlgmr.msra.gmra.mxu2 %v436_v10  ;;  %297 = vmatmul.bf16.vlgmr.msra.gmra.mxu3 %v437_v11 }
  0xa8   : > { %v283_v12 = vpop.f32.mrf.mxu0  ;;  %v288_v13 = vpop.f32.mrf.mxu1 }
  0xa9   : > { %v284_v19 = vadd.f32 %v501_v14, %v283_v12  ;;  %v289_v20 = vadd.f32 %v501_v14, %v288_v13 }
  0xaf   : > { %v293_v15 = vpop.f32.mrf.mxu2  ;;  %v298_v16 = vpop.f32.mrf.mxu3 }
  0xb0   : > { %v285_v17 = vpop.f32.mrf.mxu0  ;;  %v290_v18 = vpop.f32.mrf.mxu1  ;;  %v294_v27 = vadd.f32 %v501_v14, %v293_v15  ;;  %v299_v28 = vadd.f32 %v501_v14, %v298_v16 }
  0xb1   : > { %v286_v21 = vadd.f32 %v501_v14, %v285_v17  ;;  %v291_v22 = vadd.f32 %v501_v14, %v290_v18 }
  0xb3   : > { %v449_v23 = vpack.c.bf16 %v286_v21, %v284_v19  ;;  %v454_v24 = vpack.c.bf16 %v291_v22, %v289_v20 }
  0xb5   : > { %450 = vst [vmem:[%s172_s13] sm:$0xff] %v449_v23  }
  0xb6   : > { %466 = vst [vmem:[%s172_s13 + $0x8] sm:$0xff] %v454_v24  }
  0xb7   : > { %v295_v25 = vpop.f32.mrf.mxu2  ;;  %v300_v26 = vpop.f32.mrf.mxu3 }
  0xb8   : > { %v296_v29 = vadd.f32 %v501_v14, %v295_v25  ;;  %v301_v30 = vadd.f32 %v501_v14, %v300_v26 }
  0xba   : > { %v459_v31 = vpack.c.bf16 %v296_v29, %v294_v27  ;;  %v464_v32 = vpack.c.bf16 %v301_v30, %v299_v28 }
  0xbc   : > { %467 = vst [vmem:[%s172_s13 + $0x10] sm:$0xff] %v459_v31  }
  0xbd   : > { %468 = vst [vmem:[%s172_s13 + $0x18] sm:$0xff] %v464_v32  }
  0xbe PF: > { %s13_s12 = sadd.s32 1, %s508_s12  }
  0xbf   : > { %p10_p4 = scmp.ge.s32.totalorder %s13_s12, 4  }
  0xc1   :  { %12 = sbr.rel (!%p10_p4) target bundleno = 1 (0x1), region = 62 }

// kernel: nf_resnet_forward.14
= control target key start
LH: loop header
LB: loop body
LE: loop exit
PB: predicated region body
PF: predicated region fallthrough
CT: control target
= control target key end

     0   :  { %s704_s12 = smov 0   ;;  %s800_s0 = inlined_call_operand.vmem [shape: bf16[128,256], index: 0, kind: input, shape index: {}]   ;;  %s801_s1 = inlined_call_operand.vmem [shape: bf16[256,128], index: 1, kind: input, shape index: {}]   ;;  %s802_s2 = inlined_call_operand.vmem [shape: f32[1,128], index: 2, kind: input, shape index: {}]   ;;  %s803_s3 = inlined_call_operand.vmem [shape: bf16[128,128], index: 3, kind: output, shape index: {}]  }
   0x1 LB: > { %s495_s13 = sadd.s32 4294967295, %s682_s12   ;;  %p499_p0 = scmp.ge.s32.totalorder %s682_s12, 1  ;;  %s682_s12 = sphi %s704_s12, %s13_s12  }
   0x2   : > { %p139_p1 = scmp.lt.s32.totalorder %s682_s12, 3 }
   0x4   : > { %p140_p2 = pnand %p499_p0, %p139_p1 }
   0x5   : > { %s500_s26 = sshll.u32 (!%p140_p2), %s495_s13, 3 }
   0x6   : > { %143 = sbr.rel (%p140_p2) target bundleno = 208 (0xd0), region = 32  ;;  %p165_p3 = scmp.lt.s32.totalorder (!%p140_p2), %s500_s26, 15 }
   0xb   : > { %v619_v0 = vld [vmem:[%s801_s1 + $0x38] sm:$0xff]  ;;  %v618_v2 = vld [vmem:[%s801_s1 + $0x30] sm:$0xff]  ;;  %v617_v4 = vld [vmem:[%s801_s1 + $0x28] sm:$0xff]  ;;  %s805_s26 = smov (!%p165_p3, %s500_s26), 15 }
   0xc   : > { %v627_v1 = vld [vmem:[%s801_s1 + $0x78] sm:$0xff]  ;;  %357 = vmatpush.bf16.msra.mxu0 %v619_v0  ;;  %651 = vmatpush.bf16.msra.mxu2 %v619_v0  ;;  %v626_v3 = vld [vmem:[%s801_s1 + $0x70] sm:$0xff]  ;;  %v625_v5 = vld [vmem:[%s801_s1 + $0x68] sm:$0xff]  ;;  %s603_s13 = sshll.u32 %s805_s26, 3  ;;  %s504_s28 = sshll.u32 %s805_s26, 2 }
   0xd   : > { %386 = vmatpush.bf16.msra.mxu1 %v627_v1  ;;  %659 = vmatpush.bf16.msra.mxu3 %v627_v1  ;;  %v616_v6 = vld [vmem:[%s801_s1 + $0x20] sm:$0xff]  ;;  %v615_v8 = vld [vmem:[%s801_s1 + $0x18] sm:$0xff]  ;;  %v614_v10 = vld [vmem:[%s801_s1 + $0x10] sm:$0xff]  ;;  %s757_s18 = scalar_lea.vmem %s800_s0, %s603_s13  ;;  %s791_s4 = scalar_lea.vmem %s803_s3, %s504_s28 }
   0xe   : > { %v624_v7 = vld [vmem:[%s801_s1 + $0x60] sm:$0xff]  ;;  %v623_v9 = vld [vmem:[%s801_s1 + $0x58] sm:$0xff]  ;;  %v622_v11 = vld [vmem:[%s801_s1 + $0x50] sm:$0xff] }
   0xf   : > { %v613_v12 = vld [vmem:[%s801_s1 + $0x8] sm:$0xff]  ;;  %v612_v14 = vld [vmem:[%s801_s1] sm:$0xff]  ;;  %v515_v28 = vld [vmem:[%s757_s18 + $0x10] sm:$0xf] }
  0x10   : > { %358 = vmatpush.bf16.msra.mxu0 %v618_v2  ;;  %652 = vmatpush.bf16.msra.mxu2 %v618_v2  ;;  %v621_v13 = vld [vmem:[%s801_s1 + $0x48] sm:$0xff]  ;;  %v620_v15 = vld [vmem:[%s801_s1 + $0x40] sm:$0xff]  ;;  %v607_v29 = vld [vmem:[%s757_s18 + $0x14] sm:$0xf0] }
  0x11   : > { %387 = vmatpush.bf16.msra.mxu1 %v626_v3  ;;  %660 = vmatpush.bf16.msra.mxu3 %v626_v3  ;;  %v507_v16 = vld [vmem:[%s757_s18] sm:$0xf]  ;;  %v605_v17 = vld [vmem:[%s757_s18 + $0x4] sm:$0xf0]  ;;  %v604_v20 = vld [vmem:[%s757_s18 + $0x4] sm:$0xf]  ;;  %v516_v36 = vor.u32 %v607_v29, %v515_v28 }
  0x12   : > { %v523_v18 = vld [vmem:[%s757_s18 + $0x20] sm:$0xf]  ;;  %v609_v19 = vld [vmem:[%s757_s18 + $0x24] sm:$0xf0]  ;;  %v509_v21 = vld [vmem:[%s757_s18 + $0x8] sm:$0xf0]  ;;  %v508_v24 = vor.u32 %v605_v17, %v507_v16 }
  0x13   : > { %v608_v22 = vld [vmem:[%s757_s18 + $0x24] sm:$0xf]  ;;  %v525_v23 = vld [vmem:[%s757_s18 + $0x28] sm:$0xf0]  ;;  %v524_v25 = vor.u32 %v609_v19, %v523_v18  ;;  %v512_v26 = vor.u32 %v604_v20, %v509_v21  ;;  %v531_v30 = vld [vmem:[%s757_s18 + $0x30] sm:$0xf] }
  0x14   : > { %359 = vmatpush.bf16.msra.mxu0 %v617_v4  ;;  %653 = vmatpush.bf16.msra.mxu2 %v617_v4  ;;  %v528_v27 = vor.u32 %v608_v22, %v525_v23  ;;  %v611_v31 = vld [vmem:[%s757_s18 + $0x34] sm:$0xf0]  ;;  %v606_v32 = vld [vmem:[%s757_s18 + $0x14] sm:$0xf]  ;;  %v517_v33 = vld [vmem:[%s757_s18 + $0x18] sm:$0xf0] }
  0x15   : > { %388 = vmatpush.bf16.msra.mxu1 %v625_v5  ;;  %661 = vmatpush.bf16.msra.mxu3 %v625_v5  ;;  %v610_v34 = vld [vmem:[%s757_s18 + $0x34] sm:$0xf]  ;;  %v533_v35 = vld [vmem:[%s757_s18 + $0x38] sm:$0xf0]  ;;  %v532_v37 = vor.u32 %v611_v31, %v531_v30  ;;  %v520_v38 = vor.u32 %v606_v32, %v517_v33  ;;  %v675_v41 = vld [vmem:[%s802_s2] ss:$0 sm:$0xff] }
  0x16   : > { %v536_v39 = vor.u32 %v610_v34, %v533_v35 }
  0x18   : > { %360 = vmatpush.bf16.msra.mxu0 %v616_v6  ;;  %654 = vmatpush.bf16.msra.mxu2 %v616_v6 }
  0x19   : > { %389 = vmatpush.bf16.msra.mxu1 %v624_v7  ;;  %662 = vmatpush.bf16.msra.mxu3 %v624_v7 }
  0x1c   : > { %361 = vmatpush.bf16.msra.mxu0 %v615_v8  ;;  %655 = vmatpush.bf16.msra.mxu2 %v615_v8 }
  0x1d   : > { %390 = vmatpush.bf16.msra.mxu1 %v623_v9  ;;  %663 = vmatpush.bf16.msra.mxu3 %v623_v9 }
  0x20   : > { %362 = vmatpush.bf16.msra.mxu0 %v614_v10  ;;  %656 = vmatpush.bf16.msra.mxu2 %v614_v10 }
  0x21   : > { %391 = vmatpush.bf16.msra.mxu1 %v622_v11  ;;  %664 = vmatpush.bf16.msra.mxu3 %v622_v11 }
  0x24   : > { %363 = vmatpush.bf16.msra.mxu0 %v613_v12  ;;  %657 = vmatpush.bf16.msra.mxu2 %v613_v12 }
  0x25   : > { %392 = vmatpush.bf16.msra.mxu1 %v621_v13  ;;  %665 = vmatpush.bf16.msra.mxu3 %v621_v13 }
  0x28   : > { %364 = vmatpush.bf16.msra.mxu0 %v612_v14  ;;  %658 = vmatpush.bf16.msra.mxu2 %v612_v14 }
  0x29   : > { %393 = vmatpush.bf16.msra.mxu1 %v620_v15  ;;  %666 = vmatpush.bf16.msra.mxu3 %v620_v15 }
  0x2b   : > { %365 = vmatmul.bf16.vlgmr.msra.gmra.mxu0 %v508_v24  ;;  %375 = vmatmul.bf16.vlgmr.msra.gmra.mxu2 %v524_v25 }
  0x2c   : > { %394 = vmatmul.bf16.vlgmr.msra.gmra.mxu1 %v512_v26  ;;  %404 = vmatmul.bf16.vlgmr.msra.gmra.mxu3 %v528_v27 }
  0x3b   : > { %370 = vmatmul.bf16.gmra.mxu0 %v516_v36  ;;  %380 = vmatmul.bf16.gmra.mxu2 %v532_v37 }
  0x3c   : > { %399 = vmatmul.bf16.gmra.mxu1 %v520_v38  ;;  %409 = vmatmul.bf16.gmra.mxu3 %v536_v39 }
  0xa8   : > { %v366_v40 = vpop.f32.mrf.mxu0 }
  0xa9   : > { %v395_v42 = vpop.f32.mrf.mxu1  ;;  %v367_v43 = vadd.f32 %v675_v41, %v366_v40 }
  0xab   : > { %v396_v47 = vadd.f32 %v395_v42, %v367_v43 }
  0xad   : > { %v415_v52 = vmax.f32 %v396_v47, 0.0 }
  0xae   : > { %v376_v44 = vpop.f32.mrf.mxu2 }
  0xaf   : > { %v405_v45 = vpop.f32.mrf.mxu3  ;;  %v377_v50 = vadd.f32 %v675_v41, %v376_v44 }
  0xb0   : > { %v368_v46 = vpop.f32.mrf.mxu0 }
  0xb1   : > { %v369_v48 = vadd.f32 %v675_v41, %v368_v46  ;;  %v397_v49 = vpop.f32.mrf.mxu1  ;;  %v406_v55 = vadd.f32 %v405_v45, %v377_v50 }
  0xb3   : > { %v398_v51 = vadd.f32 %v397_v49, %v369_v48  ;;  %v419_v62 = vmax.f32 %v406_v55, 0.0 }
  0xb5   : > { %v416_v53 = vmax.f32 %v398_v51, 0.0 }
  0xb6   : > { %v378_v54 = vpop.f32.mrf.mxu2 }
  0xb7   : > { %v631_v56 = vpack.c.bf16 %v416_v53, %v415_v52  ;;  %v379_v57 = vadd.f32 %v675_v41, %v378_v54  ;;  %v407_v58 = vpop.f32.mrf.mxu3 }
  0xb8   : > { %v371_v59 = vpop.f32.mrf.mxu0 }
  0xb9   : > { %632 = vst [vmem:[%s791_s4] sm:$0xff] %v631_v56   ;;  %v408_v60 = vadd.f32 %v407_v58, %v379_v57  ;;  %v400_v61 = vpop.f32.mrf.mxu1  ;;  %v372_v1 = vadd.f32 %v675_v41, %v371_v59 }
  0xbb   : > { %v420_v63 = vmax.f32 %v408_v60, 0.0  ;;  %v401_v5 = vadd.f32 %v400_v61, %v372_v1 }
  0xbd   : > { %v641_v0 = vpack.c.bf16 %v420_v63, %v419_v62  ;;  %v417_v10 = vmax.f32 %v401_v5, 0.0 }
  0xbe   : > { %v381_v2 = vpop.f32.mrf.mxu2 }
  0xbf   : > { %649 = vst [vmem:[%s791_s4 + $0x10] sm:$0xff] %v641_v0   ;;  %v410_v3 = vpop.f32.mrf.mxu3  ;;  %v382_v8 = vadd.f32 %v675_v41, %v381_v2 }
  0xc0   : > { %v373_v4 = vpop.f32.mrf.mxu0 }
  0xc1   : > { %v374_v6 = vadd.f32 %v675_v41, %v373_v4  ;;  %v402_v7 = vpop.f32.mrf.mxu1  ;;  %v411_v13 = vadd.f32 %v410_v3, %v382_v8 }
  0xc3   : > { %v403_v9 = vadd.f32 %v402_v7, %v374_v6  ;;  %v421_v18 = vmax.f32 %v411_v13, 0.0 }
  0xc5   : > { %v418_v11 = vmax.f32 %v403_v9, 0.0 }
  0xc6   : > { %v383_v12 = vpop.f32.mrf.mxu2 }
  0xc7   : > { %v636_v14 = vpack.c.bf16 %v418_v11, %v417_v10  ;;  %v384_v15 = vadd.f32 %v675_v41, %v383_v12  ;;  %v412_v16 = vpop.f32.mrf.mxu3 }
  0xc9   : > { %648 = vst [vmem:[%s791_s4 + $0x8] sm:$0xff] %v636_v14   ;;  %v413_v17 = vadd.f32 %v412_v16, %v384_v15 }
  0xcb   : > { %v422_v19 = vmax.f32 %v413_v17, 0.0 }
  0xcd   : > { %v646_v20 = vpack.c.bf16 %v422_v19, %v421_v18 }
  0xcf   : > { %650 = vst [vmem:[%s791_s4 + $0x18] sm:$0xff] %v646_v20  }
  0xd0 PF: > { %s13_s12 = sadd.s32 1, %s682_s12  }
  0xd1   : > { %p10_p4 = scmp.ge.s32.totalorder %s13_s12, 4  }
  0xd3   :  { %12 = sbr.rel (!%p10_p4) target bundleno = 1 (0x1), region = 62 }

// kernel: nf_resnet_forward.15
= control target key start
LH: loop header
LB: loop body
LE: loop exit
PB: predicated region body
PF: predicated region fallthrough
CT: control target
= control target key end

     0   :  { %s983_s15 = smov 0   ;;  %s1130_s0 = inlined_call_operand.vmem [shape: bf16[128,384], index: 0, kind: input, shape index: {}]   ;;  %s1131_s1 = inlined_call_operand.vmem [shape: bf16[384,128], index: 1, kind: input, shape index: {}]   ;;  %s1132_s2 = inlined_call_operand.vmem [shape: f32[1,128], index: 2, kind: input, shape index: {}]   ;;  %s1133_s3 = inlined_call_operand.vmem [shape: bf16[128,128], index: 3, kind: input, shape index: {}]   ;;  %s1134_s4 = inlined_call_operand.vmem [shape: bf16[128,128], index: 4, kind: output, shape index: {}]  }
   0x1 LB: > { %s697_s16 = sadd.s32 4294967295, %s956_s15   ;;  %p701_p0 = scmp.ge.s32.totalorder %s956_s15, 1  ;;  %s956_s15 = sphi %s983_s15, %s14_s15  }
   0x2   : > { %p175_p1 = scmp.lt.s32.totalorder %s956_s15, 3 }
   0x4   : > { %p176_p2 = pnand %p701_p0, %p175_p1 }
   0x5   : > { %s702_s9 = sshll.u32 (!%p176_p2), %s697_s16, 3 }
   0x6   : > { %179 = sbr.rel (%p176_p2) target bundleno = 240 (0xf0), region = 36  ;;  %p208_p3 = scmp.lt.s32.totalorder (!%p176_p2), %s702_s9, 15 }
   0xb   : > { %v873_v0 = vld [vmem:[%s1131_s1 + $0x38] sm:$0xff]  ;;  %v872_v3 = vld [vmem:[%s1131_s1 + $0x30] sm:$0xff]  ;;  %v871_v6 = vld [vmem:[%s1131_s1 + $0x28] sm:$0xff]  ;;  %s1136_s9 = smov (!%p208_p3, %s702_s9), 15 }
   0xc   : > { %v881_v1 = vld [vmem:[%s1131_s1 + $0x78] sm:$0xff]  ;;  %502 = vmatpush.bf16.msra.mxu0 %v873_v0  ;;  %v880_v4 = vld [vmem:[%s1131_s1 + $0x70] sm:$0xff]  ;;  %932 = vmatpush.bf16.msra.mxu3 %v873_v0  ;;  %v879_v7 = vld [vmem:[%s1131_s1 + $0x68] sm:$0xff]  ;;  %s940_s27 = smul.u32 12, %s1136_s9  ;;  %s705_s23 = sshll.u32 %s1136_s9, 2 }
   0xd   : > { %v889_v2 = vld [vmem:[%s1131_s1 + $0xb8] sm:$0xff]  ;;  %531 = vmatpush.bf16.msra.mxu1 %v881_v1  ;;  %v888_v5 = vld [vmem:[%s1131_s1 + $0xb0] sm:$0xff]  ;;  %v887_v8 = vld [vmem:[%s1131_s1 + $0xa8] sm:$0xff]  ;;  %s1105_s26 = scalar_lea.vmem %s1133_s3, %s705_s23  ;;  %s1112_s28 = scalar_lea.vmem %s1134_s4, %s705_s23 }
   0xe   : > { %560 = vmatpush.bf16.msra.mxu2 %v889_v2  ;;  %v870_v9 = vld [vmem:[%s1131_s1 + $0x20] sm:$0xff]  ;;  %v869_v12 = vld [vmem:[%s1131_s1 + $0x18] sm:$0xff]  ;;  %v868_v15 = vld [vmem:[%s1131_s1 + $0x10] sm:$0xff]  ;;  %s1057_s11 = scalar_lea.vmem %s1130_s0, %s940_s27 }
   0xf   : > { %v878_v10 = vld [vmem:[%s1131_s1 + $0x60] sm:$0xff]  ;;  %v877_v13 = vld [vmem:[%s1131_s1 + $0x58] sm:$0xff]  ;;  %v876_v16 = vld [vmem:[%s1131_s1 + $0x50] sm:$0xff] }
  0x10   : > { %503 = vmatpush.bf16.msra.mxu0 %v872_v3  ;;  %933 = vmatpush.bf16.msra.mxu3 %v872_v3  ;;  %v886_v11 = vld [vmem:[%s1131_s1 + $0xa0] sm:$0xff]  ;;  %v885_v14 = vld [vmem:[%s1131_s1 + $0x98] sm:$0xff]  ;;  %v884_v17 = vld [vmem:[%s1131_s1 + $0x90] sm:$0xff] }
  0x11   : > { %532 = vmatpush.bf16.msra.mxu1 %v880_v4  ;;  %v867_v18 = vld [vmem:[%s1131_s1 + $0x8] sm:$0xff]  ;;  %v866_v21 = vld [vmem:[%s1131_s1] sm:$0xff]  ;;  %v712_v27 = vld [vmem:[%s1057_s11 + $0xc] sm:$0xf0] }
  0x12   : > { %561 = vmatpush.bf16.msra.mxu2 %v888_v5  ;;  %v875_v19 = vld [vmem:[%s1131_s1 + $0x48] sm:$0xff]  ;;  %v874_v22 = vld [vmem:[%s1131_s1 + $0x40] sm:$0xff]  ;;  %v856_v29 = vld [vmem:[%s1057_s11 + $0x10] sm:$0xf0] }
  0x13   : > { %v883_v20 = vld [vmem:[%s1131_s1 + $0x88] sm:$0xff]  ;;  %v882_v23 = vld [vmem:[%s1131_s1 + $0x80] sm:$0xff]  ;;  %v722_v30 = vld [vmem:[%s1057_s11 + $0x18] sm:$0xf] }
  0x14   : > { %504 = vmatpush.bf16.msra.mxu0 %v871_v6  ;;  %934 = vmatpush.bf16.msra.mxu3 %v871_v6  ;;  %v710_v24 = vld [vmem:[%s1057_s11] sm:$0xf]  ;;  %v855_v25 = vld [vmem:[%s1057_s11 + $0x8] sm:$0xf0]  ;;  %v854_v26 = vld [vmem:[%s1057_s11 + $0x4] sm:$0xf] }
  0x15   : > { %533 = vmatpush.bf16.msra.mxu1 %v879_v7  ;;  %v718_v28 = vld [vmem:[%s1057_s11 + $0x8] sm:$0xf]  ;;  %v858_v31 = vld [vmem:[%s1057_s11 + $0x20] sm:$0xf0]  ;;  %v711_v32 = vor.u32 %v855_v25, %v710_v24  ;;  %v715_v33 = vor.u32 %v854_v26, %v712_v27  ;;  %v857_v36 = vld [vmem:[%s1057_s11 + $0x1c] sm:$0xf] }
  0x16   : > { %562 = vmatpush.bf16.msra.mxu2 %v887_v8  ;;  %v719_v34 = vor.u32 %v856_v29, %v718_v28  ;;  %v723_v35 = vor.u32 %v858_v31, %v722_v30  ;;  %v724_v37 = vld [vmem:[%s1057_s11 + $0x24] sm:$0xf0]  ;;  %v730_v38 = vld [vmem:[%s1057_s11 + $0x20] sm:$0xf]  ;;  %v859_v39 = vld [vmem:[%s1057_s11 + $0x28] sm:$0xf0] }
  0x17   : > { %v734_v40 = vld [vmem:[%s1057_s11 + $0x30] sm:$0xf]  ;;  %v861_v41 = vld [vmem:[%s1057_s11 + $0x38] sm:$0xf0]  ;;  %v727_v42 = vor.u32 %v857_v36, %v724_v37  ;;  %v731_v43 = vor.u32 %v859_v39, %v730_v38  ;;  %v860_v45 = vld [vmem:[%s1057_s11 + $0x34] sm:$0xf] }
  0x18   : > { %505 = vmatpush.bf16.msra.mxu0 %v870_v9  ;;  %935 = vmatpush.bf16.msra.mxu3 %v870_v9  ;;  %v735_v44 = vor.u32 %v861_v41, %v734_v40  ;;  %v736_v46 = vld [vmem:[%s1057_s11 + $0x3c] sm:$0xf0]  ;;  %v742_v47 = vld [vmem:[%s1057_s11 + $0x38] sm:$0xf]  ;;  %v862_v48 = vld [vmem:[%s1057_s11 + $0x40] sm:$0xf0] }
  0x19   : > { %534 = vmatpush.bf16.msra.mxu1 %v878_v10  ;;  %v746_v49 = vld [vmem:[%s1057_s11 + $0x48] sm:$0xf]  ;;  %v864_v50 = vld [vmem:[%s1057_s11 + $0x50] sm:$0xf0]  ;;  %v739_v51 = vor.u32 %v860_v45, %v736_v46  ;;  %v743_v52 = vor.u32 %v862_v48, %v742_v47  ;;  %v863_v54 = vld [vmem:[%s1057_s11 + $0x4c] sm:$0xf] }
  0x1a   : > { %563 = vmatpush.bf16.msra.mxu2 %v886_v11  ;;  %v747_v53 = vor.u32 %v864_v50, %v746_v49  ;;  %v748_v55 = vld [vmem:[%s1057_s11 + $0x54] sm:$0xf0]  ;;  %v754_v56 = vld [vmem:[%s1057_s11 + $0x50] sm:$0xf]  ;;  %v865_v57 = vld [vmem:[%s1057_s11 + $0x58] sm:$0xf0] }
  0x1b   : > { %v751_v58 = vor.u32 %v863_v54, %v748_v55  ;;  %v755_v59 = vor.u32 %v865_v57, %v754_v56  ;;  %v1098_v62 = vld [vmem:[%s1132_s2] ss:$0 sm:$0xff]  ;;  %v927_v40 = vld [vmem:[%s1105_s26 + $0x10] sm:$0xff]   ;;  %v928_v57 = vld [vmem:[%s1105_s26 + $0x18] sm:$0xff]  }
  0x1c   : > { %506 = vmatpush.bf16.msra.mxu0 %v869_v12  ;;  %936 = vmatpush.bf16.msra.mxu3 %v869_v12  ;;  %v891_v6 = vld [vmem:[%s1105_s26] sm:$0xff]   ;;  %v901_v45 = vunpack.c.h.bf16 %v927_v40 }
  0x1d   : > { %535 = vmatpush.bf16.msra.mxu1 %v877_v13  ;;  %v892_v8 = vunpack.c.l.bf16 %v891_v6  ;;  %v893_v10 = vunpack.c.h.bf16 %v891_v6 }
  0x1e   : > { %564 = vmatpush.bf16.msra.mxu2 %v885_v14 }
  0x20   : > { %507 = vmatpush.bf16.msra.mxu0 %v868_v15  ;;  %937 = vmatpush.bf16.msra.mxu3 %v868_v15 }
  0x21   : > { %536 = vmatpush.bf16.msra.mxu1 %v876_v16 }
  0x22   : > { %565 = vmatpush.bf16.msra.mxu2 %v884_v17 }
  0x24   : > { %508 = vmatpush.bf16.msra.mxu0 %v867_v18  ;;  %938 = vmatpush.bf16.msra.mxu3 %v867_v18 }
  0x25   : > { %537 = vmatpush.bf16.msra.mxu1 %v875_v19 }
  0x26   : > { %566 = vmatpush.bf16.msra.mxu2 %v883_v20 }
  0x28   : > { %509 = vmatpush.bf16.msra.mxu0 %v866_v21  ;;  %939 = vmatpush.bf16.msra.mxu3 %v866_v21 }
  0x29   : > { %538 = vmatpush.bf16.msra.mxu1 %v874_v22  ;;  %v926_v22 = vld [vmem:[%s1105_s26 + $0x8] sm:$0xff]  }
  0x2a   : > { %567 = vmatpush.bf16.msra.mxu2 %v882_v23  ;;  %v896_v26 = vunpack.c.l.bf16 %v926_v22  ;;  %v897_v28 = vunpack.c.h.bf16 %v926_v22 }
  0x2b   : > { %510 = vmatmul.bf16.vlgmr.msra.gmra.mxu0 %v711_v32  ;;  %515 = vmatmul.bf16.vlgmr.msra.gmra.mxu3 %v723_v35 }
  0x2c   : > { %539 = vmatmul.bf16.vlgmr.msra.gmra.mxu1 %v715_v33 }
  0x2d   : > { %568 = vmatmul.bf16.vlgmr.msra.gmra.mxu2 %v719_v34 }
  0x3b   : > { %520 = vmatmul.bf16.gmra.mxu3 %v735_v44 }
  0x3c   : > { %544 = vmatmul.bf16.gmra.mxu1 %v727_v42 }
  0x3d   : > { %573 = vmatmul.bf16.gmra.mxu2 %v731_v43  ;;  %v900_v43 = vunpack.c.l.bf16 %v927_v40 }
  0x4b   : > { %525 = vmatmul.bf16.gmra.mxu3 %v747_v53 }
  0x4c   : > { %549 = vmatmul.bf16.gmra.mxu1 %v739_v51 }
  0x4d   : > { %578 = vmatmul.bf16.gmra.mxu2 %v743_v52 }
  0x5c   : > { %554 = vmatmul.bf16.gmra.mxu1 %v751_v58 }
  0x5d   : > { %583 = vmatmul.bf16.gmra.mxu2 %v755_v59 }
  0xa8   : > { %v511_v60 = vpop.f32.mrf.mxu0 }
  0xa9   : > { %v540_v61 = vpop.f32.mrf.mxu1  ;;  %v512_v63 = vadd.f32 %v1098_v62, %v511_v60 }
  0xab   : > { %v541_v4 = vadd.f32 %v540_v61, %v512_v63  ;;  %v904_v61 = vunpack.c.l.bf16 %v928_v57 }
  0xae   : > { %v516_v1 = vpop.f32.mrf.mxu3 }
  0xaf   : > { %v517_v18 = vadd.f32 %v1098_v62, %v516_v1 }
  0xb0   : > { %v569_v0 = vpop.f32.mrf.mxu2  ;;  %v513_v2 = vpop.f32.mrf.mxu0 }
  0xb1   : > { %v542_v3 = vpop.f32.mrf.mxu1  ;;  %v514_v5 = vadd.f32 %v1098_v62, %v513_v2  ;;  %v570_v7 = vadd.f32 %v569_v0, %v541_v4  ;;  %v905_v0 = vunpack.c.h.bf16 %v928_v57 }
  0xb3   : > { %v543_v9 = vadd.f32 %v542_v3, %v514_v5  ;;  %v605_v15 = vadd.f32 %v892_v8, %v570_v7 }
  0xb6   : > { %v518_v14 = vpop.f32.mrf.mxu3 }
  0xb7   : > { %v519_v24 = vadd.f32 %v1098_v62, %v518_v14 }
  0xb8   : > { %v571_v11 = vpop.f32.mrf.mxu2 }
  0xb9   : > { %v572_v12 = vadd.f32 %v571_v11, %v543_v9  ;;  %v545_v13 = vpop.f32.mrf.mxu1 }
  0xba   : > { %v546_v21 = vadd.f32 %v545_v13, %v517_v18 }
  0xbb   : > { %v606_v16 = vadd.f32 %v893_v10, %v572_v12 }
  0xbd   : > { %v909_v17 = vpack.c.bf16 %v606_v16, %v605_v15 }
  0xbe   : > { %v521_v23 = vpop.f32.mrf.mxu3 }
  0xbf   : > { %910 = vst [vmem:[%s1112_s28] sm:$0xff] %v909_v17   ;;  %v522_v36 = vadd.f32 %v1098_v62, %v521_v23 }
  0xc0   : > { %v574_v19 = vpop.f32.mrf.mxu2 }
  0xc1   : > { %v547_v20 = vpop.f32.mrf.mxu1  ;;  %v575_v25 = vadd.f32 %v574_v19, %v546_v21 }
  0xc2   : > { %v548_v27 = vadd.f32 %v547_v20, %v519_v24 }
  0xc3   : > { %v607_v32 = vadd.f32 %v896_v26, %v575_v25 }
  0xc6   : > { %v523_v35 = vpop.f32.mrf.mxu3 }
  0xc7   : > { %v524_v41 = vadd.f32 %v1098_v62, %v523_v35 }
  0xc8   : > { %v576_v29 = vpop.f32.mrf.mxu2 }
  0xc9   : > { %v577_v30 = vadd.f32 %v576_v29, %v548_v27  ;;  %v550_v31 = vpop.f32.mrf.mxu1 }
  0xca   : > { %v551_v39 = vadd.f32 %v550_v31, %v522_v36 }
  0xcb   : > { %v608_v33 = vadd.f32 %v897_v28, %v577_v30 }
  0xcd   : > { %v914_v34 = vpack.c.bf16 %v608_v33, %v607_v32 }
  0xce   : > { %v526_v46 = vpop.f32.mrf.mxu3 }
  0xcf   : > { %929 = vst [vmem:[%s1112_s28 + $0x8] sm:$0xff] %v914_v34   ;;  %v527_v53 = vadd.f32 %v1098_v62, %v526_v46 }
  0xd0   : > { %v579_v37 = vpop.f32.mrf.mxu2 }
  0xd1   : > { %v552_v38 = vpop.f32.mrf.mxu1  ;;  %v580_v42 = vadd.f32 %v579_v37, %v551_v39 }
  0xd2   : > { %v553_v44 = vadd.f32 %v552_v38, %v524_v41 }
  0xd3   : > { %v609_v50 = vadd.f32 %v900_v43, %v580_v42 }
  0xd6   : > { %v528_v55 = vpop.f32.mrf.mxu3 }
  0xd7   : > { %v529_v59 = vadd.f32 %v1098_v62, %v528_v55 }
  0xd8   : > { %v581_v47 = vpop.f32.mrf.mxu2 }
  0xd9   : > { %v582_v48 = vadd.f32 %v581_v47, %v553_v44  ;;  %v555_v49 = vpop.f32.mrf.mxu1 }
  0xda   : > { %v556_v56 = vadd.f32 %v555_v49, %v527_v53 }
  0xdb   : > { %v610_v51 = vadd.f32 %v901_v45, %v582_v48 }
  0xdd   : > { %v919_v52 = vpack.c.bf16 %v610_v51, %v609_v50 }
  0xdf   : > { %930 = vst [vmem:[%s1112_s28 + $0x10] sm:$0xff] %v919_v52  }
  0xe0   : > { %v584_v54 = vpop.f32.mrf.mxu2 }
  0xe1   : > { %v557_v58 = vpop.f32.mrf.mxu1  ;;  %v585_v60 = vadd.f32 %v584_v54, %v556_v56 }
  0xe2   : > { %v558_v63 = vadd.f32 %v557_v58, %v529_v59 }
  0xe3   : > { %v611_v3 = vadd.f32 %v904_v61, %v585_v60 }
  0xe8   : > { %v586_v1 = vpop.f32.mrf.mxu2 }
  0xe9   : > { %v587_v2 = vadd.f32 %v586_v1, %v558_v63 }
  0xeb   : > { %v612_v4 = vadd.f32 %v905_v0, %v587_v2 }
  0xed   : > { %v924_v5 = vpack.c.bf16 %v612_v4, %v611_v3 }
  0xef   : > { %931 = vst [vmem:[%s1112_s28 + $0x18] sm:$0xff] %v924_v5  }
  0xf0 PF: > { %s14_s15 = sadd.s32 1, %s956_s15  }
  0xf1   : > { %p11_p4 = scmp.ge.s32.totalorder %s14_s15, 4  }
  0xf3   :  { %13 = sbr.rel (!%p11_p4) target bundleno = 1 (0x1), region = 69 }

// kernel: nf_resnet_forward.16
= control target key start
LH: loop header
LB: loop body
LE: loop exit
PB: predicated region body
PF: predicated region fallthrough
CT: control target
= control target key end

     0   :  { %s258_s1 = inlined_call_operand.vmem [shape: bf16[128,128], index: 1, kind: input, shape index: {}]   ;;  %s259_s2 = inlined_call_operand.vmem [shape: f32[1,128], index: 2, kind: input, shape index: {}]   ;;  %s260_s0 = inlined_call_operand.vmem [shape: bf16[32,128], index: 0, kind: input, shape index: {}]   ;;  %s261_s3 = inlined_call_operand.vmem [shape: bf16[32,128], index: 3, kind: output, shape index: {}]  }
   0x1   :  { %v178_v0 = vld [vmem:[%s258_s1 + $0x38] sm:$0xff]  ;;  %v177_v1 = vld [vmem:[%s258_s1 + $0x30] sm:$0xff]  ;;  %v176_v2 = vld [vmem:[%s258_s1 + $0x28] sm:$0xff] }
   0x2   :  { %98 = vmatpush.bf16.msra.mxu0 %v178_v0  ;;  %190 = vmatpush.bf16.msra.mxu1 %v178_v0  ;;  %v175_v3 = vld [vmem:[%s258_s1 + $0x20] sm:$0xff]  ;;  %v174_v4 = vld [vmem:[%s258_s1 + $0x18] sm:$0xff]  ;;  %v173_v5 = vld [vmem:[%s258_s1 + $0x10] sm:$0xff] }
   0x3   :  { %v172_v6 = vld [vmem:[%s258_s1 + $0x8] sm:$0xff]  ;;  %v171_v7 = vld [vmem:[%s258_s1] sm:$0xff] }
   0x4   :  { %v169_v8 = vld [vmem:[%s260_s0] sm:$0xff]  ;;  %v170_v9 = vld [vmem:[%s260_s0 + $0x8] sm:$0xff] }
   0x5   :  { %v198_v12 = vld [vmem:[%s259_s2] ss:$0 sm:$0xff] }
   0x6   :  { %99 = vmatpush.bf16.msra.mxu0 %v177_v1  ;;  %191 = vmatpush.bf16.msra.mxu1 %v177_v1 }
   0xa   :  { %100 = vmatpush.bf16.msra.mxu0 %v176_v2  ;;  %192 = vmatpush.bf16.msra.mxu1 %v176_v2 }
   0xe   :  { %101 = vmatpush.bf16.msra.mxu0 %v175_v3  ;;  %193 = vmatpush.bf16.msra.mxu1 %v175_v3 }
  0x12   :  { %102 = vmatpush.bf16.msra.mxu0 %v174_v4  ;;  %194 = vmatpush.bf16.msra.mxu1 %v174_v4 }
  0x16   :  { %103 = vmatpush.bf16.msra.mxu0 %v173_v5  ;;  %195 = vmatpush.bf16.msra.mxu1 %v173_v5 }
  0x1a   :  { %104 = vmatpush.bf16.msra.mxu0 %v172_v6  ;;  %196 = vmatpush.bf16.msra.mxu1 %v172_v6 }
  0x1e   :  { %105 = vmatpush.bf16.msra.mxu0 %v171_v7  ;;  %197 = vmatpush.bf16.msra.mxu1 %v171_v7 }
  0x21   :  { %106 = vmatmul.bf16.vlgmr.msra.gmra.mxu0 %v169_v8  ;;  %111 = vmatmul.bf16.vlgmr.msra.gmra.mxu1 %v170_v9 }
  0x9e   :  { %v107_v10 = vpop.f32.mrf.mxu0  ;;  %v112_v11 = vpop.f32.mrf.mxu1 }
  0x9f   :  { %v108_v15 = vadd.f32 %v198_v12, %v107_v10  ;;  %v113_v16 = vadd.f32 %v198_v12, %v112_v11 }
  0xa6   :  { %v109_v13 = vpop.f32.mrf.mxu0  ;;  %v114_v14 = vpop.f32.mrf.mxu1 }
  0xa7   :  { %v110_v17 = vadd.f32 %v198_v12, %v109_v13  ;;  %v115_v18 = vadd.f32 %v198_v12, %v114_v14 }
  0xa9   :  { %v182_v19 = vpack.c.bf16 %v110_v17, %v108_v15  ;;  %v187_v20 = vpack.c.bf16 %v115_v18, %v113_v16 }
  0xab   :  { %183 = vst [vmem:[%s261_s3] sm:$0xff] %v182_v19  }
  0xac   :  { %189 = vst [vmem:[%s261_s3 + $0x8] sm:$0xff] %v187_v20  }

// kernel: nf_resnet_forward.17
= control target key start
LH: loop header
LB: loop body
LE: loop exit
PB: predicated region body
PF: predicated region fallthrough
CT: control target
= control target key end

     0   :  { %s630_s1 = inlined_call_operand.vmem [shape: bf16[384,128], index: 1, kind: input, shape index: {}]   ;;  %s631_s2 = inlined_call_operand.vmem [shape: f32[1,128], index: 2, kind: input, shape index: {}]   ;;  %s632_s0 = inlined_call_operand.vmem [shape: bf16[32,384], index: 0, kind: input, shape index: {}]   ;;  %s633_s3 = inlined_call_operand.vmem [shape: bf16[32,128], index: 3, kind: output, shape index: {}]  }
   0x1   :  { %v456_v0 = vld [vmem:[%s630_s1 + $0x38] sm:$0xff]  ;;  %v455_v3 = vld [vmem:[%s630_s1 + $0x30] sm:$0xff]  ;;  %v454_v6 = vld [vmem:[%s630_s1 + $0x28] sm:$0xff] }
   0x2   :  { %v464_v1 = vld [vmem:[%s630_s1 + $0x78] sm:$0xff]  ;;  %250 = vmatpush.bf16.msra.mxu0 %v456_v0  ;;  %v463_v4 = vld [vmem:[%s630_s1 + $0x70] sm:$0xff]  ;;  %484 = vmatpush.bf16.msra.mxu3 %v456_v0  ;;  %v462_v7 = vld [vmem:[%s630_s1 + $0x68] sm:$0xff] }
   0x3   :  { %v472_v2 = vld [vmem:[%s630_s1 + $0xb8] sm:$0xff]  ;;  %269 = vmatpush.bf16.msra.mxu1 %v464_v1  ;;  %v471_v5 = vld [vmem:[%s630_s1 + $0xb0] sm:$0xff]  ;;  %v470_v8 = vld [vmem:[%s630_s1 + $0xa8] sm:$0xff] }
   0x4   :  { %288 = vmatpush.bf16.msra.mxu2 %v472_v2  ;;  %v453_v9 = vld [vmem:[%s630_s1 + $0x20] sm:$0xff]  ;;  %v452_v12 = vld [vmem:[%s630_s1 + $0x18] sm:$0xff]  ;;  %v451_v15 = vld [vmem:[%s630_s1 + $0x10] sm:$0xff] }
   0x5   :  { %v461_v10 = vld [vmem:[%s630_s1 + $0x60] sm:$0xff]  ;;  %v460_v13 = vld [vmem:[%s630_s1 + $0x58] sm:$0xff]  ;;  %v459_v16 = vld [vmem:[%s630_s1 + $0x50] sm:$0xff] }
   0x6   :  { %251 = vmatpush.bf16.msra.mxu0 %v455_v3  ;;  %485 = vmatpush.bf16.msra.mxu3 %v455_v3  ;;  %v469_v11 = vld [vmem:[%s630_s1 + $0xa0] sm:$0xff]  ;;  %v468_v14 = vld [vmem:[%s630_s1 + $0x98] sm:$0xff]  ;;  %v467_v17 = vld [vmem:[%s630_s1 + $0x90] sm:$0xff] }
   0x7   :  { %270 = vmatpush.bf16.msra.mxu1 %v463_v4  ;;  %v450_v18 = vld [vmem:[%s630_s1 + $0x8] sm:$0xff]  ;;  %v449_v21 = vld [vmem:[%s630_s1] sm:$0xff]  ;;  %v327_v27 = vld [vmem:[%s632_s0 + $0xc] sm:$0xf0] }
   0x8   :  { %289 = vmatpush.bf16.msra.mxu2 %v471_v5  ;;  %v458_v19 = vld [vmem:[%s630_s1 + $0x48] sm:$0xff]  ;;  %v457_v22 = vld [vmem:[%s630_s1 + $0x40] sm:$0xff]  ;;  %v445_v29 = vld [vmem:[%s632_s0 + $0x10] sm:$0xf0] }
   0x9   :  { %v466_v20 = vld [vmem:[%s630_s1 + $0x88] sm:$0xff]  ;;  %v465_v23 = vld [vmem:[%s630_s1 + $0x80] sm:$0xff]  ;;  %v337_v30 = vld [vmem:[%s632_s0 + $0x18] sm:$0xf] }
   0xa   :  { %252 = vmatpush.bf16.msra.mxu0 %v454_v6  ;;  %486 = vmatpush.bf16.msra.mxu3 %v454_v6  ;;  %v325_v24 = vld [vmem:[%s632_s0] sm:$0xf]  ;;  %v444_v25 = vld [vmem:[%s632_s0 + $0x8] sm:$0xf0]  ;;  %v443_v26 = vld [vmem:[%s632_s0 + $0x4] sm:$0xf] }
   0xb   :  { %271 = vmatpush.bf16.msra.mxu1 %v462_v7  ;;  %v333_v28 = vld [vmem:[%s632_s0 + $0x8] sm:$0xf]  ;;  %v447_v31 = vld [vmem:[%s632_s0 + $0x20] sm:$0xf0]  ;;  %v326_v32 = vor.u32 %v444_v25, %v325_v24  ;;  %v330_v33 = vor.u32 %v443_v26, %v327_v27  ;;  %v446_v36 = vld [vmem:[%s632_s0 + $0x1c] sm:$0xf] }
   0xc   :  { %290 = vmatpush.bf16.msra.mxu2 %v470_v8  ;;  %v334_v34 = vor.u32 %v445_v29, %v333_v28  ;;  %v338_v35 = vor.u32 %v447_v31, %v337_v30  ;;  %v339_v37 = vld [vmem:[%s632_s0 + $0x24] sm:$0xf0]  ;;  %v345_v38 = vld [vmem:[%s632_s0 + $0x20] sm:$0xf]  ;;  %v448_v39 = vld [vmem:[%s632_s0 + $0x28] sm:$0xf0] }
   0xd   :  { %v342_v40 = vor.u32 %v446_v36, %v339_v37  ;;  %v346_v41 = vor.u32 %v448_v39, %v345_v38  ;;  %v492_v44 = vld [vmem:[%s631_s2] ss:$0 sm:$0xff] }
   0xe   :  { %253 = vmatpush.bf16.msra.mxu0 %v453_v9  ;;  %487 = vmatpush.bf16.msra.mxu3 %v453_v9 }
   0xf   :  { %272 = vmatpush.bf16.msra.mxu1 %v461_v10 }
  0x10   :  { %291 = vmatpush.bf16.msra.mxu2 %v469_v11 }
  0x12   :  { %254 = vmatpush.bf16.msra.mxu0 %v452_v12  ;;  %488 = vmatpush.bf16.msra.mxu3 %v452_v12 }
  0x13   :  { %273 = vmatpush.bf16.msra.mxu1 %v460_v13 }
  0x14   :  { %292 = vmatpush.bf16.msra.mxu2 %v468_v14 }
  0x16   :  { %255 = vmatpush.bf16.msra.mxu0 %v451_v15  ;;  %489 = vmatpush.bf16.msra.mxu3 %v451_v15 }
  0x17   :  { %274 = vmatpush.bf16.msra.mxu1 %v459_v16 }
  0x18   :  { %293 = vmatpush.bf16.msra.mxu2 %v467_v17 }
  0x1a   :  { %256 = vmatpush.bf16.msra.mxu0 %v450_v18  ;;  %490 = vmatpush.bf16.msra.mxu3 %v450_v18 }
  0x1b   :  { %275 = vmatpush.bf16.msra.mxu1 %v458_v19 }
  0x1c   :  { %294 = vmatpush.bf16.msra.mxu2 %v466_v20 }
  0x1e   :  { %257 = vmatpush.bf16.msra.mxu0 %v449_v21  ;;  %491 = vmatpush.bf16.msra.mxu3 %v449_v21 }
  0x1f   :  { %276 = vmatpush.bf16.msra.mxu1 %v457_v22 }
  0x20   :  { %295 = vmatpush.bf16.msra.mxu2 %v465_v23 }
  0x21   :  { %258 = vmatmul.bf16.vlgmr.msra.gmra.mxu0 %v326_v32  ;;  %263 = vmatmul.bf16.vlgmr.msra.gmra.mxu3 %v338_v35 }
  0x22   :  { %277 = vmatmul.bf16.vlgmr.msra.gmra.mxu1 %v330_v33 }
  0x23   :  { %296 = vmatmul.bf16.vlgmr.msra.gmra.mxu2 %v334_v34 }
  0x32   :  { %282 = vmatmul.bf16.gmra.mxu1 %v342_v40 }
  0x33   :  { %301 = vmatmul.bf16.gmra.mxu2 %v346_v41 }
  0x9e   :  { %v259_v42 = vpop.f32.mrf.mxu0 }
  0x9f   :  { %v278_v43 = vpop.f32.mrf.mxu1  ;;  %v260_v45 = vadd.f32 %v492_v44, %v259_v42 }
  0xa1   :  { %v279_v49 = vadd.f32 %v278_v43, %v260_v45 }
  0xa4   :  { %v264_v53 = vpop.f32.mrf.mxu3 }
  0xa5   :  { %v265_v60 = vadd.f32 %v492_v44, %v264_v53 }
  0xa6   :  { %v297_v46 = vpop.f32.mrf.mxu2  ;;  %v261_v47 = vpop.f32.mrf.mxu0 }
  0xa7   :  { %v280_v48 = vpop.f32.mrf.mxu1  ;;  %v262_v50 = vadd.f32 %v492_v44, %v261_v47  ;;  %v298_v51 = vadd.f32 %v297_v46, %v279_v49 }
  0xa9   :  { %v281_v52 = vadd.f32 %v280_v48, %v262_v50  ;;  %v307_v57 = vmax.f32 %v298_v51, 0.0 }
  0xac   :  { %v266_v62 = vpop.f32.mrf.mxu3 }
  0xad   :  { %v267_v1 = vadd.f32 %v492_v44, %v266_v62 }
  0xae   :  { %v299_v54 = vpop.f32.mrf.mxu2 }
  0xaf   :  { %v300_v55 = vadd.f32 %v299_v54, %v281_v52  ;;  %v283_v56 = vpop.f32.mrf.mxu1 }
  0xb0   :  { %v284_v63 = vadd.f32 %v283_v56, %v265_v60 }
  0xb1   :  { %v308_v58 = vmax.f32 %v300_v55, 0.0 }
  0xb3   :  { %v476_v59 = vpack.c.bf16 %v308_v58, %v307_v57 }
  0xb5   :  { %477 = vst [vmem:[%s633_s3] sm:$0xff] %v476_v59  }
  0xb6   :  { %v302_v61 = vpop.f32.mrf.mxu2 }
  0xb7   :  { %v285_v0 = vpop.f32.mrf.mxu1  ;;  %v303_v2 = vadd.f32 %v302_v61, %v284_v63 }
  0xb8   :  { %v286_v3 = vadd.f32 %v285_v0, %v267_v1 }
  0xb9   :  { %v309_v6 = vmax.f32 %v303_v2, 0.0 }
  0xbe   :  { %v304_v4 = vpop.f32.mrf.mxu2 }
  0xbf   :  { %v305_v5 = vadd.f32 %v304_v4, %v286_v3 }
  0xc1   :  { %v310_v7 = vmax.f32 %v305_v5, 0.0 }
  0xc3   :  { %v481_v8 = vpack.c.bf16 %v310_v7, %v309_v6 }
  0xc5   :  { %483 = vst [vmem:[%s633_s3 + $0x8] sm:$0xff] %v481_v8  }

// kernel: nf_resnet_forward.19
= control target key start
LH: loop header
LB: loop body
LE: loop exit
PB: predicated region body
PF: predicated region fallthrough
CT: control target
= control target key end

     0   :  { %v148_v2 = vmov 16.0   ;;  %s230_s0 = inlined_call_operand.vmem [shape: bf16[2,16,128], index: 0, kind: input, shape index: {}]   ;;  %s231_s1 = inlined_call_operand.vmem [shape: f32[128,128], index: 1, kind: input, shape index: {}]   ;;  %s232_s2 = inlined_call_operand.vmem [shape: f32[1,128], index: 2, kind: input, shape index: {}]   ;;  %s233_s3 = inlined_call_operand.hbm [shape: f32[2,128], index: 3, kind: output, shape index: {}]  }
   0x1   :  { %v61_v0 = vld [vmem:[%s231_s1 + $0x78] sm:$0xff]  ;;  %v60_v1 = vld [vmem:[%s231_s1 + $0x70] sm:$0xff]  ;;  %120 = vrcp.f32 %v148_v2  ;;  %v59_v3 = vld [vmem:[%s231_s1 + $0x68] sm:$0xff] }
   0x2   :  { %71 = vmatpush.msra.mxu0 %v61_v0  ;;  %v58_v4 = vld [vmem:[%s231_s1 + $0x60] sm:$0xff]  ;;  %v116_v6 = vld [vmem:[%s230_s0 + $0x8] sm:$0xff]   ;;  %v57_v7 = vld [vmem:[%s231_s1 + $0x58] sm:$0xff] }
   0x3   :  { %v109_v5 = vld [vmem:[%s230_s0] sm:$0xff]   ;;  %v114_v10 = vunpack.c.l.bf16 %v116_v6  ;;  %v115_v11 = vunpack.c.h.bf16 %v116_v6 }
   0x4   :  { %72 = vmatpush.msra.mxu0 %v60_v1  ;;  %v110_v8 = vunpack.c.l.bf16 %v109_v5  ;;  %v111_v9 = vunpack.c.h.bf16 %v109_v5 }
   0x6   :  { %73 = vmatpush.msra.mxu0 %v59_v3 }
   0x7   :  { %8 = vsyncpa [#allocation3], 0  ;;  %v121_v12 = vpop.eup %120  ;;  %v56_v13 = vld [vmem:[%s231_s1 + $0x50] sm:$0xff]  ;;  %v23_v14 = vadd.f32 %v111_v9, %v110_v8  ;;  %v30_v15 = vadd.f32 %v115_v11, %v114_v10  ;;  %v55_v17 = vld [vmem:[%s231_s1 + $0x48] sm:$0xff]  ;;  %vm68_vm1 = vcmask 1041409   ;;  %s149_s22 = smov [#allocation2]  }
   0x8   :  { %74 = vmatpush.msra.mxu0 %v58_v4  ;;  %v38_v16 = vmul.f32 16.0, %v121_v12  ;;  %v54_v21 = vld [vmem:[%s231_s1 + $0x40] sm:$0xff]  ;;  %v53_v24 = vld [vmem:[%s231_s1 + $0x38] sm:$0xff]  ;;  %v52_v28 = vld [vmem:[%s231_s1 + $0x30] sm:$0xff]  ;;  %vm42_vm0 = vweird.f32 %v121_v12  ;;  %s97_s23 = sshll.u32 %s149_s22, 4  ;;  %s99_s26 = sshll.u32 %s233_s3, 4  ;;  %s98_s23 = int_to_ptr.vmem [resolvable:$true] %s97_s23  ;;  %s100_s26 = int_to_ptr.hbm [resolvable:$true] %s99_s26 }
   0x9   :  { %v24_v18 = vrot.slane %v23_v14, 4  ;;  %v31_v19 = vrot.slane %v30_v15, 4  ;;  %v51_v31 = vld [vmem:[%s231_s1 + $0x28] sm:$0xff]  ;;  %v50_v35 = vld [vmem:[%s231_s1 + $0x20] sm:$0xff]  ;;  %v49_v38 = vld [vmem:[%s231_s1 + $0x18] sm:$0xff] }
   0xa   :  { %75 = vmatpush.msra.mxu0 %v57_v7  ;;  %v39_v20 = vsub.f32 1.0, %v38_v16  ;;  %v48_v40 = vld [vmem:[%s231_s1 + $0x10] sm:$0xff]  ;;  %v47_v43 = vld [vmem:[%s231_s1 + $0x8] sm:$0xff]  ;;  %v46_v44 = vld [vmem:[%s231_s1] sm:$0xff] }
   0xb   :  { %v25_v22 = vadd.f32 %v24_v18, %v23_v14  ;;  %v32_v23 = vadd.f32 %v31_v19, %v30_v15  ;;  %v119_v46 = vld [vmem:[%s232_s2] ss:$0 sm:$0xff] }
   0xc   :  { %76 = vmatpush.msra.mxu0 %v56_v13  ;;  %v40_v27 = vmul.f32 %v121_v12, %v39_v20 }
   0xd   :  { %v26_v25 = vrot.slane %v25_v22, 2  ;;  %v33_v26 = vrot.slane %v32_v23, 2 }
   0xe   :  { %77 = vmatpush.msra.mxu0 %v55_v17  ;;  %v41_v34 = vadd.f32 %v121_v12, %v40_v27 }
   0xf   :  { %v27_v29 = vadd.f32 %v26_v25, %v25_v22  ;;  %v34_v30 = vadd.f32 %v33_v26, %v32_v23 }
  0x10   :  { %78 = vmatpush.msra.mxu0 %v54_v21  ;;  %v43_v39 = vsel %vm42_vm0, %v121_v12, %v41_v34 }
  0x11   :  { %v28_v32 = vrot.slane %v27_v29, 1  ;;  %v35_v33 = vrot.slane %v34_v30, 1 }
  0x12   :  { %79 = vmatpush.msra.mxu0 %v53_v24 }
  0x13   :  { %v29_v36 = vadd.f32 %v28_v32, %v27_v29  ;;  %v36_v37 = vadd.f32 %v35_v33, %v34_v30 }
  0x14   :  { %80 = vmatpush.msra.mxu0 %v52_v28 }
  0x15   :  { %v44_v41 = vmul.f32 %v43_v39, %v29_v36  ;;  %v45_v42 = vmul.f32 %v43_v39, %v36_v37 }
  0x16   :  { %81 = vmatpush.msra.mxu0 %v51_v31 }
  0x17   :  { %v69_v45 = vsel %vm68_vm1, %v45_v42, %v44_v41 }
  0x18   :  { %82 = vmatpush.msra.mxu0 %v50_v35 }
  0x1a   :  { %83 = vmatpush.msra.mxu0 %v49_v38 }
  0x1c   :  { %84 = vmatpush.msra.mxu0 %v48_v40 }
  0x1e   :  { %85 = vmatpush.msra.mxu0 %v47_v43 }
  0x20   :  { %86 = vmatpush.msra.mxu0 %v46_v44 }
  0x21   :  { %87 = vmatmul.f32.vlgmr.msra.gmra.mxu0 %v69_v45 }
  0x9e   :  { %v88_v47 = vpop.f32.mrf.mxu0 }
  0x9f   :  { %v89_v48 = vadd.f32 %v119_v46, %v88_v47 }
  0xa1   :  { %91 = vst [vmem:[#allocation2] sm:$0x3] %v89_v48 }
  0xa2   :  { %102 = dma.vmem_to_hbm [thread:$0]  %s98_s23, 32, %s100_s26, [#allocation3]  }
  0xa3   :  { %146 = dma.done.wait [#allocation3], 32  }
  0xa4   :  { %147 = vsyncadd [#allocation3], 4294967264 }
  0xa5   :  { %107 = vsyncpa [#allocation3], 1 }

// kernel: nf_resnet_forward.18
= control target key start
LH: loop header
LB: loop body
LE: loop exit
PB: predicated region body
PF: predicated region fallthrough
CT: control target
= control target key end

     0   :  { %s1023_s1 = inlined_call_operand.vmem [shape: bf16[640,128], index: 1, kind: input, shape index: {}]   ;;  %s1024_s2 = inlined_call_operand.vmem [shape: f32[1,128], index: 2, kind: input, shape index: {}]   ;;  %s1025_s0 = inlined_call_operand.vmem [shape: bf16[32,640], index: 0, kind: input, shape index: {}]   ;;  %s1026_s3 = inlined_call_operand.vmem [shape: bf16[32,128], index: 3, kind: input, shape index: {}]   ;;  %s1027_s4 = inlined_call_operand.vmem [shape: bf16[32,128], index: 4, kind: output, shape index: {}]  }
   0x1   :  { %v741_v0 = vld [vmem:[%s1023_s1 + $0x38] sm:$0xff]  ;;  %v740_v4 = vld [vmem:[%s1023_s1 + $0x30] sm:$0xff]  ;;  %v739_v8 = vld [vmem:[%s1023_s1 + $0x28] sm:$0xff] }
   0x2   :  { %v749_v1 = vld [vmem:[%s1023_s1 + $0x78] sm:$0xff]  ;;  %405 = vmatpush.bf16.msra.mxu0 %v741_v0  ;;  %v748_v5 = vld [vmem:[%s1023_s1 + $0x70] sm:$0xff]  ;;  %v747_v9 = vld [vmem:[%s1023_s1 + $0x68] sm:$0xff] }
   0x3   :  { %v757_v2 = vld [vmem:[%s1023_s1 + $0xb8] sm:$0xff]  ;;  %424 = vmatpush.bf16.msra.mxu1 %v749_v1  ;;  %v756_v6 = vld [vmem:[%s1023_s1 + $0xb0] sm:$0xff]  ;;  %v755_v10 = vld [vmem:[%s1023_s1 + $0xa8] sm:$0xff] }
   0x4   :  { %v765_v3 = vld [vmem:[%s1023_s1 + $0xf8] sm:$0xff]  ;;  %443 = vmatpush.bf16.msra.mxu2 %v757_v2  ;;  %v764_v7 = vld [vmem:[%s1023_s1 + $0xf0] sm:$0xff]  ;;  %v763_v11 = vld [vmem:[%s1023_s1 + $0xe8] sm:$0xff] }
   0x5   :  { %462 = vmatpush.bf16.msra.mxu3 %v765_v3  ;;  %v738_v12 = vld [vmem:[%s1023_s1 + $0x20] sm:$0xff]  ;;  %v737_v16 = vld [vmem:[%s1023_s1 + $0x18] sm:$0xff]  ;;  %v736_v20 = vld [vmem:[%s1023_s1 + $0x10] sm:$0xff] }
   0x6   :  { %406 = vmatpush.bf16.msra.mxu0 %v740_v4  ;;  %v746_v13 = vld [vmem:[%s1023_s1 + $0x60] sm:$0xff]  ;;  %v745_v17 = vld [vmem:[%s1023_s1 + $0x58] sm:$0xff]  ;;  %v744_v21 = vld [vmem:[%s1023_s1 + $0x50] sm:$0xff] }
   0x7   :  { %425 = vmatpush.bf16.msra.mxu1 %v748_v5  ;;  %v754_v14 = vld [vmem:[%s1023_s1 + $0xa0] sm:$0xff]  ;;  %v753_v18 = vld [vmem:[%s1023_s1 + $0x98] sm:$0xff]  ;;  %v752_v22 = vld [vmem:[%s1023_s1 + $0x90] sm:$0xff] }
   0x8   :  { %444 = vmatpush.bf16.msra.mxu2 %v756_v6  ;;  %v762_v15 = vld [vmem:[%s1023_s1 + $0xe0] sm:$0xff]  ;;  %v761_v19 = vld [vmem:[%s1023_s1 + $0xd8] sm:$0xff]  ;;  %v760_v23 = vld [vmem:[%s1023_s1 + $0xd0] sm:$0xff] }
   0x9   :  { %463 = vmatpush.bf16.msra.mxu3 %v764_v7  ;;  %v735_v24 = vld [vmem:[%s1023_s1 + $0x8] sm:$0xff]  ;;  %v734_v28 = vld [vmem:[%s1023_s1] sm:$0xff]  ;;  %v726_v33 = vld [vmem:[%s1025_s0 + $0x10] sm:$0xf0] }
   0xa   :  { %407 = vmatpush.bf16.msra.mxu0 %v739_v8  ;;  %v743_v25 = vld [vmem:[%s1023_s1 + $0x48] sm:$0xff]  ;;  %v742_v29 = vld [vmem:[%s1023_s1 + $0x40] sm:$0xff]  ;;  %v528_v35 = vld [vmem:[%s1025_s0 + $0x14] sm:$0xf0] }
   0xb   :  { %426 = vmatpush.bf16.msra.mxu1 %v747_v9  ;;  %v751_v26 = vld [vmem:[%s1023_s1 + $0x88] sm:$0xff]  ;;  %v750_v30 = vld [vmem:[%s1023_s1 + $0x80] sm:$0xff]  ;;  %v727_v37 = vld [vmem:[%s1025_s0 + $0x18] sm:$0xf0] }
   0xc   :  { %445 = vmatpush.bf16.msra.mxu2 %v755_v10  ;;  %v759_v27 = vld [vmem:[%s1023_s1 + $0xc8] sm:$0xff]  ;;  %v758_v31 = vld [vmem:[%s1023_s1 + $0xc0] sm:$0xff]  ;;  %v773_v40 = vld [vmem:[%s1023_s1 + $0x138] sm:$0xff] }
   0xd   :  { %464 = vmatpush.bf16.msra.mxu3 %v763_v11  ;;  %v526_v32 = vld [vmem:[%s1025_s0] sm:$0xf]  ;;  %v724_v34 = vld [vmem:[%s1025_s0 + $0x4] sm:$0xf]  ;;  %v534_v36 = vld [vmem:[%s1025_s0 + $0x8] sm:$0xf] }
   0xe   :  { %408 = vmatpush.bf16.msra.mxu0 %v738_v12  ;;  %v725_v38 = vld [vmem:[%s1025_s0 + $0xc] sm:$0xf]  ;;  %v536_v39 = vld [vmem:[%s1025_s0 + $0x1c] sm:$0xf0]  ;;  %v527_v41 = vor.u32 %v726_v33, %v526_v32  ;;  %v531_v42 = vor.u32 %v724_v34, %v528_v35  ;;  %v535_v43 = vor.u32 %v727_v37, %v534_v36  ;;  %v772_v45 = vld [vmem:[%s1023_s1 + $0x130] sm:$0xff] }
   0xf   :  { %427 = vmatpush.bf16.msra.mxu1 %v746_v13  ;;  %v539_v44 = vor.u32 %v725_v38, %v536_v39  ;;  %v771_v46 = vld [vmem:[%s1023_s1 + $0x128] sm:$0xff]  ;;  %v770_v47 = vld [vmem:[%s1023_s1 + $0x120] sm:$0xff]  ;;  %v731_v49 = vld [vmem:[%s1025_s0 + $0x38] sm:$0xf0] }
  0x10   :  { %446 = vmatpush.bf16.msra.mxu2 %v754_v14  ;;  %v546_v48 = vld [vmem:[%s1025_s0 + $0x28] sm:$0xf]  ;;  %v729_v50 = vld [vmem:[%s1025_s0 + $0x2c] sm:$0xf]  ;;  %v548_v51 = vld [vmem:[%s1025_s0 + $0x3c] sm:$0xf0] }
  0x11   :  { %465 = vmatpush.bf16.msra.mxu3 %v762_v15  ;;  %v554_v52 = vld [vmem:[%s1025_s0 + $0x30] sm:$0xf]  ;;  %v732_v53 = vld [vmem:[%s1025_s0 + $0x40] sm:$0xf0]  ;;  %v730_v54 = vld [vmem:[%s1025_s0 + $0x34] sm:$0xf]  ;;  %v547_v57 = vor.u32 %v731_v49, %v546_v48  ;;  %v551_v58 = vor.u32 %v729_v50, %v548_v51 }
  0x12   :  { %409 = vmatpush.bf16.msra.mxu0 %v737_v16  ;;  %v556_v55 = vld [vmem:[%s1025_s0 + $0x44] sm:$0xf0]  ;;  %v769_v56 = vld [vmem:[%s1023_s1 + $0x118] sm:$0xff]  ;;  %v555_v59 = vor.u32 %v732_v53, %v554_v52  ;;  %v768_v61 = vld [vmem:[%s1023_s1 + $0x110] sm:$0xff] }
  0x13   :  { %428 = vmatpush.bf16.msra.mxu1 %v745_v17  ;;  %v559_v60 = vor.u32 %v730_v54, %v556_v55  ;;  %v767_v62 = vld [vmem:[%s1023_s1 + $0x108] sm:$0xff]  ;;  %v766_v63 = vld [vmem:[%s1023_s1 + $0x100] sm:$0xff]  ;;  %v542_v0 = vld [vmem:[%s1025_s0 + $0x10] sm:$0xf] }
  0x14   :  { %447 = vmatpush.bf16.msra.mxu2 %v753_v18  ;;  %v728_v1 = vld [vmem:[%s1025_s0 + $0x20] sm:$0xf0]  ;;  %v562_v2 = vld [vmem:[%s1025_s0 + $0x38] sm:$0xf]  ;;  %v733_v3 = vld [vmem:[%s1025_s0 + $0x48] sm:$0xf0] }
  0x15   :  { %466 = vmatpush.bf16.msra.mxu3 %v761_v19  ;;  %v543_v4 = vor.u32 %v728_v1, %v542_v0  ;;  %v563_v5 = vor.u32 %v733_v3, %v562_v2  ;;  %v802_v16 = vld [vmem:[%s1024_s2] ss:$0 sm:$0xff]  ;;  %v792_v37 = vld [vmem:[%s1026_s3 + $0x8] sm:$0xff]  }
  0x16   :  { %410 = vmatpush.bf16.msra.mxu0 %v736_v20  ;;  %v775_v36 = vld [vmem:[%s1026_s3] sm:$0xff]  }
  0x17   :  { %429 = vmatpush.bf16.msra.mxu1 %v744_v21 }
  0x18   :  { %448 = vmatpush.bf16.msra.mxu2 %v752_v22 }
  0x19   :  { %467 = vmatpush.bf16.msra.mxu3 %v760_v23 }
  0x1a   :  { %411 = vmatpush.bf16.msra.mxu0 %v735_v24 }
  0x1b   :  { %430 = vmatpush.bf16.msra.mxu1 %v743_v25 }
  0x1c   :  { %449 = vmatpush.bf16.msra.mxu2 %v751_v26 }
  0x1d   :  { %468 = vmatpush.bf16.msra.mxu3 %v759_v27 }
  0x1e   :  { %412 = vmatpush.bf16.msra.mxu0 %v734_v28 }
  0x1f   :  { %431 = vmatpush.bf16.msra.mxu1 %v742_v29 }
  0x20   :  { %450 = vmatpush.bf16.msra.mxu2 %v750_v30 }
  0x21   :  { %469 = vmatpush.bf16.msra.mxu3 %v758_v31  ;;  %413 = vmatmul.bf16.vlgmr.msra.gmra.mxu0 %v527_v41  ;;  %v776_v41 = vunpack.c.l.bf16 %v775_v36 }
  0x22   :  { %481 = vmatpush.bf16.msrb.mxu0 %v773_v40  ;;  %432 = vmatmul.bf16.vlgmr.msra.gmra.mxu1 %v531_v42  ;;  %v780_v42 = vunpack.c.l.bf16 %v792_v37 }
  0x23   :  { %794 = vmatpush.bf16.msrb.mxu1 %v773_v40  ;;  %451 = vmatmul.bf16.vlgmr.msra.gmra.mxu2 %v535_v43  ;;  %v777_v43 = vunpack.c.h.bf16 %v775_v36 }
  0x24   :  { %470 = vmatmul.bf16.vlgmr.msra.gmra.mxu3 %v539_v44  ;;  %v781_v44 = vunpack.c.h.bf16 %v792_v37 }
  0x26   :  { %482 = vmatpush.bf16.msrb.mxu0 %v772_v45 }
  0x27   :  { %795 = vmatpush.bf16.msrb.mxu1 %v772_v45 }
  0x2a   :  { %483 = vmatpush.bf16.msrb.mxu0 %v771_v46 }
  0x2b   :  { %796 = vmatpush.bf16.msrb.mxu1 %v771_v46 }
  0x2e   :  { %484 = vmatpush.bf16.msrb.mxu0 %v770_v47 }
  0x2f   :  { %797 = vmatpush.bf16.msrb.mxu1 %v770_v47 }
  0x31   :  { %418 = vmatmul.bf16.gmra.mxu0 %v547_v57 }
  0x32   :  { %485 = vmatpush.bf16.msrb.mxu0 %v769_v56  ;;  %437 = vmatmul.bf16.gmra.mxu1 %v551_v58 }
  0x33   :  { %798 = vmatpush.bf16.msrb.mxu1 %v769_v56  ;;  %456 = vmatmul.bf16.gmra.mxu2 %v555_v59 }
  0x34   :  { %475 = vmatmul.bf16.gmra.mxu3 %v559_v60 }
  0x36   :  { %486 = vmatpush.bf16.msrb.mxu0 %v768_v61 }
  0x37   :  { %799 = vmatpush.bf16.msrb.mxu1 %v768_v61 }
  0x3a   :  { %487 = vmatpush.bf16.msrb.mxu0 %v767_v62 }
  0x3b   :  { %800 = vmatpush.bf16.msrb.mxu1 %v767_v62 }
  0x3e   :  { %488 = vmatpush.bf16.msrb.mxu0 %v766_v63 }
  0x3f   :  { %801 = vmatpush.bf16.msrb.mxu1 %v766_v63 }
  0x41   :  { %489 = vmatmul.bf16.vlgmr.msrb.gmra.mxu0 %v543_v4 }
  0x42   :  { %494 = vmatmul.bf16.vlgmr.msrb.gmra.mxu1 %v563_v5 }
  0x9e   :  { %v414_v6 = vpop.f32.mrf.mxu0 }
  0x9f   :  { %v433_v7 = vpop.f32.mrf.mxu1  ;;  %v415_v20 = vadd.f32 %v802_v16, %v414_v6 }
  0xa1   :  { %v434_v25 = vadd.f32 %v433_v7, %v415_v20 }
  0xa6   :  { %v452_v8 = vpop.f32.mrf.mxu2  ;;  %v416_v10 = vpop.f32.mrf.mxu0 }
  0xa7   :  { %v471_v9 = vpop.f32.mrf.mxu3  ;;  %v435_v11 = vpop.f32.mrf.mxu1  ;;  %v417_v23 = vadd.f32 %v802_v16, %v416_v10  ;;  %v453_v30 = vadd.f32 %v452_v8, %v434_v25 }
  0xa9   :  { %v436_v31 = vadd.f32 %v435_v11, %v417_v23  ;;  %v472_v38 = vadd.f32 %v471_v9, %v453_v30 }
  0xae   :  { %v454_v12 = vpop.f32.mrf.mxu2  ;;  %v419_v13 = vpop.f32.mrf.mxu0 }
  0xaf   :  { %v438_v14 = vpop.f32.mrf.mxu1  ;;  %v473_v15 = vpop.f32.mrf.mxu3  ;;  %v420_v21 = vadd.f32 %v802_v16, %v419_v13  ;;  %v455_v34 = vadd.f32 %v454_v12, %v436_v31 }
  0xb1   :  { %v439_v26 = vadd.f32 %v438_v14, %v420_v21  ;;  %v474_v45 = vadd.f32 %v473_v15, %v455_v34 }
  0xb6   :  { %v457_v17 = vpop.f32.mrf.mxu2  ;;  %v421_v18 = vpop.f32.mrf.mxu0 }
  0xb7   :  { %v440_v19 = vpop.f32.mrf.mxu1  ;;  %v476_v22 = vpop.f32.mrf.mxu3  ;;  %v422_v24 = vadd.f32 %v802_v16, %v421_v18  ;;  %v458_v32 = vadd.f32 %v457_v17, %v439_v26 }
  0xb9   :  { %v441_v33 = vadd.f32 %v440_v19, %v422_v24  ;;  %v477_v39 = vadd.f32 %v476_v22, %v458_v32 }
  0xbe   :  { %v459_v27 = vpop.f32.mrf.mxu2  ;;  %v490_v28 = vpop.f32.mrf.mxu0 }
  0xbf   :  { %v495_v29 = vpop.f32.mrf.mxu1  ;;  %v460_v35 = vadd.f32 %v459_v27, %v441_v33  ;;  %v478_v40 = vpop.f32.mrf.mxu3  ;;  %v491_v47 = vadd.f32 %v490_v28, %v472_v38 }
  0xc0   :  { %v496_v48 = vadd.f32 %v495_v29, %v477_v39 }
  0xc1   :  { %v479_v46 = vadd.f32 %v478_v40, %v460_v35  ;;  %v508_v53 = vadd.f32 %v776_v41, %v491_v47 }
  0xc2   :  { %v510_v54 = vadd.f32 %v780_v42, %v496_v48 }
  0xc6   :  { %v492_v49 = vpop.f32.mrf.mxu0 }
  0xc7   :  { %v497_v50 = vpop.f32.mrf.mxu1  ;;  %v493_v51 = vadd.f32 %v492_v49, %v474_v45 }
  0xc8   :  { %v498_v52 = vadd.f32 %v497_v50, %v479_v46 }
  0xc9   :  { %v509_v55 = vadd.f32 %v777_v43, %v493_v51 }
  0xca   :  { %v511_v56 = vadd.f32 %v781_v44, %v498_v52 }
  0xcb   :  { %v785_v57 = vpack.c.bf16 %v509_v55, %v508_v53 }
  0xcc   :  { %v790_v58 = vpack.c.bf16 %v511_v56, %v510_v54 }
  0xcd   :  { %786 = vst [vmem:[%s1027_s4] sm:$0xff] %v785_v57  }
  0xce   :  { %793 = vst [vmem:[%s1027_s4 + $0x8] sm:$0xff] %v790_v58  }

</bundles_post_ra>
